<compile_context>
chip_gen: v5e
topology: v5e:2x2
jax: 0.10.0
libtpu: 0.0.40
codegen_flags: <defaults>
</compile_context>

<pallas_src>
import functools

import jax
import jax.numpy as jnp
from jax import lax
from jax.experimental import pallas as pl
from jax.experimental.pallas import tpu as pltpu


# ------------------------------------------------------------------ kernel

def _bilstm_kernel(*refs, num_layers, T, B, H):
    """Fused multi-layer bidirectional LSTM + Linear head.

    refs layout:
      refs[0]              : x        (T*B, D)   time-major, flattened
      refs[1]              : x_rev    (T*B, D)   time-reversed copy (host-built)
      refs[2 : 2+4L]       : per layer (W1 (Din,8H), W2 (Din,8H),
                                        Whh_bd (2H,8H), b (1,8H))
      refs[2+4L .. 4+4L]   : fcw_f (2H,O), fcw_b (2H,O), fc_b (1,O)
      refs[5+4L]           : out      (B, O)
      refs[6+4L:]          : scratch  zm (T*B,8H), hs (T*B,2H), hs_rev (T*B,2H)
    """
    H2 = 2 * H
    G = 8 * H

    x_ref, xrev_ref = refs[0], refs[1]
    w_refs = refs[2:2 + 4 * num_layers]
    fcwf_ref = refs[2 + 4 * num_layers]
    fcwb_ref = refs[3 + 4 * num_layers]
    fcb_ref = refs[4 + 4 * num_layers]
    out_ref = refs[5 + 4 * num_layers]
    zm_ref, hs_ref, hsr_ref = refs[6 + 4 * num_layers:]

    # g-gate lane mask (hoisted, computed once).
    lane = lax.broadcasted_iota(jnp.int32, (B, G), 1)
    g_mask = (lane >= 4 * H) & (lane < 6 * H)

    h = jnp.zeros((B, H2), jnp.float32)
    h_first = h

    for layer in range(num_layers):
        w1_ref, w2_ref, whh_ref, b_ref = w_refs[4 * layer:4 * layer + 4]

        if layer == 0:
            src, src_rev = x_ref, xrev_ref
        else:
            # One vectorized time-reversal fix-up per layer (off the serial
            # per-step chain): hs is stored in computation order
            # (row s = [h_f(s) | h_b(T-1-s)]), hs_rev is its block reversal.
            for t in range(T):
                hsr_ref[t * B:(t + 1) * B, :] = hs_ref[(T - 1 - t) * B:(T - t) * B, :]
            src, src_rev = hs_ref, hsr_ref

        # Hoisted, direction-merged pre-activation for ALL T steps of BOTH
        # directions: row s of zm already holds
        #   [fwd gate cols for time s | bwd gate cols for time T-1-s],
        # with the (b_ih + b_hh) bias and the 2x g-gate pre-scale folded in.
        zm_ref[...] = (
            jnp.dot(src[...], w1_ref[...], preferred_element_type=jnp.float32)
            + jnp.dot(src_rev[...], w2_ref[...], preferred_element_type=jnp.float32)
            + b_ref[...])

        whh = whh_ref[...]                      # hoisted out of the time loop
        h = jnp.zeros((B, H2), jnp.float32)     # [h_fwd | h_bwd] as a value
        c = jnp.zeros((B, H2), jnp.float32)     # [c_fwd | c_bwd] as a value

        # Fully unrolled time recurrence (T static & small); state lives in
        # vregs, no VMEM round-trip on the critical path.
        for s in range(T):
            z = zm_ref[s * B:(s + 1) * B, :] + jnp.dot(
                h, whh, preferred_element_type=jnp.float32)
            sg = jax.nn.sigmoid(z)
            # g gate via tanh(x) = 2*sigmoid(2x) - 1 (2x pre-folded on host).
            gates = jnp.where(g_mask, 2.0 * sg - 1.0, sg)
            i_g = gates[:, 0 * H2:1 * H2]
            f_g = gates[:, 1 * H2:2 * H2]
            g_g = gates[:, 2 * H2:3 * H2]
            o_g = gates[:, 3 * H2:4 * H2]
            c = f_g * c + i_g * g_g
            h = o_g * jnp.tanh(c)
            # Single full-width store per step (computation order).
            hs_ref[s * B:(s + 1) * B, :] = h
            if s == 0:
                h_first = h

    # FC head on out[:, -1, :] = [h_f(T-1) | h_b(T-1)].
    # In computation order h_f(T-1) is in the LAST step's h and h_b(T-1) is in
    # the FIRST step's h; the half-masked FC weights select the right halves,
    # so no lane slicing and no re-load from VMEM.
    out_ref[...] = (
        jnp.dot(h, fcwf_ref[...], preferred_element_type=jnp.float32)
        + jnp.dot(h_first, fcwb_ref[...], preferred_element_type=jnp.float32)
        + fcb_ref[...])


# ------------------------------------------------------------------ wrapper

@jax.jit
def bilstm_forward(x, layer_params, fcw_f, fcw_b, fc_b_row):
    """x: (B, T, D) float32, batch_first (like the PyTorch module).

    layer_params: tuple of (W1 (Din,8H), W2 (Din,8H), Whh_bd (2H,8H), b (1,8H))
                  per layer (produced by prep_kernel_params).
    """
    B, T, D = x.shape
    H2 = layer_params[0][2].shape[0]   # Whh is (2H, 8H)
    H = H2 // 2
    O = fcw_f.shape[1]
    num_layers = len(layer_params)

    # Time-major, flattened so the kernel never reshapes: row t*B+b <-> (t, b).
    x_tbd = jnp.transpose(x, (1, 0, 2))
    x_tm = x_tbd.reshape(T * B, D)
    x_rev = x_tbd[::-1].reshape(T * B, D)   # time-reversed copy built on host

    flat_w = [w for lp in layer_params for w in lp]
    n_in = 2 + 4 * num_layers + 3

    kernel = functools.partial(_bilstm_kernel,
                               num_layers=num_layers, T=T, B=B, H=H)

    return pl.pallas_call(
        kernel,
        out_shape=jax.ShapeDtypeStruct((B, O), jnp.float32),
        in_specs=[pl.BlockSpec(memory_space=pltpu.MemorySpace.VMEM)] * n_in,
        out_specs=pl.BlockSpec(memory_space=pltpu.MemorySpace.VMEM),
        scratch_shapes=[
            pltpu.VMEM((T * B, 8 * H), jnp.float32),   # zm: merged pre-acts
            pltpu.VMEM((T * B, H2), jnp.float32),      # hs: per-step h (comp. order)
            pltpu.VMEM((T * B, H2), jnp.float32),      # hs_rev: time-reversed hs
        ],
        compiler_params=pltpu.CompilerParams(
            vmem_limit_bytes=32 * 1024 * 1024),
    )(x_tm, x_rev, *flat_w, fcw_f, fcw_b, fc_b_row)


# ------------------------------------------------------------------ params

def init_params(key, input_dim, hidden_dim, output_dim, num_layers):
    """Raw PyTorch-style params: per layer, per direction (w_ih, w_hh, b_ih+b_hh)."""
    k = 1.0 / jnp.sqrt(hidden_dim)
    H4 = 4 * hidden_dim

    def u(kk, shape, bound):
        return jax.random.uniform(kk, shape, jnp.float32, -bound, bound)

    raw = []
    for layer in range(num_layers):
        d_in = input_dim if layer == 0 else 2 * hidden_dim
        dirs = []
        for _ in range(2):  # forward, backward
            key, k1, k2, k3, k4 = jax.random.split(key, 5)
            w_ih = u(k1, (H4, d_in), k)            # PyTorch (4H, in)
            w_hh = u(k2, (H4, hidden_dim), k)      # PyTorch (4H, H)
            b_ih = u(k3, (H4,), k)
            b_hh = u(k4, (H4,), k)
            dirs.append((w_ih, w_hh, b_ih + b_hh))
        raw.append(tuple(dirs))

    key, k1, k2 = jax.random.split(key, 3)
    kf = 1.0 / jnp.sqrt(2 * hidden_dim)
    fc_w = jax.random.uniform(k1, (output_dim, 2 * hidden_dim), jnp.float32, -kf, kf)
    fc_b = jax.random.uniform(k2, (output_dim,), jnp.float32, -kf, kf)
    return raw, fc_w, fc_b


def prep_kernel_params(raw_lstm_params, fc_w, fc_b):
    """Convert PyTorch-layout weights to the fused-kernel layout.

    Gate column layout over 8H: [i_f, i_b, f_f, f_b, g_f, g_b, o_f, o_b]
    (each H wide), g columns pre-scaled by 2 (tanh(x) = 2*sigmoid(2x)-1).
    The recurrent weight is block-diagonal over the two directions.

    Each layer's input weight Wx is split into (W1, W2) so the kernel can form
    the direction-merged pre-activation zm = src @ W1 + src_rev @ W2 + b in one
    vectorized pass, where (src, src_rev) is (x, x time-reversed) for layer 0
    and (hs in computation order, hs time-reversed) for layers >= 1.
    The FC weight is split into half-row-masked (fcw_f, fcw_b) so the head can
    consume the live last-step / first-step h vregs directly.
    """
    H = raw_lstm_params[0][0][1].shape[1]
    H2 = 2 * H
    G = 8 * H
    col_fwd = (jnp.arange(G) % H2) < H            # forward-direction columns

    layer_ws = []
    for layer, (fwd, bwd) in enumerate(raw_lstm_params):
        d_in = fwd[0].shape[1]
        wx = jnp.zeros((d_in, G), jnp.float32)
        whh = jnp.zeros((H2, G), jnp.float32)
        b = jnp.zeros((1, G), jnp.float32)
        for d, (w_ih, w_hh, bias) in enumerate((fwd, bwd)):
            for q in range(4):  # PyTorch gate order: i, f, g, o
                scale = 2.0 if q == 2 else 1.0
                col = slice(2 * q * H + d * H, 2 * q * H + (d + 1) * H)
                row = slice(q * H, (q + 1) * H)
                wx = wx.at[:, col].set(scale * w_ih[row, :].T)
                whh = whh.at[d * H:(d + 1) * H, col].set(scale * w_hh[row, :].T)
                b = b.at[0, col].set(scale * bias[row])

        cf = col_fwd[None, :]
        if layer == 0:
            # sources are (x(t), x(T-1-t)): fwd cols read src, bwd cols src_rev.
            w1 = jnp.where(cf, wx, 0.0)
            w2 = jnp.where(cf, 0.0, wx)
        else:
            # sources are (hs, hs_rev) with hs row s = [h_f(s) | h_b(T-1-s)].
            rf = (jnp.arange(H2) < H)[:, None]    # rows multiplying h_f
            w1 = jnp.where((rf & cf) | (~rf & ~cf), wx, 0.0)
            w2 = jnp.where((~rf & cf) | (rf & ~cf), wx, 0.0)
        layer_ws.append((w1, w2, whh, b))

    fcw = fc_w.T                                   # (2H, O)
    rows = jnp.arange(H2)[:, None]
    fcw_f = jnp.where(rows < H, fcw, 0.0)          # consumes fwd half of h_last
    fcw_b = jnp.where(rows >= H, fcw, 0.0)         # consumes bwd half of h_first
    return tuple(layer_ws), fcw_f, fcw_b, fc_b[None, :]


# ------------------------------------------------------------------ reference

def _lstm_dir_ref(x_tbd, w_ih, w_hh, b):
    """Standard single-direction LSTM with raw PyTorch-layout weights."""
    H = w_hh.shape[1]
    B = x_tbd.shape[1]

    def step(carry, xt):
        h, c = carry
        z = xt @ w_ih.T + h @ w_hh.T + b
        i = jax.nn.sigmoid(z[:, :H])
        f = jax.nn.sigmoid(z[:, H:2 * H])
        g = jnp.tanh(z[:, 2 * H:3 * H])
        o = jax.nn.sigmoid(z[:, 3 * H:])
        c = f * c + i * g
        h = o * jnp.tanh(c)
        return (h, c), h

    (_, _), hs = lax.scan(step, (jnp.zeros((B, H)), jnp.zeros((B, H))), x_tbd)
    return hs


def bilstm_ref(x, raw_lstm_params, fc_w, fc_b):
    layer_in = jnp.transpose(x, (1, 0, 2))
    for (fwd, bwd) in raw_lstm_params:
        h_f = _lstm_dir_ref(layer_in, *fwd)
        h_b = _lstm_dir_ref(layer_in[::-1], *bwd)[::-1]
        layer_in = jnp.concatenate([h_f, h_b], axis=-1)
    return layer_in[-1] @ fc_w.T + fc_b


# ------------------------------------------------------------------ main

if __name__ == "__main__":
    INPUT_DIM, HIDDEN_DIM, OUTPUT_DIM, NUM_LAYERS = 32, 32, 4, 2
    BATCH, SEQ = 2, 8

    key = jax.random.PRNGKey(0)
    key, xkey = jax.random.split(key)
    x = jax.random.normal(xkey, (BATCH, SEQ, INPUT_DIM), jnp.float32)

    raw_params, fc_w, fc_b = init_params(
        key, INPUT_DIM, HIDDEN_DIM, OUTPUT_DIM, NUM_LAYERS)
    layer_ws, fcw_f, fcw_b, fc_b_row = prep_kernel_params(raw_params, fc_w, fc_b)

    out = bilstm_forward(x, layer_ws, fcw_f, fcw_b, fc_b_row)
    out = jax.block_until_ready(out)

    ref = bilstm_ref(x, raw_params, fc_w, fc_b)
    assert out.shape == (BATCH, OUTPUT_DIM)
    assert jnp.allclose(out, ref, atol=1e-4, rtol=1e-4), (out, ref)

    print("KERNEL_OK")
</pallas_src>

<mosaic_0001>
module attributes {stable_mosaic.version = 11 : i64} {
  func.func @_bilstm_kernel(%arg0: memref<16x32xf32, #tpu.memory_space<vmem>>, %arg1: memref<16x32xf32, #tpu.memory_space<vmem>>, %arg2: memref<32x256xf32, #tpu.memory_space<vmem>>, %arg3: memref<32x256xf32, #tpu.memory_space<vmem>>, %arg4: memref<64x256xf32, #tpu.memory_space<vmem>>, %arg5: memref<1x256xf32, #tpu.memory_space<vmem>>, %arg6: memref<64x256xf32, #tpu.memory_space<vmem>>, %arg7: memref<64x256xf32, #tpu.memory_space<vmem>>, %arg8: memref<64x256xf32, #tpu.memory_space<vmem>>, %arg9: memref<1x256xf32, #tpu.memory_space<vmem>>, %arg10: memref<64x4xf32, #tpu.memory_space<vmem>>, %arg11: memref<64x4xf32, #tpu.memory_space<vmem>>, %arg12: memref<1x4xf32, #tpu.memory_space<vmem>>, %arg13: memref<2x4xf32, #tpu.memory_space<vmem>>, %arg14: memref<16x256xf32, #tpu.memory_space<vmem>>, %arg15: memref<16x64xf32, #tpu.memory_space<vmem>>, %arg16: memref<16x64xf32, #tpu.memory_space<vmem>>) attributes {dimension_semantics = [], scalar_prefetch = 0 : i64, scratch_operands = 3 : i64, tpu.core_type = #tpu.core_type<tc>} {
    %0 = tpu.iota {dimensions = array<i32: 1>} : vector<2x256xi32>
    %c128_i32 = arith.constant 128 : i32
    %1 = vector.broadcast %c128_i32 : i32 to vector<2x256xi32>
    %2 = arith.cmpi sge, %0, %1 : vector<2x256xi32>
    %c192_i32 = arith.constant 192 : i32
    %3 = vector.broadcast %c192_i32 : i32 to vector<2x256xi32>
    %4 = arith.cmpi slt, %0, %3 : vector<2x256xi32>
    %5 = arith.andi %2, %4 : vector<2x256xi1>
    %c0 = arith.constant 0 : index
    %c0_0 = arith.constant 0 : index
    %6 = vector.load %arg0[%c0, %c0_0] : memref<16x32xf32, #tpu.memory_space<vmem>>, vector<16x32xf32>
    %c0_1 = arith.constant 0 : index
    %c0_2 = arith.constant 0 : index
    %7 = vector.load %arg2[%c0_1, %c0_2] : memref<32x256xf32, #tpu.memory_space<vmem>>, vector<32x256xf32>
    %cst = arith.constant dense<0.000000e+00> : vector<16x256xf32>
    %8 = tpu.matmul %6, %7, %cst {dimension_numbers = #tpu.dot_dimension_numbers<[1], [0], [0], [1], [0, 0, 1, 1], [], []>} : vector<16x32xf32>, vector<32x256xf32>, vector<16x256xf32> -> vector<16x256xf32>
    %c0_3 = arith.constant 0 : index
    %c0_4 = arith.constant 0 : index
    %9 = vector.load %arg1[%c0_3, %c0_4] : memref<16x32xf32, #tpu.memory_space<vmem>>, vector<16x32xf32>
    %c0_5 = arith.constant 0 : index
    %c0_6 = arith.constant 0 : index
    %10 = vector.load %arg3[%c0_5, %c0_6] : memref<32x256xf32, #tpu.memory_space<vmem>>, vector<32x256xf32>
    %cst_7 = arith.constant dense<0.000000e+00> : vector<16x256xf32>
    %11 = tpu.matmul %9, %10, %cst_7 {dimension_numbers = #tpu.dot_dimension_numbers<[1], [0], [0], [1], [0, 0, 1, 1], [], []>} : vector<16x32xf32>, vector<32x256xf32>, vector<16x256xf32> -> vector<16x256xf32>
    %12 = arith.addf %8, %11 : vector<16x256xf32>
    %c0_8 = arith.constant 0 : index
    %c0_9 = arith.constant 0 : index
    %13 = vector.load %arg5[%c0_8, %c0_9] : memref<1x256xf32, #tpu.memory_space<vmem>>, vector<1x256xf32>
    %14 = vector.broadcast %13 : vector<1x256xf32> to vector<16x256xf32>
    %15 = arith.addf %12, %14 : vector<16x256xf32>
    %c0_10 = arith.constant 0 : index
    %c0_11 = arith.constant 0 : index
    %16 = vector.load %arg14[%c0_10, %c0_11] : memref<16x256xf32, #tpu.memory_space<vmem>>, vector<16x256xf32>
    tpu.vector_store %arg14[%c0_10, %c0_11], %15 {strides = array<i32>} : memref<16x256xf32, #tpu.memory_space<vmem>>, vector<16x256xf32>,
    %c0_12 = arith.constant 0 : index
    %c0_13 = arith.constant 0 : index
    %17 = vector.load %arg4[%c0_12, %c0_13] : memref<64x256xf32, #tpu.memory_space<vmem>>, vector<64x256xf32>
    %cst_14 = arith.constant 0.000000e+00 : f32
    %18 = vector.broadcast %cst_14 : f32 to vector<2x64xf32>
    %cst_15 = arith.constant 0.000000e+00 : f32
    %19 = vector.broadcast %cst_15 : f32 to vector<2x64xf32>
    %c0_16 = arith.constant 0 : index
    %c0_17 = arith.constant 0 : index
    %20 = vector.load %arg14[%c0_16, %c0_17] : memref<16x256xf32, #tpu.memory_space<vmem>>, vector<2x256xf32>
    %cst_18 = arith.constant dense<0.000000e+00> : vector<2x256xf32>
    %21 = tpu.matmul %18, %17, %cst_18 {dimension_numbers = #tpu.dot_dimension_numbers<[1], [0], [0], [1], [0, 0, 1, 1], [], []>} : vector<2x64xf32>, vector<64x256xf32>, vector<2x256xf32> -> vector<2x256xf32>
    %22 = arith.addf %20, %21 : vector<2x256xf32>
    %23 = arith.negf %22 : vector<2x256xf32>
    %24 = math.exp %23 : vector<2x256xf32>
    %cst_19 = arith.constant 1.000000e+00 : f32
    %25 = vector.broadcast %cst_19 : f32 to vector<2x256xf32>
    %26 = arith.addf %25, %24 : vector<2x256xf32>
    %27 = arith.divf %25, %26 : vector<2x256xf32>
    %cst_20 = arith.constant 2.000000e+00 : f32
    %28 = vector.broadcast %cst_20 : f32 to vector<2x256xf32>
    %29 = arith.mulf %28, %27 : vector<2x256xf32>
    %cst_21 = arith.constant 1.000000e+00 : f32
    %30 = vector.broadcast %cst_21 : f32 to vector<2x256xf32>
    %31 = arith.subf %29, %30 : vector<2x256xf32>
    %32 = arith.select %5, %31, %27 : vector<2x256xi1>, vector<2x256xf32>
    %33 = vector.extract_strided_slice %32 {offsets = [0, 0], sizes = [2, 64], strides = [1, 1]} : vector<2x256xf32> to vector<2x64xf32>
    %34 = vector.extract_strided_slice %32 {offsets = [0, 64], sizes = [2, 64], strides = [1, 1]} : vector<2x256xf32> to vector<2x64xf32>
    %35 = vector.extract_strided_slice %32 {offsets = [0, 128], sizes = [2, 64], strides = [1, 1]} : vector<2x256xf32> to vector<2x64xf32>
    %36 = vector.extract_strided_slice %32 {offsets = [0, 192], sizes = [2, 64], strides = [1, 1]} : vector<2x256xf32> to vector<2x64xf32>
    %37 = arith.mulf %34, %19 : vector<2x64xf32>
    %38 = arith.mulf %33, %35 : vector<2x64xf32>
    %39 = arith.addf %37, %38 : vector<2x64xf32>
    %40 = math.tanh %39 : vector<2x64xf32>
    %41 = arith.mulf %36, %40 : vector<2x64xf32>
    %c0_22 = arith.constant 0 : index
    %c0_23 = arith.constant 0 : index
    %42 = vector.load %arg15[%c0_22, %c0_23] : memref<16x64xf32, #tpu.memory_space<vmem>>, vector<2x64xf32>
    tpu.vector_store %arg15[%c0_22, %c0_23], %41 {strides = array<i32>} : memref<16x64xf32, #tpu.memory_space<vmem>>, vector<2x64xf32>,
    %c2 = arith.constant 2 : index
    %c0_24 = arith.constant 0 : index
    %43 = vector.load %arg14[%c2, %c0_24] : memref<16x256xf32, #tpu.memory_space<vmem>>, vector<2x256xf32>
    %cst_25 = arith.constant dense<0.000000e+00> : vector<2x256xf32>
    %44 = tpu.matmul %41, %17, %cst_25 {dimension_numbers = #tpu.dot_dimension_numbers<[1], [0], [0], [1], [0, 0, 1, 1], [], []>} : vector<2x64xf32>, vector<64x256xf32>, vector<2x256xf32> -> vector<2x256xf32>
    %45 = arith.addf %43, %44 : vector<2x256xf32>
    %46 = arith.negf %45 : vector<2x256xf32>
    %47 = math.exp %46 : vector<2x256xf32>
    %cst_26 = arith.constant 1.000000e+00 : f32
    %48 = vector.broadcast %cst_26 : f32 to vector<2x256xf32>
    %49 = arith.addf %48, %47 : vector<2x256xf32>
    %50 = arith.divf %48, %49 : vector<2x256xf32>
    %cst_27 = arith.constant 2.000000e+00 : f32
    %51 = vector.broadcast %cst_27 : f32 to vector<2x256xf32>
    %52 = arith.mulf %51, %50 : vector<2x256xf32>
    %cst_28 = arith.constant 1.000000e+00 : f32
    %53 = vector.broadcast %cst_28 : f32 to vector<2x256xf32>
    %54 = arith.subf %52, %53 : vector<2x256xf32>
    %55 = arith.select %5, %54, %50 : vector<2x256xi1>, vector<2x256xf32>
    %56 = vector.extract_strided_slice %55 {offsets = [0, 0], sizes = [2, 64], strides = [1, 1]} : vector<2x256xf32> to vector<2x64xf32>
    %57 = vector.extract_strided_slice %55 {offsets = [0, 64], sizes = [2, 64], strides = [1, 1]} : vector<2x256xf32> to vector<2x64xf32>
    %58 = vector.extract_strided_slice %55 {offsets = [0, 128], sizes = [2, 64], strides = [1, 1]} : vector<2x256xf32> to vector<2x64xf32>
    %59 = vector.extract_strided_slice %55 {offsets = [0, 192], sizes = [2, 64], strides = [1, 1]} : vector<2x256xf32> to vector<2x64xf32>
    %60 = arith.mulf %57, %39 : vector<2x64xf32>
    %61 = arith.mulf %56, %58 : vector<2x64xf32>
    %62 = arith.addf %60, %61 : vector<2x64xf32>
    %63 = math.tanh %62 : vector<2x64xf32>
    %64 = arith.mulf %59, %63 : vector<2x64xf32>
    %c2_29 = arith.constant 2 : index
    %c0_30 = arith.constant 0 : index
    %65 = vector.load %arg15[%c2_29, %c0_30] : memref<16x64xf32, #tpu.memory_space<vmem>>, vector<2x64xf32>
    tpu.vector_store %arg15[%c2_29, %c0_30], %64 {strides = array<i32>} : memref<16x64xf32, #tpu.memory_space<vmem>>, vector<2x64xf32>,
    %c4 = arith.constant 4 : index
    %c0_31 = arith.constant 0 : index
    %66 = vector.load %arg14[%c4, %c0_31] : memref<16x256xf32, #tpu.memory_space<vmem>>, vector<2x256xf32>
    %cst_32 = arith.constant dense<0.000000e+00> : vector<2x256xf32>
    %67 = tpu.matmul %64, %17, %cst_32 {dimension_numbers = #tpu.dot_dimension_numbers<[1], [0], [0], [1], [0, 0, 1, 1], [], []>} : vector<2x64xf32>, vector<64x256xf32>, vector<2x256xf32> -> vector<2x256xf32>
    %68 = arith.addf %66, %67 : vector<2x256xf32>
    %69 = arith.negf %68 : vector<2x256xf32>
    %70 = math.exp %69 : vector<2x256xf32>
    %cst_33 = arith.constant 1.000000e+00 : f32
    %71 = vector.broadcast %cst_33 : f32 to vector<2x256xf32>
    %72 = arith.addf %71, %70 : vector<2x256xf32>
    %73 = arith.divf %71, %72 : vector<2x256xf32>
    %cst_34 = arith.constant 2.000000e+00 : f32
    %74 = vector.broadcast %cst_34 : f32 to vector<2x256xf32>
    %75 = arith.mulf %74, %73 : vector<2x256xf32>
    %cst_35 = arith.constant 1.000000e+00 : f32
    %76 = vector.broadcast %cst_35 : f32 to vector<2x256xf32>
    %77 = arith.subf %75, %76 : vector<2x256xf32>
    %78 = arith.select %5, %77, %73 : vector<2x256xi1>, vector<2x256xf32>
    %79 = vector.extract_strided_slice %78 {offsets = [0, 0], sizes = [2, 64], strides = [1, 1]} : vector<2x256xf32> to vector<2x64xf32>
    %80 = vector.extract_strided_slice %78 {offsets = [0, 64], sizes = [2, 64], strides = [1, 1]} : vector<2x256xf32> to vector<2x64xf32>
    %81 = vector.extract_strided_slice %78 {offsets = [0, 128], sizes = [2, 64], strides = [1, 1]} : vector<2x256xf32> to vector<2x64xf32>
    %82 = vector.extract_strided_slice %78 {offsets = [0, 192], sizes = [2, 64], strides = [1, 1]} : vector<2x256xf32> to vector<2x64xf32>
    %83 = arith.mulf %80, %62 : vector<2x64xf32>
    %84 = arith.mulf %79, %81 : vector<2x64xf32>
    %85 = arith.addf %83, %84 : vector<2x64xf32>
    %86 = math.tanh %85 : vector<2x64xf32>
    %87 = arith.mulf %82, %86 : vector<2x64xf32>
    %c4_36 = arith.constant 4 : index
    %c0_37 = arith.constant 0 : index
    %88 = vector.load %arg15[%c4_36, %c0_37] : memref<16x64xf32, #tpu.memory_space<vmem>>, vector<2x64xf32>
    tpu.vector_store %arg15[%c4_36, %c0_37], %87 {strides = array<i32>} : memref<16x64xf32, #tpu.memory_space<vmem>>, vector<2x64xf32>,
    %c6 = arith.constant 6 : index
    %c0_38 = arith.constant 0 : index
    %89 = vector.load %arg14[%c6, %c0_38] : memref<16x256xf32, #tpu.memory_space<vmem>>, vector<2x256xf32>
    %cst_39 = arith.constant dense<0.000000e+00> : vector<2x256xf32>
    %90 = tpu.matmul %87, %17, %cst_39 {dimension_numbers = #tpu.dot_dimension_numbers<[1], [0], [0], [1], [0, 0, 1, 1], [], []>} : vector<2x64xf32>, vector<64x256xf32>, vector<2x256xf32> -> vector<2x256xf32>
    %91 = arith.addf %89, %90 : vector<2x256xf32>
    %92 = arith.negf %91 : vector<2x256xf32>
    %93 = math.exp %92 : vector<2x256xf32>
    %cst_40 = arith.constant 1.000000e+00 : f32
    %94 = vector.broadcast %cst_40 : f32 to vector<2x256xf32>
    %95 = arith.addf %94, %93 : vector<2x256xf32>
    %96 = arith.divf %94, %95 : vector<2x256xf32>
    %cst_41 = arith.constant 2.000000e+00 : f32
    %97 = vector.broadcast %cst_41 : f32 to vector<2x256xf32>
    %98 = arith.mulf %97, %96 : vector<2x256xf32>
    %cst_42 = arith.constant 1.000000e+00 : f32
    %99 = vector.broadcast %cst_42 : f32 to vector<2x256xf32>
    %100 = arith.subf %98, %99 : vector<2x256xf32>
    %101 = arith.select %5, %100, %96 : vector<2x256xi1>, vector<2x256xf32>
    %102 = vector.extract_strided_slice %101 {offsets = [0, 0], sizes = [2, 64], strides = [1, 1]} : vector<2x256xf32> to vector<2x64xf32>
    %103 = vector.extract_strided_slice %101 {offsets = [0, 64], sizes = [2, 64], strides = [1, 1]} : vector<2x256xf32> to vector<2x64xf32>
    %104 = vector.extract_strided_slice %101 {offsets = [0, 128], sizes = [2, 64], strides = [1, 1]} : vector<2x256xf32> to vector<2x64xf32>
    %105 = vector.extract_strided_slice %101 {offsets = [0, 192], sizes = [2, 64], strides = [1, 1]} : vector<2x256xf32> to vector<2x64xf32>
    %106 = arith.mulf %103, %85 : vector<2x64xf32>
    %107 = arith.mulf %102, %104 : vector<2x64xf32>
    %108 = arith.addf %106, %107 : vector<2x64xf32>
    %109 = math.tanh %108 : vector<2x64xf32>
    %110 = arith.mulf %105, %109 : vector<2x64xf32>
    %c6_43 = arith.constant 6 : index
    %c0_44 = arith.constant 0 : index
    %111 = vector.load %arg15[%c6_43, %c0_44] : memref<16x64xf32, #tpu.memory_space<vmem>>, vector<2x64xf32>
    tpu.vector_store %arg15[%c6_43, %c0_44], %110 {strides = array<i32>} : memref<16x64xf32, #tpu.memory_space<vmem>>, vector<2x64xf32>,
    %c8 = arith.constant 8 : index
    %c0_45 = arith.constant 0 : index
    %112 = vector.load %arg14[%c8, %c0_45] : memref<16x256xf32, #tpu.memory_space<vmem>>, vector<2x256xf32>
    %cst_46 = arith.constant dense<0.000000e+00> : vector<2x256xf32>
    %113 = tpu.matmul %110, %17, %cst_46 {dimension_numbers = #tpu.dot_dimension_numbers<[1], [0], [0], [1], [0, 0, 1, 1], [], []>} : vector<2x64xf32>, vector<64x256xf32>, vector<2x256xf32> -> vector<2x256xf32>
    %114 = arith.addf %112, %113 : vector<2x256xf32>
    %115 = arith.negf %114 : vector<2x256xf32>
    %116 = math.exp %115 : vector<2x256xf32>
    %cst_47 = arith.constant 1.000000e+00 : f32
    %117 = vector.broadcast %cst_47 : f32 to vector<2x256xf32>
    %118 = arith.addf %117, %116 : vector<2x256xf32>
    %119 = arith.divf %117, %118 : vector<2x256xf32>
    %cst_48 = arith.constant 2.000000e+00 : f32
    %120 = vector.broadcast %cst_48 : f32 to vector<2x256xf32>
    %121 = arith.mulf %120, %119 : vector<2x256xf32>
    %cst_49 = arith.constant 1.000000e+00 : f32
    %122 = vector.broadcast %cst_49 : f32 to vector<2x256xf32>
    %123 = arith.subf %121, %122 : vector<2x256xf32>
    %124 = arith.select %5, %123, %119 : vector<2x256xi1>, vector<2x256xf32>
    %125 = vector.extract_strided_slice %124 {offsets = [0, 0], sizes = [2, 64], strides = [1, 1]} : vector<2x256xf32> to vector<2x64xf32>
    %126 = vector.extract_strided_slice %124 {offsets = [0, 64], sizes = [2, 64], strides = [1, 1]} : vector<2x256xf32> to vector<2x64xf32>
    %127 = vector.extract_strided_slice %124 {offsets = [0, 128], sizes = [2, 64], strides = [1, 1]} : vector<2x256xf32> to vector<2x64xf32>
    %128 = vector.extract_strided_slice %124 {offsets = [0, 192], sizes = [2, 64], strides = [1, 1]} : vector<2x256xf32> to vector<2x64xf32>
    %129 = arith.mulf %126, %108 : vector<2x64xf32>
    %130 = arith.mulf %125, %127 : vector<2x64xf32>
    %131 = arith.addf %129, %130 : vector<2x64xf32>
    %132 = math.tanh %131 : vector<2x64xf32>
    %133 = arith.mulf %128, %132 : vector<2x64xf32>
    %c8_50 = arith.constant 8 : index
    %c0_51 = arith.constant 0 : index
    %134 = vector.load %arg15[%c8_50, %c0_51] : memref<16x64xf32, #tpu.memory_space<vmem>>, vector<2x64xf32>
    tpu.vector_store %arg15[%c8_50, %c0_51], %133 {strides = array<i32>} : memref<16x64xf32, #tpu.memory_space<vmem>>, vector<2x64xf32>,
    %c10 = arith.constant 10 : index
    %c0_52 = arith.constant 0 : index
    %135 = vector.load %arg14[%c10, %c0_52] : memref<16x256xf32, #tpu.memory_space<vmem>>, vector<2x256xf32>
    %cst_53 = arith.constant dense<0.000000e+00> : vector<2x256xf32>
    %136 = tpu.matmul %133, %17, %cst_53 {dimension_numbers = #tpu.dot_dimension_numbers<[1], [0], [0], [1], [0, 0, 1, 1], [], []>} : vector<2x64xf32>, vector<64x256xf32>, vector<2x256xf32> -> vector<2x256xf32>
    %137 = arith.addf %135, %136 : vector<2x256xf32>
    %138 = arith.negf %137 : vector<2x256xf32>
    %139 = math.exp %138 : vector<2x256xf32>
    %cst_54 = arith.constant 1.000000e+00 : f32
    %140 = vector.broadcast %cst_54 : f32 to vector<2x256xf32>
    %141 = arith.addf %140, %139 : vector<2x256xf32>
    %142 = arith.divf %140, %141 : vector<2x256xf32>
    %cst_55 = arith.constant 2.000000e+00 : f32
    %143 = vector.broadcast %cst_55 : f32 to vector<2x256xf32>
    %144 = arith.mulf %143, %142 : vector<2x256xf32>
    %cst_56 = arith.constant 1.000000e+00 : f32
    %145 = vector.broadcast %cst_56 : f32 to vector<2x256xf32>
    %146 = arith.subf %144, %145 : vector<2x256xf32>
    %147 = arith.select %5, %146, %142 : vector<2x256xi1>, vector<2x256xf32>
    %148 = vector.extract_strided_slice %147 {offsets = [0, 0], sizes = [2, 64], strides = [1, 1]} : vector<2x256xf32> to vector<2x64xf32>
    %149 = vector.extract_strided_slice %147 {offsets = [0, 64], sizes = [2, 64], strides = [1, 1]} : vector<2x256xf32> to vector<2x64xf32>
    %150 = vector.extract_strided_slice %147 {offsets = [0, 128], sizes = [2, 64], strides = [1, 1]} : vector<2x256xf32> to vector<2x64xf32>
    %151 = vector.extract_strided_slice %147 {offsets = [0, 192], sizes = [2, 64], strides = [1, 1]} : vector<2x256xf32> to vector<2x64xf32>
    %152 = arith.mulf %149, %131 : vector<2x64xf32>
    %153 = arith.mulf %148, %150 : vector<2x64xf32>
    %154 = arith.addf %152, %153 : vector<2x64xf32>
    %155 = math.tanh %154 : vector<2x64xf32>
    %156 = arith.mulf %151, %155 : vector<2x64xf32>
    %c10_57 = arith.constant 10 : index
    %c0_58 = arith.constant 0 : index
    %157 = vector.load %arg15[%c10_57, %c0_58] : memref<16x64xf32, #tpu.memory_space<vmem>>, vector<2x64xf32>
    tpu.vector_store %arg15[%c10_57, %c0_58], %156 {strides = array<i32>} : memref<16x64xf32, #tpu.memory_space<vmem>>, vector<2x64xf32>,
    %c12 = arith.constant 12 : index
    %c0_59 = arith.constant 0 : index
    %158 = vector.load %arg14[%c12, %c0_59] : memref<16x256xf32, #tpu.memory_space<vmem>>, vector<2x256xf32>
    %cst_60 = arith.constant dense<0.000000e+00> : vector<2x256xf32>
    %159 = tpu.matmul %156, %17, %cst_60 {dimension_numbers = #tpu.dot_dimension_numbers<[1], [0], [0], [1], [0, 0, 1, 1], [], []>} : vector<2x64xf32>, vector<64x256xf32>, vector<2x256xf32> -> vector<2x256xf32>
    %160 = arith.addf %158, %159 : vector<2x256xf32>
    %161 = arith.negf %160 : vector<2x256xf32>
    %162 = math.exp %161 : vector<2x256xf32>
    %cst_61 = arith.constant 1.000000e+00 : f32
    %163 = vector.broadcast %cst_61 : f32 to vector<2x256xf32>
    %164 = arith.addf %163, %162 : vector<2x256xf32>
    %165 = arith.divf %163, %164 : vector<2x256xf32>
    %cst_62 = arith.constant 2.000000e+00 : f32
    %166 = vector.broadcast %cst_62 : f32 to vector<2x256xf32>
    %167 = arith.mulf %166, %165 : vector<2x256xf32>
    %cst_63 = arith.constant 1.000000e+00 : f32
    %168 = vector.broadcast %cst_63 : f32 to vector<2x256xf32>
    %169 = arith.subf %167, %168 : vector<2x256xf32>
    %170 = arith.select %5, %169, %165 : vector<2x256xi1>, vector<2x256xf32>
    %171 = vector.extract_strided_slice %170 {offsets = [0, 0], sizes = [2, 64], strides = [1, 1]} : vector<2x256xf32> to vector<2x64xf32>
    %172 = vector.extract_strided_slice %170 {offsets = [0, 64], sizes = [2, 64], strides = [1, 1]} : vector<2x256xf32> to vector<2x64xf32>
    %173 = vector.extract_strided_slice %170 {offsets = [0, 128], sizes = [2, 64], strides = [1, 1]} : vector<2x256xf32> to vector<2x64xf32>
    %174 = vector.extract_strided_slice %170 {offsets = [0, 192], sizes = [2, 64], strides = [1, 1]} : vector<2x256xf32> to vector<2x64xf32>
    %175 = arith.mulf %172, %154 : vector<2x64xf32>
    %176 = arith.mulf %171, %173 : vector<2x64xf32>
    %177 = arith.addf %175, %176 : vector<2x64xf32>
    %178 = math.tanh %177 : vector<2x64xf32>
    %179 = arith.mulf %174, %178 : vector<2x64xf32>
    %c12_64 = arith.constant 12 : index
    %c0_65 = arith.constant 0 : index
    %180 = vector.load %arg15[%c12_64, %c0_65] : memref<16x64xf32, #tpu.memory_space<vmem>>, vector<2x64xf32>
    tpu.vector_store %arg15[%c12_64, %c0_65], %179 {strides = array<i32>} : memref<16x64xf32, #tpu.memory_space<vmem>>, vector<2x64xf32>,
    %c14 = arith.constant 14 : index
    %c0_66 = arith.constant 0 : index
    %181 = vector.load %arg14[%c14, %c0_66] : memref<16x256xf32, #tpu.memory_space<vmem>>, vector<2x256xf32>
    %cst_67 = arith.constant dense<0.000000e+00> : vector<2x256xf32>
    %182 = tpu.matmul %179, %17, %cst_67 {dimension_numbers = #tpu.dot_dimension_numbers<[1], [0], [0], [1], [0, 0, 1, 1], [], []>} : vector<2x64xf32>, vector<64x256xf32>, vector<2x256xf32> -> vector<2x256xf32>
    %183 = arith.addf %181, %182 : vector<2x256xf32>
    %184 = arith.negf %183 : vector<2x256xf32>
    %185 = math.exp %184 : vector<2x256xf32>
    %cst_68 = arith.constant 1.000000e+00 : f32
    %186 = vector.broadcast %cst_68 : f32 to vector<2x256xf32>
    %187 = arith.addf %186, %185 : vector<2x256xf32>
    %188 = arith.divf %186, %187 : vector<2x256xf32>
    %cst_69 = arith.constant 2.000000e+00 : f32
    %189 = vector.broadcast %cst_69 : f32 to vector<2x256xf32>
    %190 = arith.mulf %189, %188 : vector<2x256xf32>
    %cst_70 = arith.constant 1.000000e+00 : f32
    %191 = vector.broadcast %cst_70 : f32 to vector<2x256xf32>
    %192 = arith.subf %190, %191 : vector<2x256xf32>
    %193 = arith.select %5, %192, %188 : vector<2x256xi1>, vector<2x256xf32>
    %194 = vector.extract_strided_slice %193 {offsets = [0, 0], sizes = [2, 64], strides = [1, 1]} : vector<2x256xf32> to vector<2x64xf32>
    %195 = vector.extract_strided_slice %193 {offsets = [0, 64], sizes = [2, 64], strides = [1, 1]} : vector<2x256xf32> to vector<2x64xf32>
    %196 = vector.extract_strided_slice %193 {offsets = [0, 128], sizes = [2, 64], strides = [1, 1]} : vector<2x256xf32> to vector<2x64xf32>
    %197 = vector.extract_strided_slice %193 {offsets = [0, 192], sizes = [2, 64], strides = [1, 1]} : vector<2x256xf32> to vector<2x64xf32>
    %198 = arith.mulf %195, %177 : vector<2x64xf32>
    %199 = arith.mulf %194, %196 : vector<2x64xf32>
    %200 = arith.addf %198, %199 : vector<2x64xf32>
    %201 = math.tanh %200 : vector<2x64xf32>
    %202 = arith.mulf %197, %201 : vector<2x64xf32>
    %c14_71 = arith.constant 14 : index
    %c0_72 = arith.constant 0 : index
    %203 = vector.load %arg15[%c14_71, %c0_72] : memref<16x64xf32, #tpu.memory_space<vmem>>, vector<2x64xf32>
    tpu.vector_store %arg15[%c14_71, %c0_72], %202 {strides = array<i32>} : memref<16x64xf32, #tpu.memory_space<vmem>>, vector<2x64xf32>,
    %c14_73 = arith.constant 14 : index
    %c0_74 = arith.constant 0 : index
    %204 = vector.load %arg15[%c14_73, %c0_74] : memref<16x64xf32, #tpu.memory_space<vmem>>, vector<2x64xf32>
    %c0_75 = arith.constant 0 : index
    %c0_76 = arith.constant 0 : index
    %205 = vector.load %arg16[%c0_75, %c0_76] : memref<16x64xf32, #tpu.memory_space<vmem>>, vector<2x64xf32>
    tpu.vector_store %arg16[%c0_75, %c0_76], %204 {strides = array<i32>} : memref<16x64xf32, #tpu.memory_space<vmem>>, vector<2x64xf32>,
    %c12_77 = arith.constant 12 : index
    %c0_78 = arith.constant 0 : index
    %206 = vector.load %arg15[%c12_77, %c0_78] : memref<16x64xf32, #tpu.memory_space<vmem>>, vector<2x64xf32>
    %c2_79 = arith.constant 2 : index
    %c0_80 = arith.constant 0 : index
    %207 = vector.load %arg16[%c2_79, %c0_80] : memref<16x64xf32, #tpu.memory_space<vmem>>, vector<2x64xf32>
    tpu.vector_store %arg16[%c2_79, %c0_80], %206 {strides = array<i32>} : memref<16x64xf32, #tpu.memory_space<vmem>>, vector<2x64xf32>,
    %c10_81 = arith.constant 10 : index
    %c0_82 = arith.constant 0 : index
    %208 = vector.load %arg15[%c10_81, %c0_82] : memref<16x64xf32, #tpu.memory_space<vmem>>, vector<2x64xf32>
    %c4_83 = arith.constant 4 : index
    %c0_84 = arith.constant 0 : index
    %209 = vector.load %arg16[%c4_83, %c0_84] : memref<16x64xf32, #tpu.memory_space<vmem>>, vector<2x64xf32>
    tpu.vector_store %arg16[%c4_83, %c0_84], %208 {strides = array<i32>} : memref<16x64xf32, #tpu.memory_space<vmem>>, vector<2x64xf32>,
    %c8_85 = arith.constant 8 : index
    %c0_86 = arith.constant 0 : index
    %210 = vector.load %arg15[%c8_85, %c0_86] : memref<16x64xf32, #tpu.memory_space<vmem>>, vector<2x64xf32>
    %c6_87 = arith.constant 6 : index
    %c0_88 = arith.constant 0 : index
    %211 = vector.load %arg16[%c6_87, %c0_88] : memref<16x64xf32, #tpu.memory_space<vmem>>, vector<2x64xf32>
    tpu.vector_store %arg16[%c6_87, %c0_88], %210 {strides = array<i32>} : memref<16x64xf32, #tpu.memory_space<vmem>>, vector<2x64xf32>,
    %c6_89 = arith.constant 6 : index
    %c0_90 = arith.constant 0 : index
    %212 = vector.load %arg15[%c6_89, %c0_90] : memref<16x64xf32, #tpu.memory_space<vmem>>, vector<2x64xf32>
    %c8_91 = arith.constant 8 : index
    %c0_92 = arith.constant 0 : index
    %213 = vector.load %arg16[%c8_91, %c0_92] : memref<16x64xf32, #tpu.memory_space<vmem>>, vector<2x64xf32>
    tpu.vector_store %arg16[%c8_91, %c0_92], %212 {strides = array<i32>} : memref<16x64xf32, #tpu.memory_space<vmem>>, vector<2x64xf32>,
    %c4_93 = arith.constant 4 : index
    %c0_94 = arith.constant 0 : index
    %214 = vector.load %arg15[%c4_93, %c0_94] : memref<16x64xf32, #tpu.memory_space<vmem>>, vector<2x64xf32>
    %c10_95 = arith.constant 10 : index
    %c0_96 = arith.constant 0 : index
    %215 = vector.load %arg16[%c10_95, %c0_96] : memref<16x64xf32, #tpu.memory_space<vmem>>, vector<2x64xf32>
    tpu.vector_store %arg16[%c10_95, %c0_96], %214 {strides = array<i32>} : memref<16x64xf32, #tpu.memory_space<vmem>>, vector<2x64xf32>,
    %c2_97 = arith.constant 2 : index
    %c0_98 = arith.constant 0 : index
    %216 = vector.load %arg15[%c2_97, %c0_98] : memref<16x64xf32, #tpu.memory_space<vmem>>, vector<2x64xf32>
    %c12_99 = arith.constant 12 : index
    %c0_100 = arith.constant 0 : index
    %217 = vector.load %arg16[%c12_99, %c0_100] : memref<16x64xf32, #tpu.memory_space<vmem>>, vector<2x64xf32>
    tpu.vector_store %arg16[%c12_99, %c0_100], %216 {strides = array<i32>} : memref<16x64xf32, #tpu.memory_space<vmem>>, vector<2x64xf32>,
    %c0_101 = arith.constant 0 : index
    %c0_102 = arith.constant 0 : index
    %218 = vector.load %arg15[%c0_101, %c0_102] : memref<16x64xf32, #tpu.memory_space<vmem>>, vector<2x64xf32>
    %c14_103 = arith.constant 14 : index
    %c0_104 = arith.constant 0 : index
    %219 = vector.load %arg16[%c14_103, %c0_104] : memref<16x64xf32, #tpu.memory_space<vmem>>, vector<2x64xf32>
    tpu.vector_store %arg16[%c14_103, %c0_104], %218 {strides = array<i32>} : memref<16x64xf32, #tpu.memory_space<vmem>>, vector<2x64xf32>,
    %c0_105 = arith.constant 0 : index
    %c0_106 = arith.constant 0 : index
    %220 = vector.load %arg15[%c0_105, %c0_106] : memref<16x64xf32, #tpu.memory_space<vmem>>, vector<16x64xf32>
    %c0_107 = arith.constant 0 : index
    %c0_108 = arith.constant 0 : index
    %221 = vector.load %arg6[%c0_107, %c0_108] : memref<64x256xf32, #tpu.memory_space<vmem>>, vector<64x256xf32>
    %cst_109 = arith.constant dense<0.000000e+00> : vector<16x256xf32>
    %222 = tpu.matmul %220, %221, %cst_109 {dimension_numbers = #tpu.dot_dimension_numbers<[1], [0], [0], [1], [0, 0, 1, 1], [], []>} : vector<16x64xf32>, vector<64x256xf32>, vector<16x256xf32> -> vector<16x256xf32>
    %c0_110 = arith.constant 0 : index
    %c0_111 = arith.constant 0 : index
    %223 = vector.load %arg16[%c0_110, %c0_111] : memref<16x64xf32, #tpu.memory_space<vmem>>, vector<16x64xf32>
    %c0_112 = arith.constant 0 : index
    %c0_113 = arith.constant 0 : index
    %224 = vector.load %arg7[%c0_112, %c0_113] : memref<64x256xf32, #tpu.memory_space<vmem>>, vector<64x256xf32>
    %cst_114 = arith.constant dense<0.000000e+00> : vector<16x256xf32>
    %225 = tpu.matmul %223, %224, %cst_114 {dimension_numbers = #tpu.dot_dimension_numbers<[1], [0], [0], [1], [0, 0, 1, 1], [], []>} : vector<16x64xf32>, vector<64x256xf32>, vector<16x256xf32> -> vector<16x256xf32>
    %226 = arith.addf %222, %225 : vector<16x256xf32>
    %c0_115 = arith.constant 0 : index
    %c0_116 = arith.constant 0 : index
    %227 = vector.load %arg9[%c0_115, %c0_116] : memref<1x256xf32, #tpu.memory_space<vmem>>, vector<1x256xf32>
    %228 = vector.broadcast %227 : vector<1x256xf32> to vector<16x256xf32>
    %229 = arith.addf %226, %228 : vector<16x256xf32>
    %c0_117 = arith.constant 0 : index
    %c0_118 = arith.constant 0 : index
    %230 = vector.load %arg14[%c0_117, %c0_118] : memref<16x256xf32, #tpu.memory_space<vmem>>, vector<16x256xf32>
    tpu.vector_store %arg14[%c0_117, %c0_118], %229 {strides = array<i32>} : memref<16x256xf32, #tpu.memory_space<vmem>>, vector<16x256xf32>,
    %c0_119 = arith.constant 0 : index
    %c0_120 = arith.constant 0 : index
    %231 = vector.load %arg8[%c0_119, %c0_120] : memref<64x256xf32, #tpu.memory_space<vmem>>, vector<64x256xf32>
    %cst_121 = arith.constant 0.000000e+00 : f32
    %232 = vector.broadcast %cst_121 : f32 to vector<2x64xf32>
    %cst_122 = arith.constant 0.000000e+00 : f32
    %233 = vector.broadcast %cst_122 : f32 to vector<2x64xf32>
    %c0_123 = arith.constant 0 : index
    %c0_124 = arith.constant 0 : index
    %234 = vector.load %arg14[%c0_123, %c0_124] : memref<16x256xf32, #tpu.memory_space<vmem>>, vector<2x256xf32>
    %cst_125 = arith.constant dense<0.000000e+00> : vector<2x256xf32>
    %235 = tpu.matmul %232, %231, %cst_125 {dimension_numbers = #tpu.dot_dimension_numbers<[1], [0], [0], [1], [0, 0, 1, 1], [], []>} : vector<2x64xf32>, vector<64x256xf32>, vector<2x256xf32> -> vector<2x256xf32>
    %236 = arith.addf %234, %235 : vector<2x256xf32>
    %237 = arith.negf %236 : vector<2x256xf32>
    %238 = math.exp %237 : vector<2x256xf32>
    %cst_126 = arith.constant 1.000000e+00 : f32
    %239 = vector.broadcast %cst_126 : f32 to vector<2x256xf32>
    %240 = arith.addf %239, %238 : vector<2x256xf32>
    %241 = arith.divf %239, %240 : vector<2x256xf32>
    %cst_127 = arith.constant 2.000000e+00 : f32
    %242 = vector.broadcast %cst_127 : f32 to vector<2x256xf32>
    %243 = arith.mulf %242, %241 : vector<2x256xf32>
    %cst_128 = arith.constant 1.000000e+00 : f32
    %244 = vector.broadcast %cst_128 : f32 to vector<2x256xf32>
    %245 = arith.subf %243, %244 : vector<2x256xf32>
    %246 = arith.select %5, %245, %241 : vector<2x256xi1>, vector<2x256xf32>
    %247 = vector.extract_strided_slice %246 {offsets = [0, 0], sizes = [2, 64], strides = [1, 1]} : vector<2x256xf32> to vector<2x64xf32>
    %248 = vector.extract_strided_slice %246 {offsets = [0, 64], sizes = [2, 64], strides = [1, 1]} : vector<2x256xf32> to vector<2x64xf32>
    %249 = vector.extract_strided_slice %246 {offsets = [0, 128], sizes = [2, 64], strides = [1, 1]} : vector<2x256xf32> to vector<2x64xf32>
    %250 = vector.extract_strided_slice %246 {offsets = [0, 192], sizes = [2, 64], strides = [1, 1]} : vector<2x256xf32> to vector<2x64xf32>
    %251 = arith.mulf %248, %233 : vector<2x64xf32>
    %252 = arith.mulf %247, %249 : vector<2x64xf32>
    %253 = arith.addf %251, %252 : vector<2x64xf32>
    %254 = math.tanh %253 : vector<2x64xf32>
    %255 = arith.mulf %250, %254 : vector<2x64xf32>
    %c0_129 = arith.constant 0 : index
    %c0_130 = arith.constant 0 : index
    %256 = vector.load %arg15[%c0_129, %c0_130] : memref<16x64xf32, #tpu.memory_space<vmem>>, vector<2x64xf32>
    tpu.vector_store %arg15[%c0_129, %c0_130], %255 {strides = array<i32>} : memref<16x64xf32, #tpu.memory_space<vmem>>, vector<2x64xf32>,
    %c2_131 = arith.constant 2 : index
    %c0_132 = arith.constant 0 : index
    %257 = vector.load %arg14[%c2_131, %c0_132] : memref<16x256xf32, #tpu.memory_space<vmem>>, vector<2x256xf32>
    %cst_133 = arith.constant dense<0.000000e+00> : vector<2x256xf32>
    %258 = tpu.matmul %255, %231, %cst_133 {dimension_numbers = #tpu.dot_dimension_numbers<[1], [0], [0], [1], [0, 0, 1, 1], [], []>} : vector<2x64xf32>, vector<64x256xf32>, vector<2x256xf32> -> vector<2x256xf32>
    %259 = arith.addf %257, %258 : vector<2x256xf32>
    %260 = arith.negf %259 : vector<2x256xf32>
    %261 = math.exp %260 : vector<2x256xf32>
    %cst_134 = arith.constant 1.000000e+00 : f32
    %262 = vector.broadcast %cst_134 : f32 to vector<2x256xf32>
    %263 = arith.addf %262, %261 : vector<2x256xf32>
    %264 = arith.divf %262, %263 : vector<2x256xf32>
    %cst_135 = arith.constant 2.000000e+00 : f32
    %265 = vector.broadcast %cst_135 : f32 to vector<2x256xf32>
    %266 = arith.mulf %265, %264 : vector<2x256xf32>
    %cst_136 = arith.constant 1.000000e+00 : f32
    %267 = vector.broadcast %cst_136 : f32 to vector<2x256xf32>
    %268 = arith.subf %266, %267 : vector<2x256xf32>
    %269 = arith.select %5, %268, %264 : vector<2x256xi1>, vector<2x256xf32>
    %270 = vector.extract_strided_slice %269 {offsets = [0, 0], sizes = [2, 64], strides = [1, 1]} : vector<2x256xf32> to vector<2x64xf32>
    %271 = vector.extract_strided_slice %269 {offsets = [0, 64], sizes = [2, 64], strides = [1, 1]} : vector<2x256xf32> to vector<2x64xf32>
    %272 = vector.extract_strided_slice %269 {offsets = [0, 128], sizes = [2, 64], strides = [1, 1]} : vector<2x256xf32> to vector<2x64xf32>
    %273 = vector.extract_strided_slice %269 {offsets = [0, 192], sizes = [2, 64], strides = [1, 1]} : vector<2x256xf32> to vector<2x64xf32>
    %274 = arith.mulf %271, %253 : vector<2x64xf32>
    %275 = arith.mulf %270, %272 : vector<2x64xf32>
    %276 = arith.addf %274, %275 : vector<2x64xf32>
    %277 = math.tanh %276 : vector<2x64xf32>
    %278 = arith.mulf %273, %277 : vector<2x64xf32>
    %c2_137 = arith.constant 2 : index
    %c0_138 = arith.constant 0 : index
    %279 = vector.load %arg15[%c2_137, %c0_138] : memref<16x64xf32, #tpu.memory_space<vmem>>, vector<2x64xf32>
    tpu.vector_store %arg15[%c2_137, %c0_138], %278 {strides = array<i32>} : memref<16x64xf32, #tpu.memory_space<vmem>>, vector<2x64xf32>,
    %c4_139 = arith.constant 4 : index
    %c0_140 = arith.constant 0 : index
    %280 = vector.load %arg14[%c4_139, %c0_140] : memref<16x256xf32, #tpu.memory_space<vmem>>, vector<2x256xf32>
    %cst_141 = arith.constant dense<0.000000e+00> : vector<2x256xf32>
    %281 = tpu.matmul %278, %231, %cst_141 {dimension_numbers = #tpu.dot_dimension_numbers<[1], [0], [0], [1], [0, 0, 1, 1], [], []>} : vector<2x64xf32>, vector<64x256xf32>, vector<2x256xf32> -> vector<2x256xf32>
    %282 = arith.addf %280, %281 : vector<2x256xf32>
    %283 = arith.negf %282 : vector<2x256xf32>
    %284 = math.exp %283 : vector<2x256xf32>
    %cst_142 = arith.constant 1.000000e+00 : f32
    %285 = vector.broadcast %cst_142 : f32 to vector<2x256xf32>
    %286 = arith.addf %285, %284 : vector<2x256xf32>
    %287 = arith.divf %285, %286 : vector<2x256xf32>
    %cst_143 = arith.constant 2.000000e+00 : f32
    %288 = vector.broadcast %cst_143 : f32 to vector<2x256xf32>
    %289 = arith.mulf %288, %287 : vector<2x256xf32>
    %cst_144 = arith.constant 1.000000e+00 : f32
    %290 = vector.broadcast %cst_144 : f32 to vector<2x256xf32>
    %291 = arith.subf %289, %290 : vector<2x256xf32>
    %292 = arith.select %5, %291, %287 : vector<2x256xi1>, vector<2x256xf32>
    %293 = vector.extract_strided_slice %292 {offsets = [0, 0], sizes = [2, 64], strides = [1, 1]} : vector<2x256xf32> to vector<2x64xf32>
    %294 = vector.extract_strided_slice %292 {offsets = [0, 64], sizes = [2, 64], strides = [1, 1]} : vector<2x256xf32> to vector<2x64xf32>
    %295 = vector.extract_strided_slice %292 {offsets = [0, 128], sizes = [2, 64], strides = [1, 1]} : vector<2x256xf32> to vector<2x64xf32>
    %296 = vector.extract_strided_slice %292 {offsets = [0, 192], sizes = [2, 64], strides = [1, 1]} : vector<2x256xf32> to vector<2x64xf32>
    %297 = arith.mulf %294, %276 : vector<2x64xf32>
    %298 = arith.mulf %293, %295 : vector<2x64xf32>
    %299 = arith.addf %297, %298 : vector<2x64xf32>
    %300 = math.tanh %299 : vector<2x64xf32>
    %301 = arith.mulf %296, %300 : vector<2x64xf32>
    %c4_145 = arith.constant 4 : index
    %c0_146 = arith.constant 0 : index
    %302 = vector.load %arg15[%c4_145, %c0_146] : memref<16x64xf32, #tpu.memory_space<vmem>>, vector<2x64xf32>
    tpu.vector_store %arg15[%c4_145, %c0_146], %301 {strides = array<i32>} : memref<16x64xf32, #tpu.memory_space<vmem>>, vector<2x64xf32>,
    %c6_147 = arith.constant 6 : index
    %c0_148 = arith.constant 0 : index
    %303 = vector.load %arg14[%c6_147, %c0_148] : memref<16x256xf32, #tpu.memory_space<vmem>>, vector<2x256xf32>
    %cst_149 = arith.constant dense<0.000000e+00> : vector<2x256xf32>
    %304 = tpu.matmul %301, %231, %cst_149 {dimension_numbers = #tpu.dot_dimension_numbers<[1], [0], [0], [1], [0, 0, 1, 1], [], []>} : vector<2x64xf32>, vector<64x256xf32>, vector<2x256xf32> -> vector<2x256xf32>
    %305 = arith.addf %303, %304 : vector<2x256xf32>
    %306 = arith.negf %305 : vector<2x256xf32>
    %307 = math.exp %306 : vector<2x256xf32>
    %cst_150 = arith.constant 1.000000e+00 : f32
    %308 = vector.broadcast %cst_150 : f32 to vector<2x256xf32>
    %309 = arith.addf %308, %307 : vector<2x256xf32>
    %310 = arith.divf %308, %309 : vector<2x256xf32>
    %cst_151 = arith.constant 2.000000e+00 : f32
    %311 = vector.broadcast %cst_151 : f32 to vector<2x256xf32>
    %312 = arith.mulf %311, %310 : vector<2x256xf32>
    %cst_152 = arith.constant 1.000000e+00 : f32
    %313 = vector.broadcast %cst_152 : f32 to vector<2x256xf32>
    %314 = arith.subf %312, %313 : vector<2x256xf32>
    %315 = arith.select %5, %314, %310 : vector<2x256xi1>, vector<2x256xf32>
    %316 = vector.extract_strided_slice %315 {offsets = [0, 0], sizes = [2, 64], strides = [1, 1]} : vector<2x256xf32> to vector<2x64xf32>
    %317 = vector.extract_strided_slice %315 {offsets = [0, 64], sizes = [2, 64], strides = [1, 1]} : vector<2x256xf32> to vector<2x64xf32>
    %318 = vector.extract_strided_slice %315 {offsets = [0, 128], sizes = [2, 64], strides = [1, 1]} : vector<2x256xf32> to vector<2x64xf32>
    %319 = vector.extract_strided_slice %315 {offsets = [0, 192], sizes = [2, 64], strides = [1, 1]} : vector<2x256xf32> to vector<2x64xf32>
    %320 = arith.mulf %317, %299 : vector<2x64xf32>
    %321 = arith.mulf %316, %318 : vector<2x64xf32>
    %322 = arith.addf %320, %321 : vector<2x64xf32>
    %323 = math.tanh %322 : vector<2x64xf32>
    %324 = arith.mulf %319, %323 : vector<2x64xf32>
    %c6_153 = arith.constant 6 : index
    %c0_154 = arith.constant 0 : index
    %325 = vector.load %arg15[%c6_153, %c0_154] : memref<16x64xf32, #tpu.memory_space<vmem>>, vector<2x64xf32>
    tpu.vector_store %arg15[%c6_153, %c0_154], %324 {strides = array<i32>} : memref<16x64xf32, #tpu.memory_space<vmem>>, vector<2x64xf32>,
    %c8_155 = arith.constant 8 : index
    %c0_156 = arith.constant 0 : index
    %326 = vector.load %arg14[%c8_155, %c0_156] : memref<16x256xf32, #tpu.memory_space<vmem>>, vector<2x256xf32>
    %cst_157 = arith.constant dense<0.000000e+00> : vector<2x256xf32>
    %327 = tpu.matmul %324, %231, %cst_157 {dimension_numbers = #tpu.dot_dimension_numbers<[1], [0], [0], [1], [0, 0, 1, 1], [], []>} : vector<2x64xf32>, vector<64x256xf32>, vector<2x256xf32> -> vector<2x256xf32>
    %328 = arith.addf %326, %327 : vector<2x256xf32>
    %329 = arith.negf %328 : vector<2x256xf32>
    %330 = math.exp %329 : vector<2x256xf32>
    %cst_158 = arith.constant 1.000000e+00 : f32
    %331 = vector.broadcast %cst_158 : f32 to vector<2x256xf32>
    %332 = arith.addf %331, %330 : vector<2x256xf32>
    %333 = arith.divf %331, %332 : vector<2x256xf32>
    %cst_159 = arith.constant 2.000000e+00 : f32
    %334 = vector.broadcast %cst_159 : f32 to vector<2x256xf32>
    %335 = arith.mulf %334, %333 : vector<2x256xf32>
    %cst_160 = arith.constant 1.000000e+00 : f32
    %336 = vector.broadcast %cst_160 : f32 to vector<2x256xf32>
    %337 = arith.subf %335, %336 : vector<2x256xf32>
    %338 = arith.select %5, %337, %333 : vector<2x256xi1>, vector<2x256xf32>
    %339 = vector.extract_strided_slice %338 {offsets = [0, 0], sizes = [2, 64], strides = [1, 1]} : vector<2x256xf32> to vector<2x64xf32>
    %340 = vector.extract_strided_slice %338 {offsets = [0, 64], sizes = [2, 64], strides = [1, 1]} : vector<2x256xf32> to vector<2x64xf32>
    %341 = vector.extract_strided_slice %338 {offsets = [0, 128], sizes = [2, 64], strides = [1, 1]} : vector<2x256xf32> to vector<2x64xf32>
    %342 = vector.extract_strided_slice %338 {offsets = [0, 192], sizes = [2, 64], strides = [1, 1]} : vector<2x256xf32> to vector<2x64xf32>
    %343 = arith.mulf %340, %322 : vector<2x64xf32>
    %344 = arith.mulf %339, %341 : vector<2x64xf32>
    %345 = arith.addf %343, %344 : vector<2x64xf32>
    %346 = math.tanh %345 : vector<2x64xf32>
    %347 = arith.mulf %342, %346 : vector<2x64xf32>
    %c8_161 = arith.constant 8 : index
    %c0_162 = arith.constant 0 : index
    %348 = vector.load %arg15[%c8_161, %c0_162] : memref<16x64xf32, #tpu.memory_space<vmem>>, vector<2x64xf32>
    tpu.vector_store %arg15[%c8_161, %c0_162], %347 {strides = array<i32>} : memref<16x64xf32, #tpu.memory_space<vmem>>, vector<2x64xf32>,
    %c10_163 = arith.constant 10 : index
    %c0_164 = arith.constant 0 : index
    %349 = vector.load %arg14[%c10_163, %c0_164] : memref<16x256xf32, #tpu.memory_space<vmem>>, vector<2x256xf32>
    %cst_165 = arith.constant dense<0.000000e+00> : vector<2x256xf32>
    %350 = tpu.matmul %347, %231, %cst_165 {dimension_numbers = #tpu.dot_dimension_numbers<[1], [0], [0], [1], [0, 0, 1, 1], [], []>} : vector<2x64xf32>, vector<64x256xf32>, vector<2x256xf32> -> vector<2x256xf32>
    %351 = arith.addf %349, %350 : vector<2x256xf32>
    %352 = arith.negf %351 : vector<2x256xf32>
    %353 = math.exp %352 : vector<2x256xf32>
    %cst_166 = arith.constant 1.000000e+00 : f32
    %354 = vector.broadcast %cst_166 : f32 to vector<2x256xf32>
    %355 = arith.addf %354, %353 : vector<2x256xf32>
    %356 = arith.divf %354, %355 : vector<2x256xf32>
    %cst_167 = arith.constant 2.000000e+00 : f32
    %357 = vector.broadcast %cst_167 : f32 to vector<2x256xf32>
    %358 = arith.mulf %357, %356 : vector<2x256xf32>
    %cst_168 = arith.constant 1.000000e+00 : f32
    %359 = vector.broadcast %cst_168 : f32 to vector<2x256xf32>
    %360 = arith.subf %358, %359 : vector<2x256xf32>
    %361 = arith.select %5, %360, %356 : vector<2x256xi1>, vector<2x256xf32>
    %362 = vector.extract_strided_slice %361 {offsets = [0, 0], sizes = [2, 64], strides = [1, 1]} : vector<2x256xf32> to vector<2x64xf32>
    %363 = vector.extract_strided_slice %361 {offsets = [0, 64], sizes = [2, 64], strides = [1, 1]} : vector<2x256xf32> to vector<2x64xf32>
    %364 = vector.extract_strided_slice %361 {offsets = [0, 128], sizes = [2, 64], strides = [1, 1]} : vector<2x256xf32> to vector<2x64xf32>
    %365 = vector.extract_strided_slice %361 {offsets = [0, 192], sizes = [2, 64], strides = [1, 1]} : vector<2x256xf32> to vector<2x64xf32>
    %366 = arith.mulf %363, %345 : vector<2x64xf32>
    %367 = arith.mulf %362, %364 : vector<2x64xf32>
    %368 = arith.addf %366, %367 : vector<2x64xf32>
    %369 = math.tanh %368 : vector<2x64xf32>
    %370 = arith.mulf %365, %369 : vector<2x64xf32>
    %c10_169 = arith.constant 10 : index
    %c0_170 = arith.constant 0 : index
    %371 = vector.load %arg15[%c10_169, %c0_170] : memref<16x64xf32, #tpu.memory_space<vmem>>, vector<2x64xf32>
    tpu.vector_store %arg15[%c10_169, %c0_170], %370 {strides = array<i32>} : memref<16x64xf32, #tpu.memory_space<vmem>>, vector<2x64xf32>,
    %c12_171 = arith.constant 12 : index
    %c0_172 = arith.constant 0 : index
    %372 = vector.load %arg14[%c12_171, %c0_172] : memref<16x256xf32, #tpu.memory_space<vmem>>, vector<2x256xf32>
    %cst_173 = arith.constant dense<0.000000e+00> : vector<2x256xf32>
    %373 = tpu.matmul %370, %231, %cst_173 {dimension_numbers = #tpu.dot_dimension_numbers<[1], [0], [0], [1], [0, 0, 1, 1], [], []>} : vector<2x64xf32>, vector<64x256xf32>, vector<2x256xf32> -> vector<2x256xf32>
    %374 = arith.addf %372, %373 : vector<2x256xf32>
    %375 = arith.negf %374 : vector<2x256xf32>
    %376 = math.exp %375 : vector<2x256xf32>
    %cst_174 = arith.constant 1.000000e+00 : f32
    %377 = vector.broadcast %cst_174 : f32 to vector<2x256xf32>
    %378 = arith.addf %377, %376 : vector<2x256xf32>
    %379 = arith.divf %377, %378 : vector<2x256xf32>
    %cst_175 = arith.constant 2.000000e+00 : f32
    %380 = vector.broadcast %cst_175 : f32 to vector<2x256xf32>
    %381 = arith.mulf %380, %379 : vector<2x256xf32>
    %cst_176 = arith.constant 1.000000e+00 : f32
    %382 = vector.broadcast %cst_176 : f32 to vector<2x256xf32>
    %383 = arith.subf %381, %382 : vector<2x256xf32>
    %384 = arith.select %5, %383, %379 : vector<2x256xi1>, vector<2x256xf32>
    %385 = vector.extract_strided_slice %384 {offsets = [0, 0], sizes = [2, 64], strides = [1, 1]} : vector<2x256xf32> to vector<2x64xf32>
    %386 = vector.extract_strided_slice %384 {offsets = [0, 64], sizes = [2, 64], strides = [1, 1]} : vector<2x256xf32> to vector<2x64xf32>
    %387 = vector.extract_strided_slice %384 {offsets = [0, 128], sizes = [2, 64], strides = [1, 1]} : vector<2x256xf32> to vector<2x64xf32>
    %388 = vector.extract_strided_slice %384 {offsets = [0, 192], sizes = [2, 64], strides = [1, 1]} : vector<2x256xf32> to vector<2x64xf32>
    %389 = arith.mulf %386, %368 : vector<2x64xf32>
    %390 = arith.mulf %385, %387 : vector<2x64xf32>
    %391 = arith.addf %389, %390 : vector<2x64xf32>
    %392 = math.tanh %391 : vector<2x64xf32>
    %393 = arith.mulf %388, %392 : vector<2x64xf32>
    %c12_177 = arith.constant 12 : index
    %c0_178 = arith.constant 0 : index
    %394 = vector.load %arg15[%c12_177, %c0_178] : memref<16x64xf32, #tpu.memory_space<vmem>>, vector<2x64xf32>
    tpu.vector_store %arg15[%c12_177, %c0_178], %393 {strides = array<i32>} : memref<16x64xf32, #tpu.memory_space<vmem>>, vector<2x64xf32>,
    %c14_179 = arith.constant 14 : index
    %c0_180 = arith.constant 0 : index
    %395 = vector.load %arg14[%c14_179, %c0_180] : memref<16x256xf32, #tpu.memory_space<vmem>>, vector<2x256xf32>
    %cst_181 = arith.constant dense<0.000000e+00> : vector<2x256xf32>
    %396 = tpu.matmul %393, %231, %cst_181 {dimension_numbers = #tpu.dot_dimension_numbers<[1], [0], [0], [1], [0, 0, 1, 1], [], []>} : vector<2x64xf32>, vector<64x256xf32>, vector<2x256xf32> -> vector<2x256xf32>
    %397 = arith.addf %395, %396 : vector<2x256xf32>
    %398 = arith.negf %397 : vector<2x256xf32>
    %399 = math.exp %398 : vector<2x256xf32>
    %cst_182 = arith.constant 1.000000e+00 : f32
    %400 = vector.broadcast %cst_182 : f32 to vector<2x256xf32>
    %401 = arith.addf %400, %399 : vector<2x256xf32>
    %402 = arith.divf %400, %401 : vector<2x256xf32>
    %cst_183 = arith.constant 2.000000e+00 : f32
    %403 = vector.broadcast %cst_183 : f32 to vector<2x256xf32>
    %404 = arith.mulf %403, %402 : vector<2x256xf32>
    %cst_184 = arith.constant 1.000000e+00 : f32
    %405 = vector.broadcast %cst_184 : f32 to vector<2x256xf32>
    %406 = arith.subf %404, %405 : vector<2x256xf32>
    %407 = arith.select %5, %406, %402 : vector<2x256xi1>, vector<2x256xf32>
    %408 = vector.extract_strided_slice %407 {offsets = [0, 0], sizes = [2, 64], strides = [1, 1]} : vector<2x256xf32> to vector<2x64xf32>
    %409 = vector.extract_strided_slice %407 {offsets = [0, 64], sizes = [2, 64], strides = [1, 1]} : vector<2x256xf32> to vector<2x64xf32>
    %410 = vector.extract_strided_slice %407 {offsets = [0, 128], sizes = [2, 64], strides = [1, 1]} : vector<2x256xf32> to vector<2x64xf32>
    %411 = vector.extract_strided_slice %407 {offsets = [0, 192], sizes = [2, 64], strides = [1, 1]} : vector<2x256xf32> to vector<2x64xf32>
    %412 = arith.mulf %409, %391 : vector<2x64xf32>
    %413 = arith.mulf %408, %410 : vector<2x64xf32>
    %414 = arith.addf %412, %413 : vector<2x64xf32>
    %415 = math.tanh %414 : vector<2x64xf32>
    %416 = arith.mulf %411, %415 : vector<2x64xf32>
    %c14_185 = arith.constant 14 : index
    %c0_186 = arith.constant 0 : index
    %417 = vector.load %arg15[%c14_185, %c0_186] : memref<16x64xf32, #tpu.memory_space<vmem>>, vector<2x64xf32>
    tpu.vector_store %arg15[%c14_185, %c0_186], %416 {strides = array<i32>} : memref<16x64xf32, #tpu.memory_space<vmem>>, vector<2x64xf32>,
    %c0_187 = arith.constant 0 : index
    %c0_188 = arith.constant 0 : index
    %418 = vector.load %arg10[%c0_187, %c0_188] : memref<64x4xf32, #tpu.memory_space<vmem>>, vector<64x4xf32>
    %cst_189 = arith.constant dense<0.000000e+00> : vector<2x4xf32>
    %419 = tpu.matmul %416, %418, %cst_189 {dimension_numbers = #tpu.dot_dimension_numbers<[1], [0], [0], [1], [0, 0, 1, 1], [], []>} : vector<2x64xf32>, vector<64x4xf32>, vector<2x4xf32> -> vector<2x4xf32>
    %c0_190 = arith.constant 0 : index
    %c0_191 = arith.constant 0 : index
    %420 = vector.load %arg11[%c0_190, %c0_191] : memref<64x4xf32, #tpu.memory_space<vmem>>, vector<64x4xf32>
    %cst_192 = arith.constant dense<0.000000e+00> : vector<2x4xf32>
    %421 = tpu.matmul %255, %420, %cst_192 {dimension_numbers = #tpu.dot_dimension_numbers<[1], [0], [0], [1], [0, 0, 1, 1], [], []>} : vector<2x64xf32>, vector<64x4xf32>, vector<2x4xf32> -> vector<2x4xf32>
    %422 = arith.addf %419, %421 : vector<2x4xf32>
    %c0_193 = arith.constant 0 : index
    %c0_194 = arith.constant 0 : index
    %423 = vector.load %arg12[%c0_193, %c0_194] : memref<1x4xf32, #tpu.memory_space<vmem>>, vector<1x4xf32>
    %424 = vector.broadcast %423 : vector<1x4xf32> to vector<2x4xf32>
    %425 = arith.addf %422, %424 : vector<2x4xf32>
    %c0_195 = arith.constant 0 : index
    %c0_196 = arith.constant 0 : index
    %426 = vector.load %arg13[%c0_195, %c0_196] : memref<2x4xf32, #tpu.memory_space<vmem>>, vector<2x4xf32>
    tpu.vector_store %arg13[%c0_195, %c0_196], %425 {strides = array<i32>} : memref<2x4xf32, #tpu.memory_space<vmem>>, vector<2x4xf32>,
    return
  }
}

</mosaic_0001>

<bundles_post_ra>
// kernel: bilstm_forward.1
= control target key start
LH: loop header
LB: loop body
LE: loop exit
PB: predicated region body
PF: predicated region fallthrough
CT: control target
= control target key end

     0   :  { %18 = vsyncpa [#allocation6], 0  ;;  %s3566_s0 = inlined_call_operand.vmem [shape: f32[16,32], index: 0, kind: input, shape index: {}]   ;;  %s3567_s1 = inlined_call_operand.vmem [shape: f32[16,32], index: 1, kind: input, shape index: {}]   ;;  %s3568_s2 = inlined_call_operand.hbm [shape: f32[32,256], index: 2, kind: input, shape index: {}]   ;;  %s3569_s3 = inlined_call_operand.hbm [shape: f32[32,256], index: 3, kind: input, shape index: {}]   ;;  %s3570_s4 = inlined_call_operand.vmem [shape: f32[64,256], index: 4, kind: input, shape index: {}]   ;;  %s3571_s5 = inlined_call_operand.vmem [shape: f32[1,256], index: 5, kind: input, shape index: {}]   ;;  %s3572_s6 = inlined_call_operand.hbm [shape: f32[64,256], index: 6, kind: input, shape index: {}]   ;;  %s3573_s7 = inlined_call_operand.hbm [shape: f32[64,256], index: 7, kind: input, shape index: {}]   ;;  %s3574_s8 = inlined_call_operand.hbm [shape: f32[64,256], index: 8, kind: input, shape index: {}]   ;;  %s3575_s9 = inlined_call_operand.vmem [shape: f32[1,256], index: 9, kind: input, shape index: {}]   ;;  %s3576_s10 = inlined_call_operand.vmem [shape: f32[64,4], index: 10, kind: input, shape index: {}]   ;;  %s3577_s11 = inlined_call_operand.vmem [shape: f32[64,4], index: 11, kind: input, shape index: {}]   ;;  %s3578_s12 = inlined_call_operand.vmem [shape: f32[1,4], index: 12, kind: input, shape index: {}]   ;;  %s3579_s13 = inlined_call_operand.hbm [shape: f32[2,4], index: 13, kind: output, shape index: {}]  }
   0x1   :  { %19 = vsyncpa [#allocation9], 0 }
   0x2   :  { %20 = vsyncpa [#allocation12], 0 }
   0x3   :  { %21 = vsyncpa [#allocation7], 0  ;;  %s43_s27 = sshll.u32 %s3569_s3, 4  ;;  %s2805_s28 = smov [#allocation8]   ;;  %s44_s27 = int_to_ptr.hbm [resolvable:$true] %s43_s27 }
   0x4   :  { %s45_s29 = sshll.u32 %s2805_s28, 4  ;;  %s73_s15 = sshll.u32 %s3573_s7, 4  ;;  %s46_s29 = int_to_ptr.vmem [resolvable:$true] %s45_s29  ;;  %s74_s15 = int_to_ptr.hbm [resolvable:$true] %s73_s15 }
   0x5   :  { %s2806_s16 = smov 256   ;;  %s2807_s17 = smov 16  }
   0x6   :  { %51 = dma.hbm_to_vmem [thread:$0]  %s44_s27, 1024, %s46_s29, [#allocation9], %s2806_s16, %s2806_s16, %s2807_s17  }
   0x7   :  { %s2808_s18 = smov [#allocation11]   ;;  %s30_s22 = sshll.u32 %s3568_s2, 4  ;;  %s31_s22 = int_to_ptr.hbm [resolvable:$true] %s30_s22 }
   0x8   :  { %s75_s19 = sshll.u32 %s2808_s18, 4  ;;  %s60_s24 = sshll.u32 %s3572_s6, 4  ;;  %s76_s19 = int_to_ptr.vmem [resolvable:$true] %s75_s19  ;;  %s61_s24 = int_to_ptr.hbm [resolvable:$true] %s60_s24 }
   0x9   :  { %81 = dma.hbm_to_vmem [thread:$0]  %s74_s15, 2048, %s76_s19, [#allocation12], %s2806_s16, %s2806_s16, %s2807_s17  }
   0xa   :  { %s2809_s25 = smov [#allocation5]   ;;  %s2810_s7 = smov [#allocation10]  }
   0xb   :  { %s32_s26 = sshll.u32 %s2809_s25, 4  ;;  %s62_s27 = sshll.u32 %s2810_s7, 4  ;;  %s33_s26 = int_to_ptr.vmem [resolvable:$true] %s32_s26  ;;  %s63_s27 = int_to_ptr.vmem [resolvable:$true] %s62_s27 }
   0xc   :  { %38 = dma.hbm_to_vmem [thread:$0]  %s31_s22, 1024, %s33_s26, [#allocation6], %s2806_s16, %s2806_s16, %s2807_s17  }
   0xd   :  { %s86_s30 = sshll.u32 %s3574_s8, 4  ;;  %s2811_s2 = smov [#allocation13]   ;;  %s87_s30 = int_to_ptr.hbm [resolvable:$true] %s86_s30 }
   0xe   :  { %68 = dma.hbm_to_vmem [thread:$0]  %s61_s24, 2048, %s63_s27, [#allocation9], %s2806_s16, %s2806_s16, %s2807_s17  }
   0xf   :  { %s88_s14 = sshll.u32 %s2811_s2, 4  ;;  %s89_s14 = int_to_ptr.vmem [resolvable:$true] %s88_s14 }
  0x10   :  { %94 = dma.hbm_to_vmem [thread:$0]  %s87_s30, 2048, %s89_s14, [#allocation12], %s2806_s16, %s2806_s16, %s2807_s17  }
  0x11   :  { %2797 = dma.done.wait [#allocation6], 1024  }
  0x12   :  { %2798 = vsyncadd [#allocation6], 4294966272 }
  0x13   :  { %2799 = dma.done.wait [#allocation9], 3072  }
  0x14   :  { %2800 = vsyncadd [#allocation9], 4294964224 }
  0x15   :  { %2801 = dma.done.wait [#allocation12], 4096  }
  0x16   :  { %2802 = vsyncadd [#allocation12], 4294963200  ;;  %v140_v0 = vld [vmem:[#allocation5 + $0x30] sm:$0xff]  ;;  %v141_v1 = vld [vmem:[#allocation5 + $0x38] sm:$0xff]  ;;  %vm152_vm0 = vcmask 261120   ;;  %v2812_v36 = vmov 0.0  }
  0x17   :  { %v150_v2 = vld [vmem:[#allocation8 + $0x30] sm:$0xff]  ;;  %223 = vmatpush.msra.mxu2 %v140_v0  ;;  %246 = vmatpush.msra.mxu3 %v141_v1  ;;  %v151_v3 = vld [vmem:[#allocation8 + $0x38] sm:$0xff]  ;;  %v138_v4 = vld [vmem:[#allocation5 + $0x20] sm:$0xff]  ;;  %vm392_vm10 = vcmask 517120   ;;  %vm289_vm11 = vcmask 523264   ;;  %s2814_s8 = smov [#allocation14]  }
  0x18   :  { %v139_v5 = vld [vmem:[#allocation5 + $0x28] sm:$0xff]  ;;  %171 = vmatpush.msra.mxu0 %v150_v2  ;;  %194 = vmatpush.msra.mxu1 %v151_v3  ;;  %v148_v6 = vld [vmem:[#allocation8 + $0x20] sm:$0xff]  ;;  %v136_v8 = vld [vmem:[#allocation5 + $0x10] sm:$0xff]  ;;  %s2358_s15 = sshll.u32 %s2814_s8, 4  ;;  %s2359_s15 = int_to_ptr.vmem [resolvable:$true] %s2358_s15 }
  0x19   :  { %v149_v7 = vld [vmem:[#allocation8 + $0x28] sm:$0xff]  ;;  %224 = vmatpush.msra.mxu2 %v138_v4  ;;  %247 = vmatpush.msra.mxu3 %v139_v5  ;;  %v137_v9 = vld [vmem:[#allocation5 + $0x18] sm:$0xff]  ;;  %v146_v10 = vld [vmem:[#allocation8 + $0x10] sm:$0xff] }
  0x1a   :  { %v147_v11 = vld [vmem:[#allocation8 + $0x18] sm:$0xff]  ;;  %172 = vmatpush.msra.mxu0 %v148_v6  ;;  %195 = vmatpush.msra.mxu1 %v149_v7  ;;  %v134_v12 = vld [vmem:[#allocation5] sm:$0xff]  ;;  %v135_v13 = vld [vmem:[#allocation5 + $0x8] sm:$0xff]  ;;  %v123_v6 = vlaneseq }
  0x1b   :  { %225 = vmatpush.msra.mxu2 %v136_v8  ;;  %248 = vmatpush.msra.mxu3 %v137_v9  ;;  %v132_v14 = vld [vmem:[%s3566_s0] sm:$0xff]  ;;  %v145_v16 = vld [vmem:[#allocation8 + $0x8] sm:$0xff]  ;;  %v2911_v18 = vld [vmem:[%s3570_s4 + $0x78] sm:$0xff] }
  0x1c   :  { %173 = vmatpush.msra.mxu0 %v146_v10  ;;  %196 = vmatpush.msra.mxu1 %v147_v11  ;;  %v144_v15 = vld [vmem:[#allocation8] sm:$0xff]  ;;  %v2916_v19 = vld [vmem:[%s3570_s4 + $0x70] sm:$0xff]  ;;  %v2923_v20 = vld [vmem:[%s3570_s4 + $0x68] sm:$0xff]  ;;  %v124_v11 = vand.u32 127, %v123_v6 }
  0x1d   :  { %226 = vmatpush.msra.mxu2 %v134_v12  ;;  %249 = vmatpush.msra.mxu3 %v135_v13  ;;  %v142_v17 = vld [vmem:[%s3567_s1] sm:$0xff]  ;;  %v2935_v22 = vld [vmem:[%s3570_s4 + $0x58] sm:$0xff]  ;;  %v2940_v23 = vld [vmem:[%s3570_s4 + $0x50] sm:$0xff] }
  0x1e   :  { %2376 = vmatmul.msk.f32.vlgmr.msra.gmra.mxu2 %vm152_vm0, %v132_v14  ;;  %2378 = vmatmul.msk.f32.vlgmr.msra.gmra.mxu3 %vm152_vm0, %v132_v14  ;;  %v2928_v21 = vld [vmem:[%s3570_s4 + $0x60] sm:$0xff]  ;;  %v133_v24 = vld [vmem:[%s3566_s0 + $0x8] sm:$0xff]  ;;  %v2971_v28 = vld [vmem:[%s3570_s4 + $0x38] sm:$0xff] }
  0x1f   :  { %174 = vmatpush.msra.mxu0 %v144_v15  ;;  %197 = vmatpush.msra.mxu1 %v145_v16  ;;  %v2952_v25 = vld [vmem:[%s3570_s4 + $0x48] sm:$0xff]  ;;  %v2957_v26 = vld [vmem:[%s3570_s4 + $0x40] sm:$0xff]  ;;  %v2976_v29 = vld [vmem:[%s3570_s4 + $0x30] sm:$0xff] }
  0x20   :  { %2372 = vmatmul.msk.f32.vlgmr.msra.gmra.mxu0 %vm152_vm0, %v142_v17  ;;  %2374 = vmatmul.msk.f32.vlgmr.msra.gmra.mxu1 %vm152_vm0, %v142_v17  ;;  %v143_v27 = vld [vmem:[%s3567_s1 + $0x8] sm:$0xff]  ;;  %v2990_v31 = vld [vmem:[%s3570_s4 + $0x20] sm:$0xff]  ;;  %v2997_v32 = vld [vmem:[%s3570_s4 + $0x18] sm:$0xff]  ;;  %v3085_v17 = vadd.s32 128, %v124_v11 }
  0x21   :  { %321 = vmatpush.msrb.mxu1 %v2911_v18  ;;  %301 = vmatpush.msrb.mxu0 %v2916_v19  ;;  %v2985_v30 = vld [vmem:[%s3570_s4 + $0x28] sm:$0xff]  ;;  %v3002_v33 = vld [vmem:[%s3570_s4 + $0x10] sm:$0xff]  ;;  %v3016_v35 = vld [vmem:[%s3570_s4] sm:$0xff] }
  0x22   :  { %426 = vmatpush.msrb.mxu3 %v2911_v18  ;;  %406 = vmatpush.msrb.mxu2 %v2916_v19  ;;  %v3011_v34 = vld [vmem:[%s3570_s4 + $0x8] sm:$0xff]  ;;  %v257_v39 = vld [vmem:[%s3571_s5] sm:$0x3]  ;;  %vm129_vm8 = vcmp.lt.s32.totalorder %v3085_v17, 192  ;;  %s2813_s5 = smov 64  }
  0x23   :  { %322 = vmatpush.msrb.mxu1 %v2923_v20  ;;  %302 = vmatpush.msrb.mxu0 %v2928_v21  ;;  %v259_v40 = vperm.slane %v257_v39, 0  ;;  %v260_v41 = vperm.slane %v257_v39, 1 }
  0x24   :  { %427 = vmatpush.msrb.mxu3 %v2923_v20  ;;  %407 = vmatpush.msrb.mxu2 %v2928_v21 }
  0x25   :  { %323 = vmatpush.msrb.mxu1 %v2935_v22  ;;  %303 = vmatpush.msrb.mxu0 %v2940_v23 }
  0x26   :  { %2379 = vmatmul.msk.f32.gmra.mxu3 %vm152_vm0, %v133_v24  ;;  %2377 = vmatmul.msk.f32.gmra.mxu2 %vm152_vm0, %v133_v24 }
  0x27   :  { %324 = vmatpush.msrb.mxu1 %v2952_v25  ;;  %304 = vmatpush.msrb.mxu0 %v2957_v26 }
  0x28   :  { %2373 = vmatmul.msk.f32.gmra.mxu0 %vm152_vm0, %v143_v27  ;;  %2375 = vmatmul.msk.f32.gmra.mxu1 %vm152_vm0, %v143_v27 }
  0x29   :  { %325 = vmatpush.msrb.mxu1 %v2971_v28  ;;  %305 = vmatpush.msrb.mxu0 %v2976_v29 }
  0x2a   :  { %428 = vmatpush.msrb.mxu3 %v2935_v22  ;;  %408 = vmatpush.msrb.mxu2 %v2940_v23 }
  0x2b   :  { %326 = vmatpush.msrb.mxu1 %v2985_v30  ;;  %306 = vmatpush.msrb.mxu0 %v2990_v31 }
  0x2c   :  { %429 = vmatpush.msrb.mxu3 %v2952_v25  ;;  %409 = vmatpush.msrb.mxu2 %v2957_v26 }
  0x2d   :  { %327 = vmatpush.msrb.mxu1 %v2997_v32  ;;  %307 = vmatpush.msrb.mxu0 %v3002_v33 }
  0x2e   :  { %430 = vmatpush.msrb.mxu3 %v2971_v28  ;;  %410 = vmatpush.msrb.mxu2 %v2976_v29 }
  0x2f   :  { %328 = vmatpush.msrb.mxu1 %v3011_v34  ;;  %308 = vmatpush.msrb.mxu0 %v3016_v35 }
  0x30   :  { %309 = vmatmul.f32.vlgmr.msrb.gmra.mxu0 %v2812_v36  ;;  %329 = vmatmul.f32.vlgmr.msrb.gmra.mxu1 %v2812_v36 }
  0x31   :  { %431 = vmatpush.msrb.mxu3 %v2985_v30  ;;  %411 = vmatpush.msrb.mxu2 %v2990_v31 }
  0x32   :  { %523 = vmatpush.msra.mxu0 %v2916_v19  ;;  %543 = vmatpush.msra.mxu1 %v2911_v18 }
  0x33   :  { %432 = vmatpush.msrb.mxu3 %v2997_v32  ;;  %412 = vmatpush.msrb.mxu2 %v3002_v33 }
  0x34   :  { %524 = vmatpush.msra.mxu0 %v2928_v21  ;;  %544 = vmatpush.msra.mxu1 %v2923_v20 }
  0x35   :  { %433 = vmatpush.msrb.mxu3 %v3011_v34  ;;  %413 = vmatpush.msrb.mxu2 %v3016_v35 }
  0x36   :  { %525 = vmatpush.msra.mxu0 %v2940_v23  ;;  %545 = vmatpush.msra.mxu1 %v2935_v22 }
  0x37   :  { %640 = vmatpush.msra.mxu2 %v2916_v19  ;;  %660 = vmatpush.msra.mxu3 %v2911_v18 }
  0x38   :  { %526 = vmatpush.msra.mxu0 %v2957_v26  ;;  %546 = vmatpush.msra.mxu1 %v2952_v25 }
  0x39   :  { %641 = vmatpush.msra.mxu2 %v2928_v21  ;;  %661 = vmatpush.msra.mxu3 %v2923_v20 }
  0x3a   :  { %527 = vmatpush.msra.mxu0 %v2976_v29  ;;  %547 = vmatpush.msra.mxu1 %v2971_v28 }
  0x3b   :  { %642 = vmatpush.msra.mxu2 %v2940_v23  ;;  %662 = vmatpush.msra.mxu3 %v2935_v22 }
  0x3c   :  { %528 = vmatpush.msra.mxu0 %v2990_v31  ;;  %548 = vmatpush.msra.mxu1 %v2985_v30 }
  0x3d   :  { %643 = vmatpush.msra.mxu2 %v2957_v26  ;;  %663 = vmatpush.msra.mxu3 %v2952_v25 }
  0x3e   :  { %529 = vmatpush.msra.mxu0 %v3002_v33  ;;  %549 = vmatpush.msra.mxu1 %v2997_v32 }
  0x3f   :  { %644 = vmatpush.msra.mxu2 %v2976_v29  ;;  %664 = vmatpush.msra.mxu3 %v2971_v28 }
  0x40   :  { %530 = vmatpush.msra.mxu0 %v3016_v35  ;;  %550 = vmatpush.msra.mxu1 %v3011_v34 }
  0x41   :  { %645 = vmatpush.msra.mxu2 %v2990_v31  ;;  %665 = vmatpush.msra.mxu3 %v2985_v30 }
  0x42   :  { %757 = vmatpush.msrb.mxu0 %v2916_v19  ;;  %777 = vmatpush.msrb.mxu1 %v2911_v18 }
  0x43   :  { %646 = vmatpush.msra.mxu2 %v3002_v33  ;;  %666 = vmatpush.msra.mxu3 %v2997_v32 }
  0x44   :  { %758 = vmatpush.msrb.mxu0 %v2928_v21  ;;  %778 = vmatpush.msrb.mxu1 %v2923_v20 }
  0x45   :  { %647 = vmatpush.msra.mxu2 %v3016_v35  ;;  %667 = vmatpush.msra.mxu3 %v3011_v34 }
  0x46   :  { %759 = vmatpush.msrb.mxu0 %v2940_v23  ;;  %779 = vmatpush.msrb.mxu1 %v2935_v22 }
  0x48   :  { %760 = vmatpush.msrb.mxu0 %v2957_v26  ;;  %780 = vmatpush.msrb.mxu1 %v2952_v25 }
  0x4a   :  { %761 = vmatpush.msrb.mxu0 %v2976_v29  ;;  %781 = vmatpush.msrb.mxu1 %v2971_v28 }
  0x4c   :  { %762 = vmatpush.msrb.mxu0 %v2990_v31  ;;  %782 = vmatpush.msrb.mxu1 %v2985_v30 }
  0x4e   :  { %763 = vmatpush.msrb.mxu0 %v3002_v33  ;;  %783 = vmatpush.msrb.mxu1 %v2997_v32 }
  0x50   :  { %764 = vmatpush.msrb.mxu0 %v3016_v35  ;;  %784 = vmatpush.msrb.mxu1 %v3011_v34 }
  0x9d   :  { %v176_v37 = vpop.f32.mrf.mxu0  ;;  %v199_v38 = vpop.f32.mrf.mxu1 }
  0xa1   :  { %v228_v42 = vpop.f32.mrf.mxu2  ;;  %v251_v43 = vpop.f32.mrf.mxu3 }
  0xa2   :  { %v229_v44 = vadd.f32 %v228_v42, %v176_v37  ;;  %v252_v45 = vadd.f32 %v251_v43, %v199_v38 }
  0xa4   :  { %v263_v46 = vadd.f32 %v259_v40, %v229_v44  ;;  %v264_v47 = vadd.f32 %v260_v41, %v252_v45 }
  0xa5   :  { %v179_v48 = vpop.f32.mrf.mxu0  ;;  %v202_v49 = vpop.f32.mrf.mxu1 }
  0xa6   :  { %267 = vst [vmem:[#allocation2 + $0x10] sm:$0xff] %v263_v46 }
  0xa7   :  { %268 = vst [vmem:[#allocation2] sm:$0xff] %v264_v47 }
  0xa9   :  { %v254_v50 = vpop.f32.mrf.mxu3  ;;  %v231_v51 = vpop.f32.mrf.mxu2 }
  0xaa   :  { %v255_v52 = vadd.f32 %v254_v50, %v202_v49  ;;  %v232_v53 = vadd.f32 %v231_v51, %v179_v48 }
  0xac   :  { %v266_v54 = vadd.f32 %v260_v41, %v255_v52  ;;  %v265_v55 = vadd.f32 %v259_v40, %v232_v53 }
  0xad   :  { %v287_v56 = vld [vmem:[#allocation2 + $0x10] sm:$0x3]  ;;  %v310_v57 = vpop.f32.mrf.mxu0  ;;  %v330_v58 = vpop.f32.mrf.mxu1 }
  0xae   :  { %270 = vst [vmem:[#allocation2 + $0x8] sm:$0xff] %v266_v54  ;;  %v333_v59 = vadd.f32 %v310_v57, %v287_v56  ;;  %v288_v60 = vld [vmem:[#allocation2] sm:$0x3] }
  0xaf   :  { %269 = vst [vmem:[#allocation2 + $0x18] sm:$0xff] %v265_v55  ;;  %v334_v61 = vadd.f32 %v330_v58, %v288_v60  ;;  %v395_v60 = vld [vmem:[#allocation2] sm:$0xc] }
  0xb0   :  { %v2380_v62 = vmul.f32 -1.442695, %v333_v59  ;;  %v394_v59 = vld [vmem:[#allocation2 + $0x10] sm:$0xc] }
  0xb1   :  { %v2381_v63 = vmul.f32 -1.442695, %v334_v61 }
  0xb2   :  { %2493 = vpow2.f32 %v2380_v62 }
  0xb3   :  { %2495 = vpow2.f32 %v2381_v63 }
  0xb8   :  { %v2494_v0 = vpop.eup %2493 }
  0xb9   :  { %v2496_v1 = vpop.eup %2495  ;;  %v341_v2 = vadd.f32 1.0, %v2494_v0 }
  0xba   :  { %v342_v3 = vadd.f32 1.0, %v2496_v1 }
  0xbb   :  { %2497 = vrcp.f32 %v341_v2  ;;  %v354_v37 = vand.u32 2147483648, %v341_v2  ;;  %vm348_vm6 = vweird.f32 %v341_v2  ;;  %v352_v39 = vand.u32 2147483647, %v341_v2 }
  0xbc   :  { %2499 = vrcp.f32 %v342_v3  ;;  %v369_v13 = vand.u32 2147483648, %v342_v3  ;;  %v367_v15 = vand.u32 2147483647, %v342_v3  ;;  %vm363_vm2 = vweird.f32 %v342_v3 }
  0xbd   :  { %v355_v43 = vor.u32 1.1754944e-38, %v354_v37  ;;  %vm353_vm9 = vcmp.eq.f32.partialorder %v352_v39, 8.507059e+37 }
  0xbe   :  { %v370_v27 = vor.u32 1.1754944e-38, %v369_v13  ;;  %vm368_vm5 = vcmp.eq.f32.partialorder %v367_v15, 8.507059e+37 }
  0xc1   :  { %v2498_v4 = vpop.eup %2497 }
  0xc2   :  { %v2500_v5 = vpop.eup %2499  ;;  %v344_v7 = vmul.f32 %v2498_v4, %v341_v2  ;;  %vm349_vm3 = vweird.f32 %v2498_v4 }
  0xc3   :  { %v359_v8 = vmul.f32 %v2500_v5, %v342_v3  ;;  %vm364_vm1 = vweird.f32 %v2500_v5  ;;  %vm350_vm7 = vmor %vm348_vm6, %vm349_vm3 }
  0xc4   :  { %v345_v9 = vsub.f32 1.0, %v344_v7  ;;  %vm365_vm4 = vmor %vm363_vm2, %vm364_vm1 }
  0xc5   :  { %v360_v10 = vsub.f32 1.0, %v359_v8 }
  0xc6   :  { %v346_v12 = vmul.f32 %v2498_v4, %v345_v9 }
  0xc7   :  { %v361_v14 = vmul.f32 %v2500_v5, %v360_v10 }
  0xc8   :  { %v347_v24 = vadd.f32 %v2498_v4, %v346_v12 }
  0xc9   :  { %v362_v16 = vadd.f32 %v2500_v5, %v361_v14 }
  0xca   :  { %v351_v42 = vsel %vm350_vm7, %v2498_v4, %v347_v24 }
  0xcb   :  { %v366_v38 = vsel %vm365_vm4, %v2500_v5, %v362_v16  ;;  %v356_v45 = vsel %vm353_vm9, %v355_v43, %v351_v42 }
  0xcc   :  { %v371_v40 = vsel %vm368_vm5, %v370_v27, %v366_v38  ;;  %v379_v48 = vmul.f32 0.0, %v356_v45 }
  0xcd   :  { %v374_v41 = vmul.f32 2.0, %v371_v40 }
  0xcf   :  { %v2383_v44 = vadd.f32 -1.0, %v374_v41 }
  0xd1   :  { %v378_v46 = vsel %vm129_vm8, %v2383_v44, %v371_v40 }
  0xd2   :  { %v380_v47 = vmul.f32 %v378_v46, %v356_v45 }
  0xd4   :  { %382 = vrot.lane.b32.xlu0 %v380_v47, %s2813_s5 }
 0x146   :  { %v383_v49 = vpop.permute.xlu0 %382 }
 0x147   :  { %v3091_v50 = vadd.f32 %v383_v49, %v379_v48 }
 0x149   :  { %2501 = vtanh.f32 %v3091_v50  ;;  %v491_v38 = vrot.slane %v3091_v50, 6 }
 0x14f   :  { %v2502_v51 = vpop.eup %2501 }
 0x150   :  { %v387_v52 = vmul.f32 %v2502_v51, %v378_v46 }
 0x152   :  { %389 = vrot.lane.b32.xlu0 %v387_v52, %s2813_s5 }
 0x1c4   :  { %v390_v53 = vpop.permute.xlu0 %389 }
 0x1c5   :  { %393 = vst.msk [vmem:[#allocation3] sm:$0x3] %vm392_vm10, %v390_v53  ;;  %2384 = vmatmul.msk.f32.vlgmr.msrb.gmra.mxu2 %vm289_vm11, %v390_v53  ;;  %2385 = vmatmul.msk.f32.vlgmr.msrb.gmra.mxu3 %vm289_vm11, %v390_v53 }
 0x1c6   :  { %864 = vmatpush.msrb.mxu2 %v2916_v19  ;;  %884 = vmatpush.msrb.mxu3 %v2911_v18 }
 0x1c8   :  { %865 = vmatpush.msrb.mxu2 %v2928_v21  ;;  %885 = vmatpush.msrb.mxu3 %v2923_v20 }
 0x1ca   :  { %866 = vmatpush.msrb.mxu2 %v2940_v23  ;;  %886 = vmatpush.msrb.mxu3 %v2935_v22 }
 0x1cc   :  { %v1211_v54 = vld [vmem:[#allocation3] sm:$0x3]  ;;  %867 = vmatpush.msrb.mxu2 %v2957_v26  ;;  %887 = vmatpush.msrb.mxu3 %v2952_v25 }
 0x1cd   :  { %1212 = vst.msk [vmem:[#allocation4 + $0xe] sm:$0x3] %vm392_vm10, %v1211_v54 }
 0x1ce   :  { %868 = vmatpush.msrb.mxu2 %v2976_v29  ;;  %888 = vmatpush.msrb.mxu3 %v2971_v28 }
 0x1d0   :  { %869 = vmatpush.msrb.mxu2 %v2990_v31  ;;  %889 = vmatpush.msrb.mxu3 %v2985_v30 }
 0x1d2   :  { %870 = vmatpush.msrb.mxu2 %v3002_v33  ;;  %890 = vmatpush.msrb.mxu3 %v2997_v32 }
 0x1d4   :  { %871 = vmatpush.msrb.mxu2 %v3016_v35  ;;  %891 = vmatpush.msrb.mxu3 %v3011_v34 }
 0x248   :  { %v415_v55 = vpop.f32.mrf.mxu2  ;;  %v435_v56 = vpop.f32.mrf.mxu3 }
 0x249   :  { %v440_v57 = vrot.slane %v415_v55, 6  ;;  %v441_v58 = vrot.slane %v435_v56, 6 }
 0x24b   :  { %v444_v61 = vadd.f32 %v440_v57, %v394_v59  ;;  %v445_v62 = vadd.f32 %v441_v58, %v395_v60  ;;  %v508_v59 = vld [vmem:[#allocation2 + $0x10] sm:$0x30]  ;;  %v509_v60 = vld [vmem:[#allocation2] sm:$0x30] }
 0x24d   :  { %v2386_v63 = vmul.f32 -1.442695, %v444_v61  ;;  %v2387_v0 = vmul.f32 -1.442695, %v445_v62 }
 0x24f   :  { %2503 = vpow2.f32 %v2386_v63 }
 0x250   :  { %2505 = vpow2.f32 %v2387_v0 }
 0x255   :  { %v2504_v1 = vpop.eup %2503 }
 0x256   :  { %v2506_v2 = vpop.eup %2505  ;;  %v452_v3 = vadd.f32 1.0, %v2504_v1 }
 0x257   :  { %v453_v4 = vadd.f32 1.0, %v2506_v2 }
 0x258   :  { %2507 = vrcp.f32 %v452_v3  ;;  %v465_v10 = vand.u32 2147483648, %v452_v3  ;;  %v463_v13 = vand.u32 2147483647, %v452_v3  ;;  %vm459_vm14 = vweird.f32 %v452_v3 }
 0x259   :  { %2509 = vrcp.f32 %v453_v4  ;;  %v480_v14 = vand.u32 2147483648, %v453_v4  ;;  %v478_v16 = vand.u32 2147483647, %v453_v4  ;;  %vm474_vm0 = vweird.f32 %v453_v4 }
 0x25a   :  { %v466_v27 = vor.u32 1.1754944e-38, %v465_v10  ;;  %vm464_vm1 = vcmp.eq.f32.partialorder %v463_v13, 8.507059e+37 }
 0x25b   :  { %v481_v40 = vor.u32 1.1754944e-38, %v480_v14  ;;  %vm479_vm3 = vcmp.eq.f32.partialorder %v478_v16, 8.507059e+37 }
 0x25e   :  { %v2508_v5 = vpop.eup %2507 }
 0x25f   :  { %v2510_v6 = vpop.eup %2509  ;;  %v455_v7 = vmul.f32 %v2508_v5, %v452_v3  ;;  %vm460_vm12 = vweird.f32 %v2508_v5 }
 0x260   :  { %v470_v8 = vmul.f32 %v2510_v6, %v453_v4  ;;  %vm475_vm13 = vweird.f32 %v2510_v6  ;;  %vm461_vm15 = vmor %vm459_vm14, %vm460_vm12 }
 0x261   :  { %v456_v9 = vsub.f32 1.0, %v455_v7  ;;  %vm476_vm2 = vmor %vm474_vm0, %vm475_vm13 }
 0x262   :  { %v471_v11 = vsub.f32 1.0, %v470_v8 }
 0x263   :  { %v457_v12 = vmul.f32 %v2508_v5, %v456_v9 }
 0x264   :  { %v472_v15 = vmul.f32 %v2510_v6, %v471_v11 }
 0x265   :  { %v458_v24 = vadd.f32 %v2508_v5, %v457_v12 }
 0x266   :  { %v473_v37 = vadd.f32 %v2510_v6, %v472_v15 }
 0x267   :  { %v462_v39 = vsel %vm461_vm15, %v2508_v5, %v458_v24 }
 0x268   :  { %v467_v41 = vsel %vm464_vm1, %v466_v27, %v462_v39  ;;  %v477_v42 = vsel %vm476_vm2, %v2510_v6, %v473_v37 }
 0x269   :  { %v482_v43 = vsel %vm479_vm3, %v481_v40, %v477_v42  ;;  %v493_v44 = vmul.f32 %v491_v38, %v467_v41 }
 0x26a   :  { %v485_v45 = vmul.f32 2.0, %v482_v43 }
 0x26c   :  { %v2389_v46 = vadd.f32 -1.0, %v485_v45 }
 0x26e   :  { %v489_v47 = vsel %vm129_vm8, %v2389_v46, %v482_v43 }
 0x26f   :  { %v494_v48 = vmul.f32 %v489_v47, %v467_v41 }
 0x271   :  { %496 = vrot.lane.b32.xlu1 %v494_v48, %s2813_s5 }
 0x2e3   :  { %v497_v49 = vpop.permute.xlu1 %496 }
 0x2e4   :  { %v3119_v51 = vadd.f32 %v497_v49, %v493_v44 }
 0x2e6   :  { %2511 = vtanh.f32 %v3119_v51  ;;  %v608_v38 = vrot.slane %v3119_v51, 6 }
 0x2ec   :  { %v2512_v50 = vpop.eup %2511 }
 0x2ed   :  { %v3122_v52 = vmul.f32 %v2512_v50, %v489_v47 }
 0x2ef   :  { %v510_v53 = vrot.slane %v3122_v52, 2 }
 0x2f1   :  { %511 = vrot.lane.b32.xlu1 %v510_v53, %s2813_s5 }
 0x363   :  { %v512_v54 = vpop.permute.xlu1 %511 }
 0x364   :  { %2390 = vmatmul.msk.f32.vlgmr.msra.gmra.mxu0 %vm289_vm11, %v512_v54  ;;  %2391 = vmatmul.msk.f32.vlgmr.msra.gmra.mxu1 %vm289_vm11, %v512_v54 }
 0x365   :  { %980 = vmatpush.msra.mxu0 %v2916_v19  ;;  %1000 = vmatpush.msra.mxu1 %v2911_v18 }
 0x367   :  { %981 = vmatpush.msra.mxu0 %v2928_v21  ;;  %1001 = vmatpush.msra.mxu1 %v2923_v20 }
 0x369   :  { %982 = vmatpush.msra.mxu0 %v2940_v23  ;;  %1002 = vmatpush.msra.mxu1 %v2935_v22 }
 0x36b   :  { %983 = vmatpush.msra.mxu0 %v2957_v26  ;;  %1003 = vmatpush.msra.mxu1 %v2952_v25 }
 0x36d   :  { %984 = vmatpush.msra.mxu0 %v2976_v29  ;;  %1004 = vmatpush.msra.mxu1 %v2971_v28 }
 0x36f   :  { %985 = vmatpush.msra.mxu0 %v2990_v31  ;;  %1005 = vmatpush.msra.mxu1 %v2985_v30 }
 0x371   :  { %986 = vmatpush.msra.mxu0 %v3002_v33  ;;  %1006 = vmatpush.msra.mxu1 %v2997_v32 }
 0x373   :  { %987 = vmatpush.msra.mxu0 %v3016_v35  ;;  %1007 = vmatpush.msra.mxu1 %v3011_v34 }
 0x3e1   :  { %v532_v55 = vpop.f32.mrf.mxu0  ;;  %v552_v56 = vpop.f32.mrf.mxu1 }
 0x3e2   :  { %v557_v57 = vrot.slane %v532_v55, 4  ;;  %v558_v58 = vrot.slane %v552_v56, 4 }
 0x3e4   :  { %v561_v61 = vadd.f32 %v557_v57, %v508_v59  ;;  %v562_v62 = vadd.f32 %v558_v58, %v509_v60 }
 0x3e6   :  { %v2392_v63 = vmul.f32 -1.442695, %v561_v61  ;;  %v2393_v0 = vmul.f32 -1.442695, %v562_v62 }
 0x3e8   :  { %2513 = vpow2.f32 %v2392_v63 }
 0x3e9   :  { %2515 = vpow2.f32 %v2393_v0 }
 0x3ee   :  { %v2514_v1 = vpop.eup %2513 }
 0x3ef   :  { %v2516_v2 = vpop.eup %2515  ;;  %v569_v3 = vadd.f32 1.0, %v2514_v1 }
 0x3f0   :  { %v570_v4 = vadd.f32 1.0, %v2516_v2 }
 0x3f1   :  { %2517 = vrcp.f32 %v569_v3  ;;  %v582_v10 = vand.u32 2147483648, %v569_v3  ;;  %v580_v13 = vand.u32 2147483647, %v569_v3  ;;  %vm576_vm6 = vweird.f32 %v569_v3 }
 0x3f2   :  { %2519 = vrcp.f32 %v570_v4  ;;  %v597_v14 = vand.u32 2147483648, %v570_v4  ;;  %v595_v16 = vand.u32 2147483647, %v570_v4  ;;  %vm591_vm9 = vweird.f32 %v570_v4 }
 0x3f3   :  { %v583_v27 = vor.u32 1.1754944e-38, %v582_v10  ;;  %vm581_vm12 = vcmp.eq.f32.partialorder %v580_v13, 8.507059e+37 }
 0x3f4   :  { %v598_v40 = vor.u32 1.1754944e-38, %v597_v14  ;;  %vm596_vm14 = vcmp.eq.f32.partialorder %v595_v16, 8.507059e+37 }
 0x3f7   :  { %v2518_v5 = vpop.eup %2517 }
 0x3f8   :  { %v2520_v6 = vpop.eup %2519  ;;  %v572_v7 = vmul.f32 %v2518_v5, %v569_v3  ;;  %vm577_vm4 = vweird.f32 %v2518_v5 }
 0x3f9   :  { %v587_v8 = vmul.f32 %v2520_v6, %v570_v4  ;;  %vm592_vm5 = vweird.f32 %v2520_v6  ;;  %vm578_vm7 = vmor %vm576_vm6, %vm577_vm4 }
 0x3fa   :  { %v573_v9 = vsub.f32 1.0, %v572_v7  ;;  %vm593_vm13 = vmor %vm591_vm9, %vm592_vm5 }
 0x3fb   :  { %v588_v11 = vsub.f32 1.0, %v587_v8 }
 0x3fc   :  { %v574_v12 = vmul.f32 %v2518_v5, %v573_v9 }
 0x3fd   :  { %v589_v15 = vmul.f32 %v2520_v6, %v588_v11 }
 0x3fe   :  { %v575_v24 = vadd.f32 %v2518_v5, %v574_v12 }
 0x3ff   :  { %v590_v37 = vadd.f32 %v2520_v6, %v589_v15 }
 0x400   :  { %v579_v39 = vsel %vm578_vm7, %v2518_v5, %v575_v24 }
 0x401   :  { %v584_v41 = vsel %vm581_vm12, %v583_v27, %v579_v39  ;;  %v594_v42 = vsel %vm593_vm13, %v2520_v6, %v590_v37 }
 0x402   :  { %v599_v43 = vsel %vm596_vm14, %v598_v40, %v594_v42  ;;  %v610_v44 = vmul.f32 %v608_v38, %v584_v41  ;;  %v742_v40 = vld [vmem:[#allocation2 + $0x18] sm:$0x3]  ;;  %v743_v42 = vld [vmem:[#allocation2 + $0x8] sm:$0x3] }
 0x403   :  { %v602_v45 = vmul.f32 2.0, %v599_v43 }
 0x405   :  { %v2395_v46 = vadd.f32 -1.0, %v602_v45 }
 0x407   :  { %v606_v47 = vsel %vm129_vm8, %v2395_v46, %v599_v43 }
 0x408   :  { %v611_v48 = vmul.f32 %v606_v47, %v584_v41 }
 0x40a   :  { %613 = vrot.lane.b32.xlu2 %v611_v48, %s2813_s5 }
 0x464   :  { %v614_v49 = vpop.permute.xlu2 %613 }
 0x465   :  { %v3148_v50 = vadd.f32 %v614_v49, %v610_v44 }
 0x467   :  { %2521 = vtanh.f32 %v3148_v50  ;;  %v725_v5 = vrot.slane %v3148_v50, 6 }
 0x46d   :  { %v2522_v51 = vpop.eup %2521 }
 0x46e   :  { %v3151_v53 = vmul.f32 %v2522_v51, %v606_v47 }
 0x470   :  { %v627_v54 = vrot.slane %v3151_v53, 4 }
 0x472   :  { %628 = vrot.lane.b32.xlu2 %v627_v54, %s2813_s5 }
 0x4cc   :  { %v629_v55 = vpop.permute.xlu2 %628 }
 0x4cd   :  { %2396 = vmatmul.msk.f32.vlgmr.msra.gmra.mxu2 %vm289_vm11, %v629_v55  ;;  %2397 = vmatmul.msk.f32.vlgmr.msra.gmra.mxu3 %vm289_vm11, %v629_v55 }
 0x4ce   :  { %1096 = vmatpush.msra.mxu2 %v2916_v19  ;;  %1116 = vmatpush.msra.mxu3 %v2911_v18 }
 0x4d0   :  { %1097 = vmatpush.msra.mxu2 %v2928_v21  ;;  %1117 = vmatpush.msra.mxu3 %v2923_v20 }
 0x4d2   :  { %1098 = vmatpush.msra.mxu2 %v2940_v23  ;;  %1118 = vmatpush.msra.mxu3 %v2935_v22  ;;  %v625_v22 = vld [vmem:[#allocation2 + $0x10] sm:$0xc0]  ;;  %v626_v23 = vld [vmem:[#allocation2] sm:$0xc0] }
 0x4d4   :  { %1099 = vmatpush.msra.mxu2 %v2957_v26  ;;  %1119 = vmatpush.msra.mxu3 %v2952_v25 }
 0x4d6   :  { %1100 = vmatpush.msra.mxu2 %v2976_v29  ;;  %1120 = vmatpush.msra.mxu3 %v2971_v28 }
 0x4d8   :  { %1101 = vmatpush.msra.mxu2 %v2990_v31  ;;  %1121 = vmatpush.msra.mxu3 %v2985_v30 }
 0x4da   :  { %1102 = vmatpush.msra.mxu2 %v3002_v33  ;;  %1122 = vmatpush.msra.mxu3 %v2997_v32 }
 0x4dc   :  { %1103 = vmatpush.msra.mxu2 %v3016_v35  ;;  %1123 = vmatpush.msra.mxu3 %v3011_v34 }
 0x550   :  { %v649_v18 = vpop.f32.mrf.mxu2  ;;  %v669_v19 = vpop.f32.mrf.mxu3 }
 0x551   :  { %v674_v20 = vrot.slane %v649_v18, 2  ;;  %v675_v21 = vrot.slane %v669_v19, 2 }
 0x553   :  { %v678_v25 = vadd.f32 %v674_v20, %v625_v22  ;;  %v679_v26 = vadd.f32 %v675_v21, %v626_v23 }
 0x555   :  { %v2398_v28 = vmul.f32 -1.442695, %v678_v25  ;;  %v2399_v29 = vmul.f32 -1.442695, %v679_v26 }
 0x557   :  { %2523 = vpow2.f32 %v2398_v28 }
 0x558   :  { %2525 = vpow2.f32 %v2399_v29 }
 0x55d   :  { %v2524_v30 = vpop.eup %2523 }
 0x55e   :  { %v2526_v31 = vpop.eup %2525  ;;  %v686_v33 = vadd.f32 1.0, %v2524_v30 }
 0x55f   :  { %v687_v32 = vadd.f32 1.0, %v2526_v31 }
 0x560   :  { %2527 = vrcp.f32 %v686_v33  ;;  %v699_v59 = vand.u32 2147483648, %v686_v33  ;;  %v697_v62 = vand.u32 2147483647, %v686_v33  ;;  %vm693_vm1 = vweird.f32 %v686_v33 }
 0x561   :  { %2529 = vrcp.f32 %v687_v32  ;;  %v714_v63 = vand.u32 2147483648, %v687_v32  ;;  %v712_v1 = vand.u32 2147483647, %v687_v32  ;;  %vm708_vm3 = vweird.f32 %v687_v32 }
 0x562   :  { %v700_v3 = vor.u32 1.1754944e-38, %v699_v59  ;;  %vm698_vm4 = vcmp.eq.f32.partialorder %v697_v62, 8.507059e+37 }
 0x563   :  { %v715_v7 = vor.u32 1.1754944e-38, %v714_v63  ;;  %vm713_vm6 = vcmp.eq.f32.partialorder %v712_v1, 8.507059e+37 }
 0x566   :  { %v2528_v35 = vpop.eup %2527 }
 0x567   :  { %v2530_v34 = vpop.eup %2529  ;;  %v689_v56 = vmul.f32 %v2528_v35, %v686_v33  ;;  %vm694_vm15 = vweird.f32 %v2528_v35 }
 0x568   :  { %v704_v57 = vmul.f32 %v2530_v34, %v687_v32  ;;  %vm709_vm0 = vweird.f32 %v2530_v34  ;;  %vm695_vm2 = vmor %vm693_vm1, %vm694_vm15 }
 0x569   :  { %v690_v58 = vsub.f32 1.0, %v689_v56  ;;  %vm710_vm5 = vmor %vm708_vm3, %vm709_vm0 }
 0x56a   :  { %v705_v60 = vsub.f32 1.0, %v704_v57 }
 0x56b   :  { %v691_v61 = vmul.f32 %v2528_v35, %v690_v58 }
 0x56c   :  { %v706_v0 = vmul.f32 %v2530_v34, %v705_v60 }
 0x56d   :  { %v692_v2 = vadd.f32 %v2528_v35, %v691_v61 }
 0x56e   :  { %v707_v4 = vadd.f32 %v2530_v34, %v706_v0 }
 0x56f   :  { %v696_v6 = vsel %vm695_vm2, %v2528_v35, %v692_v2 }
 0x570   :  { %v701_v8 = vsel %vm698_vm4, %v700_v3, %v696_v6  ;;  %v711_v9 = vsel %vm710_vm5, %v2530_v34, %v707_v4 }
 0x571   :  { %v716_v10 = vsel %vm713_vm6, %v715_v7, %v711_v9  ;;  %v727_v11 = vmul.f32 %v725_v5, %v701_v8 }
 0x572   :  { %v719_v12 = vmul.f32 2.0, %v716_v10 }
 0x574   :  { %v2401_v13 = vadd.f32 -1.0, %v719_v12 }
 0x576   :  { %v723_v14 = vsel %vm129_vm8, %v2401_v13, %v716_v10  ;;  %v852_v10 = vld [vmem:[#allocation2 + $0x18] sm:$0xc] }
 0x577   :  { %v728_v15 = vmul.f32 %v723_v14, %v701_v8 }
 0x579   :  { %730 = vrot.lane.b32.xlu0 %v728_v15, %s2813_s5 }
 0x5eb   :  { %v731_v16 = vpop.permute.xlu0 %730 }
 0x5ec   :  { %v733_v24 = vadd.f32 %v731_v16, %v727_v11  ;;  %v853_v11 = vld [vmem:[#allocation2 + $0x8] sm:$0xc] }
 0x5ee   :  { %2531 = vtanh.f32 %v733_v24  ;;  %v836_v32 = vrot.slane %v733_v24, 6 }
 0x5f4   :  { %v2532_v27 = vpop.eup %2531 }
 0x5f5   :  { %v3177_v37 = vmul.f32 %v2532_v27, %v723_v14 }
 0x5f7   :  { %v744_v38 = vrot.slane %v3177_v37, 6 }
 0x5f9   :  { %745 = vrot.lane.b32.xlu1 %v744_v38, %s2813_s5 }
 0x66b   :  { %v746_v39 = vpop.permute.xlu1 %745 }
 0x66c   :  { %2402 = vmatmul.msk.f32.vlgmr.msrb.gmra.mxu0 %vm289_vm11, %v746_v39  ;;  %2403 = vmatmul.msk.f32.vlgmr.msrb.gmra.mxu1 %vm289_vm11, %v746_v39 }
 0x6e9   :  { %v766_v41 = vpop.f32.mrf.mxu0  ;;  %v786_v43 = vpop.f32.mrf.mxu1 }
 0x6ea   :  { %v789_v44 = vadd.f32 %v766_v41, %v742_v40  ;;  %v790_v45 = vadd.f32 %v786_v43, %v743_v42 }
 0x6ec   :  { %v2404_v46 = vmul.f32 -1.442695, %v789_v44  ;;  %v2405_v47 = vmul.f32 -1.442695, %v790_v45 }
 0x6ee   :  { %2533 = vpow2.f32 %v2404_v46 }
 0x6ef   :  { %2535 = vpow2.f32 %v2405_v47 }
 0x6f4   :  { %v2534_v48 = vpop.eup %2533 }
 0x6f5   :  { %v2536_v49 = vpop.eup %2535  ;;  %v797_v50 = vadd.f32 1.0, %v2534_v48 }
 0x6f6   :  { %v798_v51 = vadd.f32 1.0, %v2536_v49 }
 0x6f7   :  { %2537 = vrcp.f32 %v797_v50  ;;  %v810_v22 = vand.u32 2147483648, %v797_v50  ;;  %v808_v25 = vand.u32 2147483647, %v797_v50  ;;  %vm804_vm12 = vweird.f32 %v797_v50 }
 0x6f8   :  { %2539 = vrcp.f32 %v798_v51  ;;  %v825_v26 = vand.u32 2147483648, %v798_v51  ;;  %v823_v29 = vand.u32 2147483647, %v798_v51  ;;  %vm819_vm14 = vweird.f32 %v798_v51 }
 0x6f9   :  { %v811_v31 = vor.u32 1.1754944e-38, %v810_v22  ;;  %vm809_vm15 = vcmp.eq.f32.partialorder %v808_v25, 8.507059e+37 }
 0x6fa   :  { %v826_v34 = vor.u32 1.1754944e-38, %v825_v26  ;;  %vm824_vm1 = vcmp.eq.f32.partialorder %v823_v29, 8.507059e+37 }
 0x6fd   :  { %v2538_v54 = vpop.eup %2537 }
 0x6fe   :  { %v2540_v55 = vpop.eup %2539  ;;  %v800_v18 = vmul.f32 %v2538_v54, %v797_v50  ;;  %vm805_vm7 = vweird.f32 %v2538_v54 }
 0x6ff   :  { %v815_v19 = vmul.f32 %v2540_v55, %v798_v51  ;;  %vm820_vm9 = vweird.f32 %v2540_v55  ;;  %vm806_vm13 = vmor %vm804_vm12, %vm805_vm7 }
 0x700   :  { %v801_v20 = vsub.f32 1.0, %v800_v18  ;;  %vm821_vm0 = vmor %vm819_vm14, %vm820_vm9 }
 0x701   :  { %v816_v21 = vsub.f32 1.0, %v815_v19 }
 0x702   :  { %v802_v23 = vmul.f32 %v2538_v54, %v801_v20 }
 0x703   :  { %v817_v28 = vmul.f32 %v2540_v55, %v816_v21 }
 0x704   :  { %v803_v30 = vadd.f32 %v2538_v54, %v802_v23 }
 0x705   :  { %v818_v33 = vadd.f32 %v2540_v55, %v817_v28 }
 0x706   :  { %v807_v35 = vsel %vm806_vm13, %v2538_v54, %v803_v30 }
 0x707   :  { %v812_v56 = vsel %vm809_vm15, %v811_v31, %v807_v35  ;;  %v822_v57 = vsel %vm821_vm0, %v2540_v55, %v818_v33 }
 0x708   :  { %v827_v58 = vsel %vm824_vm1, %v826_v34, %v822_v57  ;;  %v838_v59 = vmul.f32 %v836_v32, %v812_v56 }
 0x709   :  { %v830_v60 = vmul.f32 2.0, %v827_v58 }
 0x70b   :  { %v2407_v61 = vadd.f32 -1.0, %v830_v60 }
 0x70d   :  { %v834_v62 = vsel %vm129_vm8, %v2407_v61, %v827_v58  ;;  %v965_v61 = vld [vmem:[#allocation2 + $0x18] sm:$0x30] }
 0x70e   :  { %v839_v63 = vmul.f32 %v834_v62, %v812_v56 }
 0x710   :  { %841 = vrot.lane.b32.xlu2 %v839_v63, %s2813_s5 }
 0x76a   :  { %v842_v0 = vpop.permute.xlu2 %841 }
 0x76b   :  { %v844_v1 = vadd.f32 %v842_v0, %v838_v59 }
 0x76d   :  { %2541 = vtanh.f32 %v844_v1  ;;  %v949_v18 = vrot.slane %v844_v1, 6 }
 0x773   :  { %v2542_v2 = vpop.eup %2541 }
 0x774   :  { %v846_v3 = vmul.f32 %v2542_v2, %v834_v62  ;;  %v966_v62 = vld [vmem:[#allocation2 + $0x8] sm:$0x30] }
 0x776   :  { %848 = vrot.lane.b32.xlu0 %v846_v3, %s2813_s5 }
 0x7e8   :  { %v849_v4 = vpop.permute.xlu0 %848 }
 0x7e9   :  { %851 = vst.msk [vmem:[#allocation3 + $0x8] sm:$0x3] %vm392_vm10, %v849_v4  ;;  %2408 = vmatmul.msk.f32.vlgmr.msrb.gmra.mxu2 %vm289_vm11, %v849_v4  ;;  %2409 = vmatmul.msk.f32.vlgmr.msrb.gmra.mxu3 %vm289_vm11, %v849_v4 }
 0x7f0   :  { %v1203_v5 = vld [vmem:[#allocation3 + $0x8] sm:$0x3] }
 0x7f1   :  { %1204 = vst.msk [vmem:[#allocation4 + $0x6] sm:$0x3] %vm392_vm10, %v1203_v5 }
 0x86c   :  { %v873_v6 = vpop.f32.mrf.mxu2  ;;  %v893_v7 = vpop.f32.mrf.mxu3 }
 0x86d   :  { %v898_v8 = vrot.slane %v873_v6, 6  ;;  %v899_v9 = vrot.slane %v893_v7, 6 }
 0x86f   :  { %v902_v12 = vadd.f32 %v898_v8, %v852_v10  ;;  %v903_v13 = vadd.f32 %v899_v9, %v853_v11 }
 0x871   :  { %v2410_v14 = vmul.f32 -1.442695, %v902_v12  ;;  %v2411_v15 = vmul.f32 -1.442695, %v903_v13 }
 0x873   :  { %2543 = vpow2.f32 %v2410_v14 }
 0x874   :  { %2545 = vpow2.f32 %v2411_v15 }
 0x879   :  { %v2544_v16 = vpop.eup %2543 }
 0x87a   :  { %v2546_v24 = vpop.eup %2545  ;;  %v910_v27 = vadd.f32 1.0, %v2544_v16 }
 0x87b   :  { %v911_v38 = vadd.f32 1.0, %v2546_v24 }
 0x87c   :  { %2547 = vrcp.f32 %v910_v27  ;;  %v923_v44 = vand.u32 2147483648, %v910_v27  ;;  %v921_v47 = vand.u32 2147483647, %v910_v27  ;;  %vm917_vm4 = vweird.f32 %v910_v27 }
 0x87d   :  { %2549 = vrcp.f32 %v911_v38  ;;  %v938_v48 = vand.u32 2147483648, %v911_v38  ;;  %v936_v50 = vand.u32 2147483647, %v911_v38  ;;  %vm932_vm6 = vweird.f32 %v911_v38 }
 0x87e   :  { %v924_v54 = vor.u32 1.1754944e-38, %v923_v44  ;;  %vm922_vm7 = vcmp.eq.f32.partialorder %v921_v47, 8.507059e+37 }
 0x87f   :  { %v939_v20 = vor.u32 1.1754944e-38, %v938_v48  ;;  %vm937_vm12 = vcmp.eq.f32.partialorder %v936_v50, 8.507059e+37 }
 0x882   :  { %v2548_v39 = vpop.eup %2547 }
 0x883   :  { %v2550_v40 = vpop.eup %2549  ;;  %v913_v41 = vmul.f32 %v2548_v39, %v910_v27  ;;  %vm918_vm2 = vweird.f32 %v2548_v39 }
 0x884   :  { %v928_v42 = vmul.f32 %v2550_v40, %v911_v38  ;;  %vm933_vm3 = vweird.f32 %v2550_v40  ;;  %vm919_vm5 = vmor %vm917_vm4, %vm918_vm2 }
 0x885   :  { %v914_v43 = vsub.f32 1.0, %v913_v41  ;;  %vm934_vm9 = vmor %vm932_vm6, %vm933_vm3  ;;  %vm623_vm6 = vcmask 521220  }
 0x886   :  { %v929_v45 = vsub.f32 1.0, %v928_v42 }
 0x887   :  { %v915_v46 = vmul.f32 %v2548_v39, %v914_v43 }
 0x888   :  { %v930_v49 = vmul.f32 %v2550_v40, %v929_v45 }
 0x889   :  { %v916_v51 = vadd.f32 %v2548_v39, %v915_v46 }
 0x88a   :  { %v931_v55 = vadd.f32 %v2550_v40, %v930_v49 }
 0x88b   :  { %v920_v19 = vsel %vm919_vm5, %v2548_v39, %v916_v51  ;;  %vm506_vm5 = vcmask 519170  }
 0x88c   :  { %v925_v21 = vsel %vm922_vm7, %v924_v54, %v920_v19  ;;  %v935_v22 = vsel %vm934_vm9, %v2550_v40, %v931_v55 }
 0x88d   :  { %v940_v23 = vsel %vm937_vm12, %v939_v20, %v935_v22  ;;  %v951_v25 = vmul.f32 %v949_v18, %v925_v21 }
 0x88e   :  { %v943_v26 = vmul.f32 2.0, %v940_v23 }
 0x890   :  { %v2413_v28 = vadd.f32 -1.0, %v943_v26 }
 0x892   :  { %v947_v29 = vsel %vm129_vm8, %v2413_v28, %v940_v23 }
 0x893   :  { %v952_v30 = vmul.f32 %v947_v29, %v925_v21 }
 0x895   :  { %954 = vrot.lane.b32.xlu1 %v952_v30, %s2813_s5 }
 0x907   :  { %v955_v31 = vpop.permute.xlu1 %954 }
 0x908   :  { %v957_v33 = vadd.f32 %v955_v31, %v951_v25 }
 0x90a   :  { %2551 = vtanh.f32 %v957_v33  ;;  %v1065_v41 = vrot.slane %v957_v33, 6 }
 0x910   :  { %v2552_v32 = vpop.eup %2551 }
 0x911   :  { %v959_v35 = vmul.f32 %v2552_v32, %v947_v29 }
 0x913   :  { %v967_v34 = vrot.slane %v959_v35, 2 }
 0x915   :  { %968 = vrot.lane.b32.xlu2 %v967_v34, %s2813_s5  ;;  %v1082_v34 = vld [vmem:[#allocation2 + $0x8] sm:$0xc0] }
 0x96f   :  { %v969_v56 = vpop.permute.xlu2 %968 }
 0x970   :  { %2414 = vmatmul.msk.f32.vlgmr.msra.gmra.mxu0 %vm289_vm11, %v969_v56  ;;  %2415 = vmatmul.msk.f32.vlgmr.msra.gmra.mxu1 %vm289_vm11, %v969_v56 }
 0x9ed   :  { %v989_v57 = vpop.f32.mrf.mxu0  ;;  %v1009_v58 = vpop.f32.mrf.mxu1 }
 0x9ee   :  { %v1014_v59 = vrot.slane %v989_v57, 4  ;;  %v1015_v60 = vrot.slane %v1009_v58, 4 }
 0x9f0   :  { %v1018_v63 = vadd.f32 %v1014_v59, %v965_v61  ;;  %v1019_v0 = vadd.f32 %v1015_v60, %v966_v62 }
 0x9f2   :  { %v2416_v1 = vmul.f32 -1.442695, %v1018_v63  ;;  %v2417_v2 = vmul.f32 -1.442695, %v1019_v0 }
 0x9f4   :  { %2553 = vpow2.f32 %v2416_v1 }
 0x9f5   :  { %2555 = vpow2.f32 %v2417_v2 }
 0x9fa   :  { %v2554_v3 = vpop.eup %2553 }
 0x9fb   :  { %v2556_v4 = vpop.eup %2555  ;;  %v1026_v5 = vadd.f32 1.0, %v2554_v3 }
 0x9fc   :  { %v1027_v6 = vadd.f32 1.0, %v2556_v4 }
 0x9fd   :  { %2557 = vrcp.f32 %v1026_v5  ;;  %v1039_v12 = vand.u32 2147483648, %v1026_v5  ;;  %v1037_v15 = vand.u32 2147483647, %v1026_v5  ;;  %vm1033_vm15 = vweird.f32 %v1026_v5 }
 0x9fe   :  { %2559 = vrcp.f32 %v1027_v6  ;;  %v1054_v16 = vand.u32 2147483648, %v1027_v6  ;;  %v1052_v27 = vand.u32 2147483647, %v1027_v6  ;;  %vm1048_vm1 = vweird.f32 %v1027_v6 }
 0x9ff   :  { %v1040_v39 = vor.u32 1.1754944e-38, %v1039_v12  ;;  %vm1038_vm2 = vcmp.eq.f32.partialorder %v1037_v15, 8.507059e+37 }
 0xa00   :  { %v1055_v43 = vor.u32 1.1754944e-38, %v1054_v16  ;;  %vm1053_vm4 = vcmp.eq.f32.partialorder %v1052_v27, 8.507059e+37 }
 0xa03   :  { %v2558_v7 = vpop.eup %2557 }
 0xa04   :  { %v2560_v8 = vpop.eup %2559  ;;  %v1029_v9 = vmul.f32 %v2558_v7, %v1026_v5  ;;  %vm1034_vm13 = vweird.f32 %v2558_v7 }
 0xa05   :  { %v1044_v10 = vmul.f32 %v2560_v8, %v1027_v6  ;;  %vm1049_vm14 = vweird.f32 %v2560_v8  ;;  %vm1035_vm0 = vmor %vm1033_vm15, %vm1034_vm13 }
 0xa06   :  { %v1030_v11 = vsub.f32 1.0, %v1029_v9  ;;  %vm1050_vm3 = vmor %vm1048_vm1, %vm1049_vm14 }
 0xa07   :  { %v1045_v13 = vsub.f32 1.0, %v1044_v10 }
 0xa08   :  { %v1031_v14 = vmul.f32 %v2558_v7, %v1030_v11 }
 0xa09   :  { %v1046_v24 = vmul.f32 %v2560_v8, %v1045_v13 }
 0xa0a   :  { %v1032_v38 = vadd.f32 %v2558_v7, %v1031_v14 }
 0xa0b   :  { %v1047_v40 = vadd.f32 %v2560_v8, %v1046_v24 }
 0xa0c   :  { %v1036_v42 = vsel %vm1035_vm0, %v2558_v7, %v1032_v38 }
 0xa0d   :  { %v1041_v44 = vsel %vm1038_vm2, %v1040_v39, %v1036_v42  ;;  %v1051_v45 = vsel %vm1050_vm3, %v2560_v8, %v1047_v40  ;;  %vm740_vm2 = vcmask 523270  }
 0xa0e   :  { %v1056_v46 = vsel %vm1053_vm4, %v1055_v43, %v1051_v45  ;;  %v1067_v47 = vmul.f32 %v1065_v41, %v1041_v44 }
 0xa0f   :  { %v1059_v48 = vmul.f32 2.0, %v1056_v46 }
 0xa11   :  { %v2419_v49 = vadd.f32 -1.0, %v1059_v48 }
 0xa13   :  { %v1063_v50 = vsel %vm129_vm8, %v2419_v49, %v1056_v46  ;;  %v1247_v49 = vld [vmem:[#allocation11 + $0x70] sm:$0xff] }
 0xa14   :  { %v1068_v51 = vmul.f32 %v1063_v50, %v1041_v44  ;;  %1263 = vmatpush.msrb.mxu0 %v1247_v49 }
 0xa16   :  { %1070 = vrot.lane.b32.xlu0 %v1068_v51, %s2813_s5  ;;  %v1229_v51 = vld [vmem:[#allocation10 + $0x70] sm:$0xff] }
 0xa17   :  { %1315 = vmatpush.msrb.mxu2 %v1229_v51 }
 0xa1e   :  { %961 = vrot.lane.b32.xlu0 %v959_v35, %s2813_s5  ;;  %v1081_v35 = vld [vmem:[#allocation2 + $0x18] sm:$0xc0] }
 0xa26   :  { %503 = vrot.lane.b32.xlu0 %v3122_v52, %s2813_s5 }
 0xa88   :  { %v1071_v54 = vpop.permute.xlu0 %1070 }
 0xa89   :  { %v3203_v55 = vadd.f32 %v1071_v54, %v1067_v47  ;;  %v1230_v54 = vld [vmem:[#allocation10 + $0x78] sm:$0xff] }
 0xa8a   :  { %1338 = vmatpush.msrb.mxu3 %v1230_v54 }
 0xa8b   :  { %2561 = vtanh.f32 %v3203_v55  ;;  %v1181_v15 = vrot.slane %v3203_v55, 6  ;;  %v1245_v55 = vld [vmem:[#allocation11 + $0x60] sm:$0xff] }
 0xa8c   :  { %1264 = vmatpush.msrb.mxu0 %v1245_v55 }
 0xa90   :  { %v962_v18 = vpop.permute.xlu0 %961 }
 0xa91   :  { %v2562_v19 = vpop.eup %2561  ;;  %964 = vst.msk [vmem:[#allocation3 + $0x8] sm:$0xc] %vm506_vm5, %v962_v18  ;;  %v1246_v18 = vld [vmem:[#allocation11 + $0x68] sm:$0xff] }
 0xa92   :  { %v1075_v20 = vmul.f32 %v2562_v19, %v1063_v50  ;;  %v1248_v50 = vld [vmem:[#allocation11 + $0x78] sm:$0xff]  ;;  %v1227_v19 = vld [vmem:[#allocation10 + $0x60] sm:$0xff] }
 0xa93   :  { %1286 = vmatpush.msrb.mxu1 %v1248_v50  ;;  %1316 = vmatpush.msrb.mxu2 %v1227_v19 }
 0xa94   :  { %v1083_v21 = vrot.slane %v1075_v20, 4 }
 0xa95   :  { %1287 = vmatpush.msrb.mxu1 %v1246_v18 }
 0xa96   :  { %1084 = vrot.lane.b32.xlu1 %v1083_v21, %s2813_s5  ;;  %v1243_v21 = vld [vmem:[#allocation11 + $0x50] sm:$0xff] }
 0xa97   :  { %1265 = vmatpush.msrb.mxu0 %v1243_v21 }
 0xa98   :  { %v1201_v22 = vld [vmem:[#allocation3 + $0xa] sm:$0x3]  ;;  %v504_v23 = vpop.permute.xlu0 %503 }
 0xa99   :  { %1202 = vst.msk [vmem:[#allocation4 + $0x4] sm:$0x3] %vm392_vm10, %v1201_v22  ;;  %v1244_v22 = vld [vmem:[#allocation11 + $0x58] sm:$0xff] }
 0xa9a   :  { %507 = vst.msk [vmem:[#allocation3] sm:$0xc] %vm506_vm5, %v504_v23  ;;  %v1225_v23 = vld [vmem:[#allocation10 + $0x50] sm:$0xff]  ;;  %1288 = vmatpush.msrb.mxu1 %v1244_v22 }
 0xa9b   :  { %1317 = vmatpush.msrb.mxu2 %v1225_v23 }
 0xa9e   :  { %1077 = vrot.lane.b32.xlu1 %v1075_v20, %s2813_s5  ;;  %v1228_v20 = vld [vmem:[#allocation10 + $0x68] sm:$0xff] }
 0xa9f   :  { %1339 = vmatpush.msrb.mxu3 %v1228_v20 }
 0xaa1   :  { %v1209_v52 = vld [vmem:[#allocation3 + $0x2] sm:$0x3] }
 0xaa2   :  { %1210 = vst.msk [vmem:[#allocation4 + $0xc] sm:$0x3] %vm392_vm10, %v1209_v52  ;;  %v1241_v52 = vld [vmem:[#allocation11 + $0x40] sm:$0xff] }
 0xaa3   :  { %1266 = vmatpush.msrb.mxu0 %v1241_v52 }
 0xaa6   :  { %620 = vrot.lane.b32.xlu1 %v3151_v53, %s2813_s5 }
 0xb08   :  { %v1085_v25 = vpop.permute.xlu1 %1084 }
 0xb09   :  { %2420 = vmatmul.msk.f32.vlgmr.msra.gmra.mxu2 %vm289_vm11, %v1085_v25  ;;  %2421 = vmatmul.msk.f32.vlgmr.msra.gmra.mxu3 %vm289_vm11, %v1085_v25  ;;  %v1242_v25 = vld [vmem:[#allocation11 + $0x48] sm:$0xff] }
 0xb0a   :  { %1289 = vmatpush.msrb.mxu1 %v1242_v25 }
 0xb10   :  { %v1078_v26 = vpop.permute.xlu1 %1077 }
 0xb11   :  { %1080 = vst.msk [vmem:[#allocation3 + $0x8] sm:$0x30] %vm623_vm6, %v1078_v26  ;;  %v1223_v26 = vld [vmem:[#allocation10 + $0x40] sm:$0xff] }
 0xb12   :  { %1318 = vmatpush.msrb.mxu2 %v1223_v26 }
 0xb18   :  { %v1199_v28 = vld [vmem:[#allocation3 + $0xc] sm:$0x3]  ;;  %v621_v29 = vpop.permute.xlu1 %620 }
 0xb19   :  { %1200 = vst.msk [vmem:[#allocation4 + $0x2] sm:$0x3] %vm392_vm10, %v1199_v28  ;;  %v1224_v28 = vld [vmem:[#allocation10 + $0x48] sm:$0xff] }
 0xb1a   :  { %624 = vst.msk [vmem:[#allocation3] sm:$0x30] %vm623_vm6, %v621_v29  ;;  %v1239_v29 = vld [vmem:[#allocation11 + $0x30] sm:$0xff] }
 0xb1b   :  { %1267 = vmatpush.msrb.mxu0 %v1239_v29 }
 0xb21   :  { %v1207_v30 = vld [vmem:[#allocation3 + $0x4] sm:$0x3] }
 0xb22   :  { %1208 = vst.msk [vmem:[#allocation4 + $0xa] sm:$0x3] %vm392_vm10, %v1207_v30  ;;  %v1240_v30 = vld [vmem:[#allocation11 + $0x38] sm:$0xff] }
 0xb23   :  { %1290 = vmatpush.msrb.mxu1 %v1240_v30 }
 0xb8c   :  { %v1105_v31 = vpop.f32.mrf.mxu2  ;;  %v1125_v53 = vpop.f32.mrf.mxu3 }
 0xb8d   :  { %v1130_v33 = vrot.slane %v1105_v31, 2  ;;  %v1131_v32 = vrot.slane %v1125_v53, 2  ;;  %v1221_v31 = vld [vmem:[#allocation10 + $0x30] sm:$0xff]  ;;  %v1222_v53 = vld [vmem:[#allocation10 + $0x38] sm:$0xff] }
 0xb8e   :  { %1319 = vmatpush.msrb.mxu2 %v1221_v31 }
 0xb8f   :  { %v1134_v56 = vadd.f32 %v1130_v33, %v1081_v35  ;;  %v1135_v57 = vadd.f32 %v1131_v32, %v1082_v34  ;;  %v1237_v33 = vld [vmem:[#allocation11 + $0x20] sm:$0xff]  ;;  %v1238_v32 = vld [vmem:[#allocation11 + $0x28] sm:$0xff] }
 0xb90   :  { %v1219_v35 = vld [vmem:[#allocation10 + $0x20] sm:$0xff]  ;;  %1268 = vmatpush.msrb.mxu0 %v1237_v33  ;;  %1291 = vmatpush.msrb.mxu1 %v1238_v32  ;;  %v1220_v34 = vld [vmem:[#allocation10 + $0x28] sm:$0xff] }
 0xb91   :  { %v2422_v58 = vmul.f32 -1.442695, %v1134_v56  ;;  %v2423_v59 = vmul.f32 -1.442695, %v1135_v57  ;;  %1320 = vmatpush.msrb.mxu2 %v1219_v35  ;;  %v1235_v56 = vld [vmem:[#allocation11 + $0x10] sm:$0xff]  ;;  %v1236_v57 = vld [vmem:[#allocation11 + $0x18] sm:$0xff] }
 0xb92   :  { %1269 = vmatpush.msrb.mxu0 %v1235_v56  ;;  %1292 = vmatpush.msrb.mxu1 %v1236_v57 }
 0xb93   :  { %2563 = vpow2.f32 %v2422_v58  ;;  %v1217_v58 = vld [vmem:[#allocation10 + $0x10] sm:$0xff] }
 0xb94   :  { %2565 = vpow2.f32 %v2423_v59  ;;  %v1218_v59 = vld [vmem:[#allocation10 + $0x18] sm:$0xff]  ;;  %1321 = vmatpush.msrb.mxu2 %v1217_v58 }
 0xb99   :  { %v2564_v60 = vpop.eup %2563 }
 0xb9a   :  { %v2566_v61 = vpop.eup %2565  ;;  %v1142_v62 = vadd.f32 1.0, %v2564_v60  ;;  %v1233_v60 = vld [vmem:[#allocation11] sm:$0xff] }
 0xb9b   :  { %v1143_v63 = vadd.f32 1.0, %v2566_v61  ;;  %v1234_v61 = vld [vmem:[#allocation11 + $0x8] sm:$0xff]  ;;  %1270 = vmatpush.msrb.mxu0 %v1233_v60 }
 0xb9c   :  { %2567 = vrcp.f32 %v1142_v62  ;;  %v1155_v5 = vand.u32 2147483648, %v1142_v62  ;;  %v1153_v8 = vand.u32 2147483647, %v1142_v62  ;;  %vm1149_vm12 = vweird.f32 %v1142_v62  ;;  %1293 = vmatpush.msrb.mxu1 %v1234_v61 }
 0xb9d   :  { %2569 = vrcp.f32 %v1143_v63  ;;  %v1170_v9 = vand.u32 2147483648, %v1143_v63  ;;  %v1168_v11 = vand.u32 2147483647, %v1143_v63  ;;  %vm1164_vm14 = vweird.f32 %v1143_v63 }
 0xb9e   :  { %v1156_v13 = vor.u32 1.1754944e-38, %v1155_v5  ;;  %vm1154_vm15 = vcmp.eq.f32.partialorder %v1153_v8, 8.507059e+37  ;;  %v3239_v5 = vld [vmem:[#allocation13 + $0x50] sm:$0xff]  ;;  %v3255_v8 = vld [vmem:[#allocation13 + $0x38] sm:$0xff] }
 0xb9f   :  { %v1171_v24 = vor.u32 1.1754944e-38, %v1170_v9  ;;  %vm1169_vm1 = vcmp.eq.f32.partialorder %v1168_v11, 8.507059e+37  ;;  %v3259_v9 = vld [vmem:[#allocation13 + $0x30] sm:$0xff]  ;;  %v3263_v11 = vld [vmem:[#allocation13 + $0x20] sm:$0xff] }
 0xba2   :  { %v2568_v0 = vpop.eup %2567 }
 0xba3   :  { %v2570_v1 = vpop.eup %2569  ;;  %v1145_v2 = vmul.f32 %v2568_v0, %v1142_v62  ;;  %vm1150_vm7 = vweird.f32 %v2568_v0  ;;  %v1215_v62 = vld [vmem:[#allocation10] sm:$0xff] }
 0xba4   :  { %v1160_v3 = vmul.f32 %v2570_v1, %v1143_v63  ;;  %vm1165_vm9 = vweird.f32 %v2570_v1  ;;  %vm1151_vm13 = vmor %vm1149_vm12, %vm1150_vm7  ;;  %v1216_v63 = vld [vmem:[#allocation10 + $0x8] sm:$0xff]  ;;  %1322 = vmatpush.msrb.mxu2 %v1215_v62 }
 0xba5   :  { %v1146_v4 = vsub.f32 1.0, %v1145_v2  ;;  %vm1166_vm0 = vmor %vm1164_vm14, %vm1165_vm9  ;;  %v3231_v2 = vld [vmem:[#allocation13 + $0x68] sm:$0xff] }
 0xba6   :  { %v1161_v6 = vsub.f32 1.0, %v1160_v3  ;;  %v3235_v3 = vld [vmem:[#allocation13 + $0x60] sm:$0xff] }
 0xba7   :  { %v1147_v7 = vmul.f32 %v2568_v0, %v1146_v4  ;;  %v3237_v4 = vld [vmem:[#allocation13 + $0x58] sm:$0xff] }
 0xba8   :  { %v1162_v10 = vmul.f32 %v2570_v1, %v1161_v6  ;;  %v3251_v6 = vld [vmem:[#allocation13 + $0x48] sm:$0xff] }
 0xba9   :  { %v1148_v12 = vadd.f32 %v2568_v0, %v1147_v7  ;;  %v3253_v7 = vld [vmem:[#allocation13 + $0x40] sm:$0xff] }
 0xbaa   :  { %v1163_v14 = vadd.f32 %v2570_v1, %v1162_v10  ;;  %v3261_v10 = vld [vmem:[#allocation13 + $0x28] sm:$0xff] }
 0xbab   :  { %v1152_v16 = vsel %vm1151_vm13, %v2568_v0, %v1148_v12  ;;  %v3227_v0 = vld [vmem:[#allocation13 + $0x78] sm:$0xff] }
 0xbac   :  { %v1157_v27 = vsel %vm1154_vm15, %v1156_v13, %v1152_v16  ;;  %v1167_v38 = vsel %vm1166_vm0, %v2570_v1, %v1163_v14  ;;  %v3229_v1 = vld [vmem:[#allocation13 + $0x70] sm:$0xff]  ;;  %1413 = vmatpush.msra.mxu1 %v3227_v0  ;;  %v3269_v12 = vld [vmem:[#allocation13 + $0x18] sm:$0xff]  ;;  %v3280_v16 = vld [vmem:[#allocation13] sm:$0xff] }
 0xbad   :  { %v1172_v39 = vsel %vm1169_vm1, %v1171_v24, %v1167_v38  ;;  %v1183_v40 = vmul.f32 %v1181_v15, %v1157_v27  ;;  %1393 = vmatpush.msra.mxu0 %v3229_v1  ;;  %1497 = vmatpush.msra.mxu2 %v3229_v1  ;;  %v3271_v13 = vld [vmem:[#allocation13 + $0x10] sm:$0xff]  ;;  %v3278_v15 = vld [vmem:[#allocation13 + $0x8] sm:$0xff] }
 0xbae   :  { %v1175_v41 = vmul.f32 2.0, %v1172_v39  ;;  %1414 = vmatpush.msra.mxu1 %v3231_v2 }
 0xbaf   :  { %1394 = vmatpush.msra.mxu0 %v3235_v3  ;;  %1498 = vmatpush.msra.mxu2 %v3235_v3 }
 0xbb0   :  { %v2425_v42 = vadd.f32 -1.0, %v1175_v41  ;;  %1415 = vmatpush.msra.mxu1 %v3237_v4 }
 0xbb1   :  { %1395 = vmatpush.msra.mxu0 %v3239_v5  ;;  %1499 = vmatpush.msra.mxu2 %v3239_v5 }
 0xbb2   :  { %v1179_v43 = vsel %vm129_vm8, %v2425_v42, %v1172_v39  ;;  %1416 = vmatpush.msra.mxu1 %v3251_v6 }
 0xbb3   :  { %v1184_v44 = vmul.f32 %v1179_v43, %v1157_v27  ;;  %1396 = vmatpush.msra.mxu0 %v3253_v7  ;;  %1500 = vmatpush.msra.mxu2 %v3253_v7 }
 0xbb4   :  { %1417 = vmatpush.msra.mxu1 %v3255_v8 }
 0xbb5   :  { %1186 = vrot.lane.b32.xlu2 %v1184_v44, %s2813_s5  ;;  %1397 = vmatpush.msra.mxu0 %v3259_v9  ;;  %v1353_v44 = vld [vmem:[%s3575_s9] sm:$0x3] }
 0xbb6   :  { %1501 = vmatpush.msra.mxu2 %v3259_v9  ;;  %1418 = vmatpush.msra.mxu1 %v3261_v10 }
 0xbb7   :  { %1398 = vmatpush.msra.mxu0 %v3263_v11 }
 0xbb8   :  { %1502 = vmatpush.msra.mxu2 %v3263_v11  ;;  %1419 = vmatpush.msra.mxu1 %v3269_v12 }
 0xbb9   :  { %1399 = vmatpush.msra.mxu0 %v3271_v13 }
 0xbba   :  { %1503 = vmatpush.msra.mxu2 %v3271_v13  ;;  %1420 = vmatpush.msra.mxu1 %v3278_v15 }
 0xbbb   :  { %1400 = vmatpush.msra.mxu0 %v3280_v16 }
 0xbbc   :  { %1504 = vmatpush.msra.mxu2 %v3280_v16 }
 0xc0f   :  { %v1187_v45 = vpop.permute.xlu2 %1186 }
 0xc10   :  { %v1189_v46 = vadd.f32 %v1187_v45, %v1183_v40  ;;  %v1355_v45 = vperm.slane %v1353_v44, 0 }
 0xc12   :  { %2571 = vtanh.f32 %v1189_v46  ;;  %v1356_v46 = vperm.slane %v1353_v44, 1 }
 0xc18   :  { %v2572_v47 = vpop.eup %2571 }
 0xc19   :  { %v1191_v48 = vmul.f32 %v2572_v47, %v1179_v43 }
 0xc1b   :  { %1193 = vrot.lane.b32.xlu2 %v1191_v48, %s2813_s5 }
 0xc23   :  { %737 = vrot.lane.b32.xlu2 %v3177_v37, %s2813_s5  ;;  %v1226_v37 = vld [vmem:[#allocation10 + $0x58] sm:$0xff] }
 0xc24   :  { %1340 = vmatpush.msrb.mxu3 %v1226_v37 }
 0xc26   :  { %1341 = vmatpush.msrb.mxu3 %v1224_v28 }
 0xc28   :  { %1342 = vmatpush.msrb.mxu3 %v1222_v53 }
 0xc2a   :  { %1343 = vmatpush.msrb.mxu3 %v1220_v34 }
 0xc2c   :  { %1344 = vmatpush.msrb.mxu3 %v1218_v59 }
 0xc2e   :  { %1345 = vmatpush.msrb.mxu3 %v1216_v63 }
 0xc30   :  { %1517 = vmatpush.msra.mxu3 %v3227_v0 }
 0xc32   :  { %1518 = vmatpush.msra.mxu3 %v3231_v2 }
 0xc34   :  { %1519 = vmatpush.msra.mxu3 %v3237_v4 }
 0xc36   :  { %1520 = vmatpush.msra.mxu3 %v3251_v6 }
 0xc38   :  { %1521 = vmatpush.msra.mxu3 %v3255_v8 }
 0xc3a   :  { %1522 = vmatpush.msra.mxu3 %v3261_v10 }
 0xc3c   :  { %1523 = vmatpush.msra.mxu3 %v3269_v12 }
 0xc3e   :  { %1524 = vmatpush.msra.mxu3 %v3278_v15 }
 0xc75   :  { %v1194_v14 = vpop.permute.xlu2 %1193 }
 0xc76   :  { %1196 = vst.msk [vmem:[#allocation3 + $0x8] sm:$0xc0] %vm740_vm2, %v1194_v14 }
 0xc7d   :  { %v1197_v24 = vld [vmem:[#allocation3 + $0xe] sm:$0x3]  ;;  %v738_v27 = vpop.permute.xlu2 %737 }
 0xc7e   :  { %1198 = vst.msk [vmem:[#allocation4] sm:$0x3] %vm392_vm10, %v1197_v24  ;;  %v1214_v42 = vld [vmem:[#allocation3 + $0x8] sm:$0xff] }
 0xc7f   :  { %741 = vst.msk [vmem:[#allocation3] sm:$0xc0] %vm740_vm2, %v738_v27 }
 0xc85   :  { %v1231_v38 = vld [vmem:[#allocation4] sm:$0xff] }
 0xc86   :  { %v1205_v39 = vld [vmem:[#allocation3 + $0x6] sm:$0x3]  ;;  %2426 = vmatmul.msk.f32.vlgmr.msrb.gmra.mxu0 %vm289_vm11, %v1231_v38  ;;  %2428 = vmatmul.msk.f32.vlgmr.msrb.gmra.mxu1 %vm289_vm11, %v1231_v38 }
 0xc87   :  { %v1213_v40 = vld [vmem:[#allocation3] sm:$0xff]  ;;  %1206 = vst.msk [vmem:[#allocation4 + $0x8] sm:$0x3] %vm392_vm10, %v1205_v39  ;;  %1613 = vmatpush.msrb.mxu0 %v3229_v1  ;;  %1633 = vmatpush.msrb.mxu1 %v3227_v0 }
 0xc88   :  { %2430 = vmatmul.msk.f32.vlgmr.msrb.gmra.mxu2 %vm289_vm11, %v1213_v40  ;;  %2432 = vmatmul.msk.f32.vlgmr.msrb.gmra.mxu3 %vm289_vm11, %v1213_v40 }
 0xc89   :  { %1729 = vmatpush.msrb.mxu2 %v3229_v1  ;;  %1749 = vmatpush.msrb.mxu3 %v3227_v0 }
 0xc8a   :  { %1614 = vmatpush.msrb.mxu0 %v3235_v3  ;;  %1634 = vmatpush.msrb.mxu1 %v3231_v2 }
 0xc8b   :  { %1730 = vmatpush.msrb.mxu2 %v3235_v3  ;;  %1750 = vmatpush.msrb.mxu3 %v3231_v2 }
 0xc8c   :  { %1615 = vmatpush.msrb.mxu0 %v3239_v5  ;;  %1635 = vmatpush.msrb.mxu1 %v3237_v4 }
 0xc8d   :  { %1731 = vmatpush.msrb.mxu2 %v3239_v5  ;;  %1751 = vmatpush.msrb.mxu3 %v3237_v4 }
 0xc8e   :  { %v1232_v41 = vld [vmem:[#allocation4 + $0x8] sm:$0xff]  ;;  %1616 = vmatpush.msrb.mxu0 %v3253_v7  ;;  %1636 = vmatpush.msrb.mxu1 %v3251_v6 }
 0xc8f   :  { %2427 = vmatmul.msk.f32.gmra.mxu0 %vm289_vm11, %v1232_v41  ;;  %2429 = vmatmul.msk.f32.gmra.mxu1 %vm289_vm11, %v1232_v41 }
 0xc90   :  { %2431 = vmatmul.msk.f32.gmra.mxu2 %vm289_vm11, %v1214_v42  ;;  %2433 = vmatmul.msk.f32.gmra.mxu3 %vm289_vm11, %v1214_v42 }
 0xc91   :  { %1617 = vmatpush.msrb.mxu0 %v3259_v9  ;;  %1637 = vmatpush.msrb.mxu1 %v3255_v8 }
 0xc92   :  { %1732 = vmatpush.msrb.mxu2 %v3253_v7  ;;  %1752 = vmatpush.msrb.mxu3 %v3251_v6 }
 0xc93   :  { %1618 = vmatpush.msrb.mxu0 %v3263_v11  ;;  %1638 = vmatpush.msrb.mxu1 %v3261_v10 }
 0xc94   :  { %1733 = vmatpush.msrb.mxu2 %v3259_v9  ;;  %1753 = vmatpush.msrb.mxu3 %v3255_v8 }
 0xc95   :  { %1619 = vmatpush.msrb.mxu0 %v3271_v13  ;;  %1639 = vmatpush.msrb.mxu1 %v3269_v12 }
 0xc96   :  { %1734 = vmatpush.msrb.mxu2 %v3263_v11  ;;  %1754 = vmatpush.msrb.mxu3 %v3261_v10 }
 0xc97   :  { %1401 = vmatmul.f32.vlgmr.msra.gmra.mxu0 %v2812_v36  ;;  %1421 = vmatmul.f32.vlgmr.msra.gmra.mxu1 %v2812_v36 }
 0xc98   :  { %1620 = vmatpush.msrb.mxu0 %v3280_v16  ;;  %1640 = vmatpush.msrb.mxu1 %v3278_v15 }
 0xc99   :  { %1735 = vmatpush.msrb.mxu2 %v3271_v13  ;;  %1755 = vmatpush.msrb.mxu3 %v3269_v12 }
 0xc9a   :  { %1845 = vmatpush.msra.mxu0 %v3229_v1  ;;  %1865 = vmatpush.msra.mxu1 %v3227_v0 }
 0xc9b   :  { %1736 = vmatpush.msrb.mxu2 %v3280_v16  ;;  %1756 = vmatpush.msrb.mxu3 %v3278_v15 }
 0xc9c   :  { %1846 = vmatpush.msra.mxu0 %v3235_v3  ;;  %1866 = vmatpush.msra.mxu1 %v3231_v2 }
 0xc9e   :  { %1847 = vmatpush.msra.mxu0 %v3239_v5  ;;  %1867 = vmatpush.msra.mxu1 %v3237_v4 }
 0xca0   :  { %1848 = vmatpush.msra.mxu0 %v3253_v7  ;;  %1868 = vmatpush.msra.mxu1 %v3251_v6 }
 0xca2   :  { %1849 = vmatpush.msra.mxu0 %v3259_v9  ;;  %1869 = vmatpush.msra.mxu1 %v3255_v8 }
 0xca4   :  { %1850 = vmatpush.msra.mxu0 %v3263_v11  ;;  %1870 = vmatpush.msra.mxu1 %v3261_v10 }
 0xca6   :  { %1851 = vmatpush.msra.mxu0 %v3271_v13  ;;  %1871 = vmatpush.msra.mxu1 %v3269_v12 }
 0xca8   :  { %1852 = vmatpush.msra.mxu0 %v3280_v16  ;;  %1872 = vmatpush.msra.mxu1 %v3278_v15 }
 0xd03   :  { %v1272_v36 = vpop.f32.mrf.mxu0  ;;  %v1295_v43 = vpop.f32.mrf.mxu1 }
 0xd0b   :  { %v1324_v47 = vpop.f32.mrf.mxu2  ;;  %v1347_v48 = vpop.f32.mrf.mxu3 }
 0xd0c   :  { %v1325_v49 = vadd.f32 %v1324_v47, %v1272_v36  ;;  %v1348_v50 = vadd.f32 %v1347_v48, %v1295_v43  ;;  %v1275_v51 = vpop.f32.mrf.mxu0  ;;  %v1298_v18 = vpop.f32.mrf.mxu1 }
 0xd0e   :  { %v1359_v54 = vadd.f32 %v1355_v45, %v1325_v49  ;;  %v1360_v55 = vadd.f32 %v1356_v46, %v1348_v50 }
 0xd10   :  { %1363 = vst [vmem:[#allocation2 + $0x10] sm:$0xff] %v1359_v54 }
 0xd11   :  { %1364 = vst [vmem:[#allocation2] sm:$0xff] %v1360_v55 }
 0xd13   :  { %v1327_v19 = vpop.f32.mrf.mxu2  ;;  %v1350_v20 = vpop.f32.mrf.mxu3 }
 0xd14   :  { %v1328_v21 = vadd.f32 %v1327_v19, %v1275_v51  ;;  %v1351_v22 = vadd.f32 %v1350_v20, %v1298_v18  ;;  %v1402_v23 = vpop.f32.mrf.mxu0  ;;  %v1422_v37 = vpop.f32.mrf.mxu1 }
 0xd16   :  { %v1361_v52 = vadd.f32 %v1355_v45, %v1328_v21  ;;  %v1362_v25 = vadd.f32 %v1356_v46, %v1351_v22 }
 0xd17   :  { %v1383_v26 = vld [vmem:[#allocation2 + $0x10] sm:$0x3] }
 0xd18   :  { %v1425_v28 = vadd.f32 %v1402_v23, %v1383_v26  ;;  %v1384_v29 = vld [vmem:[#allocation2] sm:$0x3]  ;;  %1365 = vst [vmem:[#allocation2 + $0x18] sm:$0xff] %v1361_v52  ;;  %v1486_v52 = vld [vmem:[#allocation2] sm:$0xc] }
 0xd19   :  { %v1426_v30 = vadd.f32 %v1422_v37, %v1384_v29  ;;  %1366 = vst [vmem:[#allocation2 + $0x8] sm:$0xff] %v1362_v25  ;;  %v1485_v37 = vld [vmem:[#allocation2 + $0x10] sm:$0xc] }
 0xd1a   :  { %v2434_v31 = vmul.f32 -1.442695, %v1425_v28 }
 0xd1b   :  { %v2435_v53 = vmul.f32 -1.442695, %v1426_v30 }
 0xd1c   :  { %2573 = vpow2.f32 %v2434_v31 }
 0xd1d   :  { %2575 = vpow2.f32 %v2435_v53 }
 0xd22   :  { %v2574_v33 = vpop.eup %2573 }
 0xd23   :  { %v2576_v32 = vpop.eup %2575  ;;  %v1433_v35 = vadd.f32 1.0, %v2574_v33 }
 0xd24   :  { %v1434_v34 = vadd.f32 1.0, %v2576_v32 }
 0xd25   :  { %2577 = vrcp.f32 %v1433_v35  ;;  %v1446_v40 = vand.u32 2147483648, %v1433_v35  ;;  %vm1440_vm13 = vweird.f32 %v1433_v35  ;;  %v1444_v42 = vand.u32 2147483647, %v1433_v35 }
 0xd26   :  { %2579 = vrcp.f32 %v1434_v34  ;;  %v1461_v63 = vand.u32 2147483648, %v1434_v34  ;;  %v1459_v24 = vand.u32 2147483647, %v1434_v34  ;;  %vm1455_vm4 = vweird.f32 %v1434_v34 }
 0xd27   :  { %v1447_v45 = vor.u32 1.1754944e-38, %v1446_v40  ;;  %vm1445_vm15 = vcmp.eq.f32.partialorder %v1444_v42, 8.507059e+37 }
 0xd28   :  { %v1462_v39 = vor.u32 1.1754944e-38, %v1461_v63  ;;  %vm1460_vm12 = vcmp.eq.f32.partialorder %v1459_v24, 8.507059e+37 }
 0xd2b   :  { %v2578_v56 = vpop.eup %2577 }
 0xd2c   :  { %v2580_v57 = vpop.eup %2579  ;;  %v1436_v58 = vmul.f32 %v2578_v56, %v1433_v35  ;;  %vm1441_vm7 = vweird.f32 %v2578_v56 }
 0xd2d   :  { %v1451_v59 = vmul.f32 %v2580_v57, %v1434_v34  ;;  %vm1456_vm3 = vweird.f32 %v2580_v57  ;;  %vm1442_vm14 = vmor %vm1440_vm13, %vm1441_vm7 }
 0xd2e   :  { %v1437_v60 = vsub.f32 1.0, %v1436_v58  ;;  %vm1457_vm9 = vmor %vm1455_vm4, %vm1456_vm3 }
 0xd2f   :  { %v1452_v61 = vsub.f32 1.0, %v1451_v59 }
 0xd30   :  { %v1438_v62 = vmul.f32 %v2578_v56, %v1437_v60 }
 0xd31   :  { %v1453_v14 = vmul.f32 %v2580_v57, %v1452_v61 }
 0xd32   :  { %v1439_v38 = vadd.f32 %v2578_v56, %v1438_v62 }
 0xd33   :  { %v1454_v27 = vadd.f32 %v2580_v57, %v1453_v14 }
 0xd34   :  { %v1443_v44 = vsel %vm1442_vm14, %v2578_v56, %v1439_v38 }
 0xd35   :  { %v1458_v41 = vsel %vm1457_vm9, %v2580_v57, %v1454_v27  ;;  %v1448_v47 = vsel %vm1445_vm15, %v1447_v45, %v1443_v44 }
 0xd36   :  { %v1463_v36 = vsel %vm1460_vm12, %v1462_v39, %v1458_v41  ;;  %v1471_v50 = vmul.f32 0.0, %v1448_v47 }
 0xd37   :  { %v1466_v43 = vmul.f32 2.0, %v1463_v36 }
 0xd39   :  { %v2437_v46 = vadd.f32 -1.0, %v1466_v43 }
 0xd3b   :  { %v1470_v48 = vsel %vm129_vm8, %v2437_v46, %v1463_v36 }
 0xd3c   :  { %v1472_v49 = vmul.f32 %v1470_v48, %v1448_v47 }
 0xd3e   :  { %1474 = vrot.lane.b32.xlu0 %v1472_v49, %s2813_s5 }
 0xdb0   :  { %v1475_v51 = vpop.permute.xlu0 %1474 }
 0xdb1   :  { %v3359_v54 = vadd.f32 %v1475_v51, %v1471_v50 }
 0xdb3   :  { %2581 = vtanh.f32 %v3359_v54  ;;  %v1582_v39 = vrot.slane %v3359_v54, 6 }
 0xdb9   :  { %v2582_v55 = vpop.eup %2581 }
 0xdba   :  { %v1479_v18 = vmul.f32 %v2582_v55, %v1470_v48 }
 0xdbc   :  { %1481 = vrot.lane.b32.xlu1 %v1479_v18, %s2813_s5 }
 0xe2e   :  { %v3363_v19 = vpop.permute.xlu1 %1481 }
 0xe2f   :  { %1484 = vst.msk [vmem:[#allocation3] sm:$0x3] %vm392_vm10, %v3363_v19  ;;  %2438 = vmatmul.msk.f32.vlgmr.msra.gmra.mxu2 %vm289_vm11, %v3363_v19  ;;  %2439 = vmatmul.msk.f32.vlgmr.msra.gmra.mxu3 %vm289_vm11, %v3363_v19 }
 0xe30   :  { %1952 = vmatpush.msra.mxu2 %v3229_v1  ;;  %1972 = vmatpush.msra.mxu3 %v3227_v0 }
 0xe32   :  { %1953 = vmatpush.msra.mxu2 %v3235_v3  ;;  %1973 = vmatpush.msra.mxu3 %v3231_v2 }
 0xe34   :  { %1954 = vmatpush.msra.mxu2 %v3239_v5  ;;  %1974 = vmatpush.msra.mxu3 %v3237_v4 }
 0xe36   :  { %1955 = vmatpush.msra.mxu2 %v3253_v7  ;;  %1975 = vmatpush.msra.mxu3 %v3251_v6 }
 0xe38   :  { %1956 = vmatpush.msra.mxu2 %v3259_v9  ;;  %1976 = vmatpush.msra.mxu3 %v3255_v8 }
 0xe3a   :  { %1957 = vmatpush.msra.mxu2 %v3263_v11  ;;  %1977 = vmatpush.msra.mxu3 %v3261_v10 }
 0xe3c   :  { %1958 = vmatpush.msra.mxu2 %v3271_v13  ;;  %1978 = vmatpush.msra.mxu3 %v3269_v12 }
 0xe3e   :  { %1959 = vmatpush.msra.mxu2 %v3280_v16  ;;  %1979 = vmatpush.msra.mxu3 %v3278_v15 }
 0xeb2   :  { %v1506_v20 = vpop.f32.mrf.mxu2  ;;  %v1526_v21 = vpop.f32.mrf.mxu3 }
 0xeb3   :  { %v1531_v22 = vrot.slane %v1506_v20, 6  ;;  %v1532_v23 = vrot.slane %v1526_v21, 6 }
 0xeb5   :  { %v1535_v25 = vadd.f32 %v1531_v22, %v1485_v37  ;;  %v1536_v26 = vadd.f32 %v1532_v23, %v1486_v52  ;;  %v1598_v37 = vld [vmem:[#allocation2 + $0x10] sm:$0x30]  ;;  %v1599_v52 = vld [vmem:[#allocation2] sm:$0x30] }
 0xeb7   :  { %v2440_v28 = vmul.f32 -1.442695, %v1535_v25  ;;  %v2441_v29 = vmul.f32 -1.442695, %v1536_v26 }
 0xeb9   :  { %2583 = vpow2.f32 %v2440_v28 }
 0xeba   :  { %2585 = vpow2.f32 %v2441_v29 }
 0xebf   :  { %v2584_v30 = vpop.eup %2583 }
 0xec0   :  { %v2586_v31 = vpop.eup %2585  ;;  %v1543_v53 = vadd.f32 1.0, %v2584_v30 }
 0xec1   :  { %v1544_v33 = vadd.f32 1.0, %v2586_v31 }
 0xec2   :  { %2587 = vrcp.f32 %v1543_v53  ;;  %v1556_v58 = vand.u32 2147483648, %v1543_v53  ;;  %v1554_v61 = vand.u32 2147483647, %v1543_v53  ;;  %vm1550_vm3 = vweird.f32 %v1543_v53 }
 0xec3   :  { %2589 = vrcp.f32 %v1544_v33  ;;  %v1571_v62 = vand.u32 2147483648, %v1544_v33  ;;  %v1569_v14 = vand.u32 2147483647, %v1544_v33  ;;  %vm1565_vm7 = vweird.f32 %v1544_v33 }
 0xec4   :  { %v1557_v27 = vor.u32 1.1754944e-38, %v1556_v58  ;;  %vm1555_vm9 = vcmp.eq.f32.partialorder %v1554_v61, 8.507059e+37 }
 0xec5   :  { %v1572_v41 = vor.u32 1.1754944e-38, %v1571_v62  ;;  %vm1570_vm13 = vcmp.eq.f32.partialorder %v1569_v14, 8.507059e+37 }
 0xec8   :  { %v2588_v32 = vpop.eup %2587 }
 0xec9   :  { %v2590_v35 = vpop.eup %2589  ;;  %v1546_v34 = vmul.f32 %v2588_v32, %v1543_v53  ;;  %vm1551_vm0 = vweird.f32 %v2588_v32 }
 0xeca   :  { %v1561_v56 = vmul.f32 %v2590_v35, %v1544_v33  ;;  %vm1566_vm1 = vweird.f32 %v2590_v35  ;;  %vm1552_vm4 = vmor %vm1550_vm3, %vm1551_vm0 }
 0xecb   :  { %v1547_v57 = vsub.f32 1.0, %v1546_v34  ;;  %vm1567_vm12 = vmor %vm1565_vm7, %vm1566_vm1 }
 0xecc   :  { %v1562_v59 = vsub.f32 1.0, %v1561_v56 }
 0xecd   :  { %v1548_v60 = vmul.f32 %v2588_v32, %v1547_v57 }
 0xece   :  { %v1563_v63 = vmul.f32 %v2590_v35, %v1562_v59 }
 0xecf   :  { %v1549_v24 = vadd.f32 %v2588_v32, %v1548_v60 }
 0xed0   :  { %v1564_v38 = vadd.f32 %v2590_v35, %v1563_v63 }
 0xed1   :  { %v1553_v40 = vsel %vm1552_vm4, %v2588_v32, %v1549_v24 }
 0xed2   :  { %v1558_v42 = vsel %vm1555_vm9, %v1557_v27, %v1553_v40  ;;  %v1568_v36 = vsel %vm1567_vm12, %v2590_v35, %v1564_v38 }
 0xed3   :  { %v1573_v43 = vsel %vm1570_vm13, %v1572_v41, %v1568_v36  ;;  %v1584_v44 = vmul.f32 %v1582_v39, %v1558_v42 }
 0xed4   :  { %v1576_v45 = vmul.f32 2.0, %v1573_v43 }
 0xed6   :  { %v2443_v46 = vadd.f32 -1.0, %v1576_v45 }
 0xed8   :  { %v1580_v47 = vsel %vm129_vm8, %v2443_v46, %v1573_v43 }
 0xed9   :  { %v1585_v48 = vmul.f32 %v1580_v47, %v1558_v42 }
 0xedb   :  { %1587 = vrot.lane.b32.xlu2 %v1585_v48, %s2813_s5 }
 0xf35   :  { %v1588_v49 = vpop.permute.xlu2 %1587 }
 0xf36   :  { %v3391_v50 = vadd.f32 %v1588_v49, %v1584_v44 }
 0xf38   :  { %2591 = vtanh.f32 %v3391_v50  ;;  %v1698_v39 = vrot.slane %v3391_v50, 6 }
 0xf3e   :  { %v2592_v51 = vpop.eup %2591 }
 0xf3f   :  { %v3394_v54 = vmul.f32 %v2592_v51, %v1580_v47 }
 0xf41   :  { %v1600_v55 = vrot.slane %v3394_v54, 2 }
 0xf43   :  { %1601 = vrot.lane.b32.xlu0 %v1600_v55, %s2813_s5 }
 0xfb5   :  { %v1602_v18 = vpop.permute.xlu0 %1601 }
 0xfb6   :  { %2444 = vmatmul.msk.f32.vlgmr.msrb.gmra.mxu0 %vm289_vm11, %v1602_v18  ;;  %2445 = vmatmul.msk.f32.vlgmr.msrb.gmra.mxu1 %vm289_vm11, %v1602_v18 }
 0xfb7   :  { %2068 = vmatpush.msrb.mxu0 %v3229_v1  ;;  %2088 = vmatpush.msrb.mxu1 %v3227_v0 }
 0xfb9   :  { %2069 = vmatpush.msrb.mxu0 %v3235_v3  ;;  %2089 = vmatpush.msrb.mxu1 %v3231_v2 }
 0xfbb   :  { %2070 = vmatpush.msrb.mxu0 %v3239_v5  ;;  %2090 = vmatpush.msrb.mxu1 %v3237_v4 }
 0xfbd   :  { %2071 = vmatpush.msrb.mxu0 %v3253_v7  ;;  %2091 = vmatpush.msrb.mxu1 %v3251_v6 }
 0xfbf   :  { %2072 = vmatpush.msrb.mxu0 %v3259_v9  ;;  %2092 = vmatpush.msrb.mxu1 %v3255_v8 }
 0xfc1   :  { %2073 = vmatpush.msrb.mxu0 %v3263_v11  ;;  %2093 = vmatpush.msrb.mxu1 %v3261_v10 }
 0xfc3   :  { %2074 = vmatpush.msrb.mxu0 %v3271_v13  ;;  %2094 = vmatpush.msrb.mxu1 %v3269_v12 }
 0xfc5   :  { %2075 = vmatpush.msrb.mxu0 %v3280_v16  ;;  %2095 = vmatpush.msrb.mxu1 %v3278_v15 }
0x1033   :  { %v1622_v20 = vpop.f32.mrf.mxu0  ;;  %v1642_v21 = vpop.f32.mrf.mxu1 }
0x1034   :  { %v1647_v22 = vrot.slane %v1622_v20, 4  ;;  %v1648_v23 = vrot.slane %v1642_v21, 4 }
0x1036   :  { %v1651_v25 = vadd.f32 %v1647_v22, %v1598_v37  ;;  %v1652_v26 = vadd.f32 %v1648_v23, %v1599_v52 }
0x1038   :  { %v2446_v28 = vmul.f32 -1.442695, %v1651_v25  ;;  %v2447_v29 = vmul.f32 -1.442695, %v1652_v26 }
0x103a   :  { %2593 = vpow2.f32 %v2446_v28 }
0x103b   :  { %2595 = vpow2.f32 %v2447_v29 }
0x1040   :  { %v2594_v30 = vpop.eup %2593 }
0x1041   :  { %v2596_v31 = vpop.eup %2595  ;;  %v1659_v53 = vadd.f32 1.0, %v2594_v30 }
0x1042   :  { %v1660_v33 = vadd.f32 1.0, %v2596_v31 }
0x1043   :  { %2597 = vrcp.f32 %v1659_v53  ;;  %v1672_v58 = vand.u32 2147483648, %v1659_v53  ;;  %v1670_v61 = vand.u32 2147483647, %v1659_v53  ;;  %vm1666_vm0 = vweird.f32 %v1659_v53 }
0x1044   :  { %2599 = vrcp.f32 %v1660_v33  ;;  %v1687_v62 = vand.u32 2147483648, %v1660_v33  ;;  %v1685_v14 = vand.u32 2147483647, %v1660_v33  ;;  %vm1681_vm3 = vweird.f32 %v1660_v33 }
0x1045   :  { %v1673_v27 = vor.u32 1.1754944e-38, %v1672_v58  ;;  %vm1671_vm4 = vcmp.eq.f32.partialorder %v1670_v61, 8.507059e+37 }
0x1046   :  { %v1688_v41 = vor.u32 1.1754944e-38, %v1687_v62  ;;  %vm1686_vm9 = vcmp.eq.f32.partialorder %v1685_v14, 8.507059e+37 }
0x1049   :  { %v2598_v32 = vpop.eup %2597 }
0x104a   :  { %v2600_v35 = vpop.eup %2599  ;;  %v1662_v34 = vmul.f32 %v2598_v32, %v1659_v53  ;;  %vm1667_vm14 = vweird.f32 %v2598_v32 }
0x104b   :  { %v1677_v56 = vmul.f32 %v2600_v35, %v1660_v33  ;;  %vm1682_vm15 = vweird.f32 %v2600_v35  ;;  %vm1668_vm1 = vmor %vm1666_vm0, %vm1667_vm14 }
0x104c   :  { %v1663_v57 = vsub.f32 1.0, %v1662_v34  ;;  %vm1683_vm7 = vmor %vm1681_vm3, %vm1682_vm15 }
0x104d   :  { %v1678_v59 = vsub.f32 1.0, %v1677_v56 }
0x104e   :  { %v1664_v60 = vmul.f32 %v2598_v32, %v1663_v57 }
0x104f   :  { %v1679_v63 = vmul.f32 %v2600_v35, %v1678_v59 }
0x1050   :  { %v1665_v24 = vadd.f32 %v2598_v32, %v1664_v60 }
0x1051   :  { %v1680_v38 = vadd.f32 %v2600_v35, %v1679_v63 }
0x1052   :  { %v1669_v40 = vsel %vm1668_vm1, %v2598_v32, %v1665_v24 }
0x1053   :  { %v1674_v42 = vsel %vm1671_vm4, %v1673_v27, %v1669_v40  ;;  %v1684_v36 = vsel %vm1683_vm7, %v2600_v35, %v1680_v38 }
0x1054   :  { %v1689_v43 = vsel %vm1686_vm9, %v1688_v41, %v1684_v36  ;;  %v1700_v44 = vmul.f32 %v1698_v39, %v1674_v42  ;;  %v1830_v41 = vld [vmem:[#allocation2 + $0x18] sm:$0x3]  ;;  %v1831_v36 = vld [vmem:[#allocation2 + $0x8] sm:$0x3] }
0x1055   :  { %v1692_v45 = vmul.f32 2.0, %v1689_v43 }
0x1057   :  { %v2449_v46 = vadd.f32 -1.0, %v1692_v45 }
0x1059   :  { %v1696_v47 = vsel %vm129_vm8, %v2449_v46, %v1689_v43 }
0x105a   :  { %v1701_v48 = vmul.f32 %v1696_v47, %v1674_v42 }
0x105c   :  { %1703 = vrot.lane.b32.xlu1 %v1701_v48, %s2813_s5 }
0x10ce   :  { %v1704_v49 = vpop.permute.xlu1 %1703 }
0x10cf   :  { %v3420_v51 = vadd.f32 %v1704_v49, %v1700_v44 }
0x10d1   :  { %2601 = vtanh.f32 %v3420_v51  ;;  %v1814_v32 = vrot.slane %v3420_v51, 6 }
0x10d7   :  { %v2602_v50 = vpop.eup %2601 }
0x10d8   :  { %v3423_v55 = vmul.f32 %v2602_v50, %v1696_v47 }
0x10da   :  { %v1716_v18 = vrot.slane %v3423_v55, 4 }
0x10dc   :  { %1717 = vrot.lane.b32.xlu2 %v1716_v18, %s2813_s5 }
0x1136   :  { %v1718_v20 = vpop.permute.xlu2 %1717 }
0x1137   :  { %2450 = vmatmul.msk.f32.vlgmr.msrb.gmra.mxu2 %vm289_vm11, %v1718_v20  ;;  %2451 = vmatmul.msk.f32.vlgmr.msrb.gmra.mxu3 %vm289_vm11, %v1718_v20 }
0x1138   :  { %2184 = vmatpush.msrb.mxu2 %v3229_v1  ;;  %2204 = vmatpush.msrb.mxu3 %v3227_v0 }
0x113a   :  { %2185 = vmatpush.msrb.mxu2 %v3235_v3  ;;  %2205 = vmatpush.msrb.mxu3 %v3231_v2 }
0x113c   :  { %2186 = vmatpush.msrb.mxu2 %v3239_v5  ;;  %2206 = vmatpush.msrb.mxu3 %v3237_v4  ;;  %v1714_v4 = vld [vmem:[#allocation2 + $0x10] sm:$0xc0]  ;;  %v1715_v5 = vld [vmem:[#allocation2] sm:$0xc0] }
0x113e   :  { %2187 = vmatpush.msrb.mxu2 %v3253_v7  ;;  %2207 = vmatpush.msrb.mxu3 %v3251_v6 }
0x1140   :  { %2188 = vmatpush.msrb.mxu2 %v3259_v9  ;;  %2208 = vmatpush.msrb.mxu3 %v3255_v8 }
0x1142   :  { %2189 = vmatpush.msrb.mxu2 %v3263_v11  ;;  %2209 = vmatpush.msrb.mxu3 %v3261_v10 }
0x1144   :  { %2190 = vmatpush.msrb.mxu2 %v3271_v13  ;;  %2210 = vmatpush.msrb.mxu3 %v3269_v12 }
0x1146   :  { %2191 = vmatpush.msrb.mxu2 %v3280_v16  ;;  %2211 = vmatpush.msrb.mxu3 %v3278_v15 }
0x11ba   :  { %v1738_v0 = vpop.f32.mrf.mxu2  ;;  %v1758_v1 = vpop.f32.mrf.mxu3 }
0x11bb   :  { %v1763_v2 = vrot.slane %v1738_v0, 2  ;;  %v1764_v3 = vrot.slane %v1758_v1, 2 }
0x11bd   :  { %v1767_v6 = vadd.f32 %v1763_v2, %v1714_v4  ;;  %v1768_v7 = vadd.f32 %v1764_v3, %v1715_v5 }
0x11bf   :  { %v2452_v8 = vmul.f32 -1.442695, %v1767_v6  ;;  %v2453_v9 = vmul.f32 -1.442695, %v1768_v7 }
0x11c1   :  { %2603 = vpow2.f32 %v2452_v8 }
0x11c2   :  { %2605 = vpow2.f32 %v2453_v9 }
0x11c7   :  { %v2604_v10 = vpop.eup %2603 }
0x11c8   :  { %v2606_v11 = vpop.eup %2605  ;;  %v1775_v13 = vadd.f32 1.0, %v2604_v10 }
0x11c9   :  { %v1776_v12 = vadd.f32 1.0, %v2606_v11 }
0x11ca   :  { %2607 = vrcp.f32 %v1775_v13  ;;  %v1788_v37 = vand.u32 2147483648, %v1775_v13  ;;  %v1786_v26 = vand.u32 2147483647, %v1775_v13  ;;  %vm1782_vm14 = vweird.f32 %v1775_v13 }
0x11cb   :  { %2609 = vrcp.f32 %v1776_v12  ;;  %v1803_v28 = vand.u32 2147483648, %v1776_v12  ;;  %v1801_v30 = vand.u32 2147483647, %v1776_v12  ;;  %vm1797_vm0 = vweird.f32 %v1776_v12 }
0x11cc   :  { %v1789_v53 = vor.u32 1.1754944e-38, %v1788_v37  ;;  %vm1787_vm1 = vcmp.eq.f32.partialorder %v1786_v26, 8.507059e+37 }
0x11cd   :  { %v1804_v34 = vor.u32 1.1754944e-38, %v1803_v28  ;;  %vm1802_vm4 = vcmp.eq.f32.partialorder %v1801_v30, 8.507059e+37 }
0x11d0   :  { %v2608_v16 = vpop.eup %2607 }
0x11d1   :  { %v2610_v15 = vpop.eup %2609  ;;  %v1778_v21 = vmul.f32 %v2608_v16, %v1775_v13  ;;  %vm1783_vm12 = vweird.f32 %v2608_v16 }
0x11d2   :  { %v1793_v22 = vmul.f32 %v2610_v15, %v1776_v12  ;;  %vm1798_vm13 = vweird.f32 %v2610_v15  ;;  %vm1784_vm15 = vmor %vm1782_vm14, %vm1783_vm12 }
0x11d3   :  { %v1779_v23 = vsub.f32 1.0, %v1778_v21  ;;  %vm1799_vm3 = vmor %vm1797_vm0, %vm1798_vm13 }
0x11d4   :  { %v1794_v52 = vsub.f32 1.0, %v1793_v22 }
0x11d5   :  { %v1780_v25 = vmul.f32 %v2608_v16, %v1779_v23 }
0x11d6   :  { %v1795_v29 = vmul.f32 %v2610_v15, %v1794_v52 }
0x11d7   :  { %v1781_v31 = vadd.f32 %v2608_v16, %v1780_v25 }
0x11d8   :  { %v1796_v33 = vadd.f32 %v2610_v15, %v1795_v29 }
0x11d9   :  { %v1785_v35 = vsel %vm1784_vm15, %v2608_v16, %v1781_v31 }
0x11da   :  { %v1790_v56 = vsel %vm1787_vm1, %v1789_v53, %v1785_v35  ;;  %v1800_v57 = vsel %vm1799_vm3, %v2610_v15, %v1796_v33 }
0x11db   :  { %v1805_v58 = vsel %vm1802_vm4, %v1804_v34, %v1800_v57  ;;  %v1816_v59 = vmul.f32 %v1814_v32, %v1790_v56  ;;  %v1940_v57 = vld [vmem:[#allocation2 + $0x18] sm:$0xc] }
0x11dc   :  { %v1808_v60 = vmul.f32 2.0, %v1805_v58 }
0x11de   :  { %v2455_v61 = vadd.f32 -1.0, %v1808_v60 }
0x11e0   :  { %v1812_v62 = vsel %vm129_vm8, %v2455_v61, %v1805_v58  ;;  %v1941_v58 = vld [vmem:[#allocation2 + $0x8] sm:$0xc] }
0x11e1   :  { %v1817_v63 = vmul.f32 %v1812_v62, %v1790_v56 }
0x11e3   :  { %1819 = vrot.lane.b32.xlu0 %v1817_v63, %s2813_s5 }
0x1255   :  { %v1820_v14 = vpop.permute.xlu0 %1819 }
0x1256   :  { %v1822_v24 = vadd.f32 %v1820_v14, %v1816_v59 }
0x1258   :  { %2611 = vtanh.f32 %v1822_v24  ;;  %v1924_v12 = vrot.slane %v1822_v24, 6 }
0x125e   :  { %v2612_v27 = vpop.eup %2611 }
0x125f   :  { %v3449_v38 = vmul.f32 %v2612_v27, %v1812_v62 }
0x1261   :  { %v1832_v39 = vrot.slane %v3449_v38, 6 }
0x1263   :  { %1833 = vrot.lane.b32.xlu1 %v1832_v39, %s2813_s5 }
0x12d5   :  { %v1834_v40 = vpop.permute.xlu1 %1833 }
0x12d6   :  { %2456 = vmatmul.msk.f32.vlgmr.msra.gmra.mxu0 %vm289_vm11, %v1834_v40  ;;  %2457 = vmatmul.msk.f32.vlgmr.msra.gmra.mxu1 %vm289_vm11, %v1834_v40 }
0x1353   :  { %v1854_v42 = vpop.f32.mrf.mxu0  ;;  %v1874_v43 = vpop.f32.mrf.mxu1 }
0x1354   :  { %v1877_v44 = vadd.f32 %v1854_v42, %v1830_v41  ;;  %v1878_v45 = vadd.f32 %v1874_v43, %v1831_v36 }
0x1356   :  { %v2458_v46 = vmul.f32 -1.442695, %v1877_v44  ;;  %v2459_v47 = vmul.f32 -1.442695, %v1878_v45 }
0x1358   :  { %2613 = vpow2.f32 %v2458_v46 }
0x1359   :  { %2615 = vpow2.f32 %v2459_v47 }
0x135e   :  { %v2614_v48 = vpop.eup %2613 }
0x135f   :  { %v2616_v49 = vpop.eup %2615  ;;  %v1885_v51 = vadd.f32 1.0, %v2614_v48 }
0x1360   :  { %v1886_v50 = vadd.f32 1.0, %v2616_v49 }
0x1361   :  { %2617 = vrcp.f32 %v1885_v51  ;;  %v1898_v4 = vand.u32 2147483648, %v1885_v51  ;;  %v1896_v6 = vand.u32 2147483647, %v1885_v51  ;;  %vm1892_vm12 = vweird.f32 %v1885_v51 }
0x1362   :  { %2619 = vrcp.f32 %v1886_v50  ;;  %v1913_v7 = vand.u32 2147483648, %v1886_v50  ;;  %v1911_v9 = vand.u32 2147483647, %v1886_v50  ;;  %vm1907_vm14 = vweird.f32 %v1886_v50 }
0x1363   :  { %v1899_v11 = vor.u32 1.1754944e-38, %v1898_v4  ;;  %vm1897_vm15 = vcmp.eq.f32.partialorder %v1896_v6, 8.507059e+37 }
0x1364   :  { %v1914_v15 = vor.u32 1.1754944e-38, %v1913_v7  ;;  %vm1912_vm1 = vcmp.eq.f32.partialorder %v1911_v9, 8.507059e+37 }
0x1367   :  { %v2618_v18 = vpop.eup %2617 }
0x1368   :  { %v2620_v20 = vpop.eup %2619  ;;  %v1888_v0 = vmul.f32 %v2618_v18, %v1885_v51  ;;  %vm1893_vm7 = vweird.f32 %v2618_v18 }
0x1369   :  { %v1903_v1 = vmul.f32 %v2620_v20, %v1886_v50  ;;  %vm1908_vm9 = vweird.f32 %v2620_v20  ;;  %vm1894_vm13 = vmor %vm1892_vm12, %vm1893_vm7 }
0x136a   :  { %v1889_v2 = vsub.f32 1.0, %v1888_v0  ;;  %vm1909_vm0 = vmor %vm1907_vm14, %vm1908_vm9 }
0x136b   :  { %v1904_v3 = vsub.f32 1.0, %v1903_v1 }
0x136c   :  { %v1890_v5 = vmul.f32 %v2618_v18, %v1889_v2 }
0x136d   :  { %v1905_v8 = vmul.f32 %v2620_v20, %v1904_v3 }
0x136e   :  { %v1891_v10 = vadd.f32 %v2618_v18, %v1890_v5 }
0x136f   :  { %v1906_v13 = vadd.f32 %v2620_v20, %v1905_v8 }
0x1370   :  { %v1895_v16 = vsel %vm1894_vm13, %v2618_v18, %v1891_v10  ;;  %v2300_v10 = vld [vmem:[%s3577_s11 + $0x38] sm:$0xff] }
0x1371   :  { %v1900_v21 = vsel %vm1897_vm15, %v1899_v11, %v1895_v16  ;;  %v1910_v22 = vsel %vm1909_vm0, %v2620_v20, %v1906_v13  ;;  %v2299_v11 = vld [vmem:[%s3577_s11 + $0x30] sm:$0xff]  ;;  %2309 = vmatpush.msra.mxu0 %v2300_v10  ;;  %v2298_v13 = vld [vmem:[%s3577_s11 + $0x28] sm:$0xff] }
0x1372   :  { %v1915_v23 = vsel %vm1912_vm1, %v1914_v15, %v1910_v22  ;;  %v1926_v37 = vmul.f32 %v1924_v12, %v1900_v21  ;;  %v2297_v12 = vld [vmem:[%s3577_s11 + $0x20] sm:$0xff] }
0x1373   :  { %v1918_v52 = vmul.f32 2.0, %v1915_v23  ;;  %2310 = vmatpush.msra.mxu0 %v2299_v11 }
0x1375   :  { %v2461_v25 = vadd.f32 -1.0, %v1918_v52  ;;  %2311 = vmatpush.msra.mxu0 %v2298_v13  ;;  %v2295_v52 = vld [vmem:[%s3577_s11 + $0x10] sm:$0xff] }
0x1377   :  { %v1922_v26 = vsel %vm129_vm8, %v2461_v25, %v1915_v23  ;;  %2312 = vmatpush.msra.mxu0 %v2297_v12  ;;  %v2294_v25 = vld [vmem:[%s3577_s11 + $0x8] sm:$0xff] }
0x1378   :  { %v1927_v28 = vmul.f32 %v1922_v26, %v1900_v21 }
0x137a   :  { %1929 = vrot.lane.b32.xlu2 %v1927_v28, %s2813_s5 }
0x13d4   :  { %v1930_v29 = vpop.permute.xlu2 %1929 }
0x13d5   :  { %v1932_v30 = vadd.f32 %v1930_v29, %v1926_v37  ;;  %v2296_v37 = vld [vmem:[%s3577_s11 + $0x18] sm:$0xff] }
0x13d6   :  { %2313 = vmatpush.msra.mxu0 %v2296_v37 }
0x13d7   :  { %2621 = vtanh.f32 %v1932_v30  ;;  %v2037_v20 = vrot.slane %v1932_v30, 6 }
0x13d8   :  { %2314 = vmatpush.msra.mxu0 %v2295_v52 }
0x13da   :  { %2315 = vmatpush.msra.mxu0 %v2294_v25 }
0x13dd   :  { %v2622_v31 = vpop.eup %2621 }
0x13de   :  { %v1934_v53 = vmul.f32 %v2622_v31, %v1922_v26  ;;  %v2293_v26 = vld [vmem:[%s3577_s11] sm:$0xff] }
0x13df   :  { %2316 = vmatpush.msra.mxu0 %v2293_v26 }
0x13e0   :  { %1936 = vrot.lane.b32.xlu0 %v1934_v53, %s2813_s5 }
0x1452   :  { %v1937_v33 = vpop.permute.xlu0 %1936 }
0x1453   :  { %1939 = vst.msk [vmem:[#allocation3 + $0x8] sm:$0x3] %vm392_vm10, %v1937_v33  ;;  %2462 = vmatmul.msk.f32.vlgmr.msra.gmra.mxu2 %vm289_vm11, %v1937_v33  ;;  %2463 = vmatmul.msk.f32.vlgmr.msra.gmra.mxu3 %vm289_vm11, %v1937_v33  ;;  %v2053_v33 = vld [vmem:[#allocation2 + $0x18] sm:$0x30] }
0x14d6   :  { %v1961_v32 = vpop.f32.mrf.mxu2  ;;  %v1981_v35 = vpop.f32.mrf.mxu3 }
0x14d7   :  { %v1986_v34 = vrot.slane %v1961_v32, 6  ;;  %v1987_v56 = vrot.slane %v1981_v35, 6  ;;  %v2054_v32 = vld [vmem:[#allocation2 + $0x8] sm:$0x30] }
0x14d9   :  { %v1990_v59 = vadd.f32 %v1986_v34, %v1940_v57  ;;  %v1991_v60 = vadd.f32 %v1987_v56, %v1941_v58 }
0x14db   :  { %v2464_v61 = vmul.f32 -1.442695, %v1990_v59  ;;  %v2465_v62 = vmul.f32 -1.442695, %v1991_v60 }
0x14dd   :  { %2623 = vpow2.f32 %v2464_v61 }
0x14de   :  { %2625 = vpow2.f32 %v2465_v62 }
0x14e3   :  { %v2624_v63 = vpop.eup %2623 }
0x14e4   :  { %v2626_v14 = vpop.eup %2625  ;;  %v1998_v24 = vadd.f32 1.0, %v2624_v63 }
0x14e5   :  { %v1999_v27 = vadd.f32 1.0, %v2626_v14 }
0x14e6   :  { %2627 = vrcp.f32 %v1998_v24  ;;  %v2011_v43 = vand.u32 2147483648, %v1998_v24  ;;  %v2009_v46 = vand.u32 2147483647, %v1998_v24  ;;  %vm2005_vm4 = vweird.f32 %v1998_v24 }
0x14e7   :  { %2629 = vrcp.f32 %v1999_v27  ;;  %v2026_v47 = vand.u32 2147483648, %v1999_v27  ;;  %v2024_v49 = vand.u32 2147483647, %v1999_v27  ;;  %vm2020_vm9 = vweird.f32 %v1999_v27 }
0x14e8   :  { %v2012_v50 = vor.u32 1.1754944e-38, %v2011_v43  ;;  %vm2010_vm12 = vcmp.eq.f32.partialorder %v2009_v46, 8.507059e+37 }
0x14e9   :  { %v2027_v1 = vor.u32 1.1754944e-38, %v2026_v47  ;;  %vm2025_vm14 = vcmp.eq.f32.partialorder %v2024_v49, 8.507059e+37 }
0x14ec   :  { %v2628_v39 = vpop.eup %2627 }
0x14ed   :  { %v2630_v40 = vpop.eup %2629  ;;  %v2001_v41 = vmul.f32 %v2628_v39, %v1998_v24  ;;  %vm2006_vm10 = vweird.f32 %v2628_v39 }
0x14ee   :  { %v2016_v42 = vmul.f32 %v2630_v40, %v1999_v27  ;;  %vm2021_vm3 = vweird.f32 %v2630_v40  ;;  %vm2007_vm7 = vmor %vm2005_vm4, %vm2006_vm10 }
0x14ef   :  { %v2002_v36 = vsub.f32 1.0, %v2001_v41  ;;  %vm2022_vm13 = vmor %vm2020_vm9, %vm2021_vm3 }
0x14f0   :  { %v2017_v44 = vsub.f32 1.0, %v2016_v42 }
0x14f1   :  { %v2003_v45 = vmul.f32 %v2628_v39, %v2002_v36 }
0x14f2   :  { %v2018_v48 = vmul.f32 %v2630_v40, %v2017_v44 }
0x14f3   :  { %v2004_v51 = vadd.f32 %v2628_v39, %v2003_v45 }
0x14f4   :  { %v2019_v18 = vadd.f32 %v2630_v40, %v2018_v48 }
0x14f5   :  { %v2008_v0 = vsel %vm2007_vm7, %v2628_v39, %v2004_v51 }
0x14f6   :  { %v2013_v2 = vsel %vm2010_vm12, %v2012_v50, %v2008_v0  ;;  %v2023_v3 = vsel %vm2022_vm13, %v2630_v40, %v2019_v18 }
0x14f7   :  { %v2028_v4 = vsel %vm2025_vm14, %v2027_v1, %v2023_v3  ;;  %v2039_v5 = vmul.f32 %v2037_v20, %v2013_v2 }
0x14f8   :  { %v2031_v6 = vmul.f32 2.0, %v2028_v4 }
0x14fa   :  { %v2467_v7 = vadd.f32 -1.0, %v2031_v6 }
0x14fc   :  { %v2035_v8 = vsel %vm129_vm8, %v2467_v7, %v2028_v4 }
0x14fd   :  { %v2040_v9 = vmul.f32 %v2035_v8, %v2013_v2 }
0x14ff   :  { %2042 = vrot.lane.b32.xlu1 %v2040_v9, %s2813_s5 }
0x1571   :  { %v2043_v16 = vpop.permute.xlu1 %2042 }
0x1572   :  { %v3477_v15 = vadd.f32 %v2043_v16, %v2039_v5 }
0x1574   :  { %2631 = vtanh.f32 %v3477_v15  ;;  %v2153_v47 = vrot.slane %v3477_v15, 6 }
0x157a   :  { %v2632_v21 = vpop.eup %2631 }
0x157b   :  { %v3480_v22 = vmul.f32 %v2632_v21, %v2035_v8  ;;  %v2169_v21 = vld [vmem:[#allocation2 + $0x18] sm:$0xc0] }
0x157d   :  { %v2055_v23 = vrot.slane %v3480_v22, 2 }
0x157f   :  { %2056 = vrot.lane.b32.xlu2 %v2055_v23, %s2813_s5 }
0x15d9   :  { %v2057_v28 = vpop.permute.xlu2 %2056 }
0x15da   :  { %2468 = vmatmul.msk.f32.vlgmr.msrb.gmra.mxu0 %vm289_vm11, %v2057_v28  ;;  %2469 = vmatmul.msk.f32.vlgmr.msrb.gmra.mxu1 %vm289_vm11, %v2057_v28 }
0x15e2   :  { %2480 = vmatmul.msk.f32.vlgmr.msra.gmra.mxu0 %vm289_vm11, %v3363_v19 }
0x1657   :  { %v2077_v29 = vpop.f32.mrf.mxu0  ;;  %v2097_v30 = vpop.f32.mrf.mxu1 }
0x1658   :  { %v2102_v31 = vrot.slane %v2077_v29, 4  ;;  %v2103_v53 = vrot.slane %v2097_v30, 4 }
0x165a   :  { %v2106_v35 = vadd.f32 %v2102_v31, %v2053_v33  ;;  %v2107_v34 = vadd.f32 %v2103_v53, %v2054_v32 }
0x165c   :  { %v2470_v56 = vmul.f32 -1.442695, %v2106_v35  ;;  %v2471_v57 = vmul.f32 -1.442695, %v2107_v34 }
0x165e   :  { %2633 = vpow2.f32 %v2470_v56 }
0x165f   :  { %2635 = vpow2.f32 %v2471_v57 }
0x1664   :  { %v2634_v58 = vpop.eup %2633 }
0x1665   :  { %v2636_v59 = vpop.eup %2635  ;;  %v2114_v60 = vadd.f32 1.0, %v2634_v58 }
0x1666   :  { %v2115_v61 = vadd.f32 1.0, %v2636_v59 }
0x1667   :  { %2637 = vrcp.f32 %v2114_v60  ;;  %v2127_v27 = vand.u32 2147483648, %v2114_v60  ;;  %v2125_v41 = vand.u32 2147483647, %v2114_v60  ;;  %vm2121_vm1 = vweird.f32 %v2114_v60 }
0x1668   :  { %2639 = vrcp.f32 %v2115_v61  ;;  %v2142_v42 = vand.u32 2147483648, %v2115_v61  ;;  %v2140_v43 = vand.u32 2147483647, %v2115_v61  ;;  %vm2136_vm3 = vweird.f32 %v2115_v61 }
0x1669   :  { %v2128_v45 = vor.u32 1.1754944e-38, %v2127_v27  ;;  %vm2126_vm4 = vcmp.eq.f32.partialorder %v2125_v41, 8.507059e+37 }
0x166a   :  { %v2143_v49 = vor.u32 1.1754944e-38, %v2142_v42  ;;  %vm2141_vm9 = vcmp.eq.f32.partialorder %v2140_v43, 8.507059e+37 }
0x166d   :  { %v2638_v62 = vpop.eup %2637 }
0x166e   :  { %v2640_v19 = vpop.eup %2639  ;;  %v2117_v63 = vmul.f32 %v2638_v62, %v2114_v60  ;;  %vm2122_vm15 = vweird.f32 %v2638_v62 }
0x166f   :  { %v2132_v14 = vmul.f32 %v2640_v19, %v2115_v61  ;;  %vm2137_vm0 = vweird.f32 %v2640_v19  ;;  %vm2123_vm10 = vmor %vm2121_vm1, %vm2122_vm15 }
0x1670   :  { %v2118_v24 = vsub.f32 1.0, %v2117_v63  ;;  %vm2138_vm7 = vmor %vm2136_vm3, %vm2137_vm0 }
0x1671   :  { %v2133_v39 = vsub.f32 1.0, %v2132_v14 }
0x1672   :  { %v2119_v40 = vmul.f32 %v2638_v62, %v2118_v24 }
0x1673   :  { %v2134_v36 = vmul.f32 %v2640_v19, %v2133_v39 }
0x1674   :  { %v2120_v44 = vadd.f32 %v2638_v62, %v2119_v40 }
0x1675   :  { %v2135_v46 = vadd.f32 %v2640_v19, %v2134_v36 }
0x1676   :  { %v2124_v48 = vsel %vm2123_vm10, %v2638_v62, %v2120_v44 }
0x1677   :  { %v2129_v51 = vsel %vm2126_vm4, %v2128_v45, %v2124_v48  ;;  %v2139_v50 = vsel %vm2138_vm7, %v2640_v19, %v2135_v46  ;;  %v2292_v45 = vld [vmem:[%s3576_s10 + $0x38] sm:$0xff]  ;;  %v2291_v46 = vld [vmem:[%s3576_s10 + $0x30] sm:$0xff] }
0x1678   :  { %v2144_v18 = vsel %vm2141_vm9, %v2143_v49, %v2139_v50  ;;  %v2155_v20 = vmul.f32 %v2153_v47, %v2129_v51  ;;  %2334 = vmatpush.msra.mxu1 %v2292_v45  ;;  %v2290_v47 = vld [vmem:[%s3576_s10 + $0x28] sm:$0xff]  ;;  %v2288_v49 = vld [vmem:[%s3576_s10 + $0x18] sm:$0xff] }
0x1679   :  { %v2147_v0 = vmul.f32 2.0, %v2144_v18 }
0x167a   :  { %2335 = vmatpush.msra.mxu1 %v2291_v46 }
0x167b   :  { %v2473_v1 = vadd.f32 -1.0, %v2147_v0 }
0x167c   :  { %2336 = vmatpush.msra.mxu1 %v2290_v47 }
0x167d   :  { %v2151_v2 = vsel %vm129_vm8, %v2473_v1, %v2144_v18  ;;  %v2286_v18 = vld [vmem:[%s3576_s10 + $0x8] sm:$0xff]  ;;  %v2285_v1 = vld [vmem:[%s3576_s10] sm:$0xff] }
0x167e   :  { %v2156_v3 = vmul.f32 %v2151_v2, %v2129_v51  ;;  %v2287_v51 = vld [vmem:[%s3576_s10 + $0x10] sm:$0xff] }
0x1680   :  { %2158 = vrot.lane.b32.xlu0 %v2156_v3, %s2813_s5 }
0x16f2   :  { %v2159_v4 = vpop.permute.xlu0 %2158 }
0x16f3   :  { %v3504_v5 = vadd.f32 %v2159_v4, %v2155_v20 }
0x16f5   :  { %2641 = vtanh.f32 %v3504_v5  ;;  %v2269_v63 = vrot.slane %v3504_v5, 6 }
0x16fb   :  { %v2642_v6 = vpop.eup %2641 }
0x16fc   :  { %v3507_v7 = vmul.f32 %v2642_v6, %v2151_v2 }
0x16fe   :  { %v2171_v8 = vrot.slane %v3507_v7, 4 }
0x1700   :  { %2172 = vrot.lane.b32.xlu1 %v2171_v8, %s2813_s5  ;;  %v2318_v8 = vpop.f32.mrf.mxu0 }
0x1708   :  { %1594 = vrot.lane.b32.xlu1 %v3394_v54, %s2813_s5  ;;  %v2170_v54 = vld [vmem:[#allocation2 + $0x8] sm:$0xc0] }
0x1710   :  { %2049 = vrot.lane.b32.xlu1 %v3480_v22, %s2813_s5 }
0x1772   :  { %v2173_v9 = vpop.permute.xlu1 %2172 }
0x1773   :  { %2474 = vmatmul.msk.f32.vlgmr.msrb.gmra.mxu2 %vm289_vm11, %v2173_v9  ;;  %2475 = vmatmul.msk.f32.vlgmr.msrb.gmra.mxu3 %vm289_vm11, %v2173_v9 }
0x177a   :  { %v1595_v10 = vpop.permute.xlu1 %1594 }
0x177b   :  { %1597 = vst.msk [vmem:[#allocation3] sm:$0xc] %vm506_vm5, %v1595_v10 }
0x1782   :  { %v2050_v11 = vpop.permute.xlu1 %2049 }
0x1783   :  { %2052 = vst.msk [vmem:[#allocation3 + $0x8] sm:$0xc] %vm506_vm5, %v2050_v11 }
0x17f6   :  { %v2193_v13 = vpop.f32.mrf.mxu2  ;;  %v2213_v12 = vpop.f32.mrf.mxu3 }
0x17f7   :  { %v2218_v16 = vrot.slane %v2193_v13, 2  ;;  %v2219_v15 = vrot.slane %v2213_v12, 2 }
0x17f9   :  { %v2222_v23 = vadd.f32 %v2218_v16, %v2169_v21  ;;  %v2223_v37 = vadd.f32 %v2219_v15, %v2170_v54 }
0x17fb   :  { %v2476_v22 = vmul.f32 -1.442695, %v2222_v23  ;;  %v2477_v52 = vmul.f32 -1.442695, %v2223_v37 }
0x17fd   :  { %2643 = vpow2.f32 %v2476_v22 }
0x17fe   :  { %2645 = vpow2.f32 %v2477_v52 }
0x1803   :  { %v2644_v25 = vpop.eup %2643 }
0x1804   :  { %v2646_v26 = vpop.eup %2645  ;;  %v2230_v28 = vadd.f32 1.0, %v2644_v25 }
0x1805   :  { %v2231_v29 = vadd.f32 1.0, %v2646_v26 }
0x1806   :  { %2647 = vrcp.f32 %v2230_v28  ;;  %v2243_v34 = vand.u32 2147483648, %v2230_v28  ;;  %v2241_v57 = vand.u32 2147483647, %v2230_v28  ;;  %vm2237_vm13 = vweird.f32 %v2230_v28 }
0x1807   :  { %2649 = vrcp.f32 %v2231_v29  ;;  %v2258_v58 = vand.u32 2147483648, %v2231_v29  ;;  %v2256_v60 = vand.u32 2147483647, %v2231_v29  ;;  %vm2252_vm15 = vweird.f32 %v2231_v29 }
0x1808   :  { %v2244_v62 = vor.u32 1.1754944e-38, %v2243_v34  ;;  %vm2242_vm0 = vcmp.eq.f32.partialorder %v2241_v57, 8.507059e+37 }
0x1809   :  { %v2259_v24 = vor.u32 1.1754944e-38, %v2258_v58  ;;  %vm2257_vm10 = vcmp.eq.f32.partialorder %v2256_v60, 8.507059e+37 }
0x180c   :  { %v2648_v30 = vpop.eup %2647 }
0x180d   :  { %v2650_v31 = vpop.eup %2649  ;;  %v2233_v53 = vmul.f32 %v2648_v30, %v2230_v28  ;;  %vm2238_vm5 = vweird.f32 %v2648_v30 }
0x180e   :  { %v2248_v33 = vmul.f32 %v2650_v31, %v2231_v29  ;;  %vm2253_vm12 = vweird.f32 %v2650_v31  ;;  %vm2239_vm14 = vmor %vm2237_vm13, %vm2238_vm5 }
0x180f   :  { %v2234_v32 = vsub.f32 1.0, %v2233_v53  ;;  %vm2254_vm1 = vmor %vm2252_vm15, %vm2253_vm12 }
0x1810   :  { %v2249_v35 = vsub.f32 1.0, %v2248_v33 }
0x1811   :  { %v2235_v56 = vmul.f32 %v2648_v30, %v2234_v32 }
0x1812   :  { %v2250_v59 = vmul.f32 %v2650_v31, %v2249_v35 }
0x1813   :  { %v2236_v61 = vadd.f32 %v2648_v30, %v2235_v56 }
0x1814   :  { %v2251_v19 = vadd.f32 %v2650_v31, %v2250_v59 }
0x1815   :  { %v2240_v14 = vsel %vm2239_vm14, %v2648_v30, %v2236_v61 }
0x1816   :  { %v2245_v27 = vsel %vm2242_vm0, %v2244_v62, %v2240_v14  ;;  %v2255_v39 = vsel %vm2254_vm1, %v2650_v31, %v2251_v19 }
0x1817   :  { %v2260_v40 = vsel %vm2257_vm10, %v2259_v24, %v2255_v39  ;;  %v2271_v41 = vmul.f32 %v2269_v63, %v2245_v27 }
0x1818   :  { %v2263_v42 = vmul.f32 2.0, %v2260_v40 }
0x181a   :  { %v2479_v36 = vadd.f32 -1.0, %v2263_v42 }
0x181c   :  { %v2267_v43 = vsel %vm129_vm8, %v2479_v36, %v2260_v40  ;;  %vm2351_vm8 = vcmask 25600  }
0x181d   :  { %v2272_v44 = vmul.f32 %v2267_v43, %v2245_v27 }
0x181f   :  { %2274 = vrot.lane.b32.xlu2 %v2272_v44, %s2813_s5 }
0x1827   :  { %1710 = vrot.lane.b32.xlu2 %v3423_v55, %s2813_s5  ;;  %v2289_v55 = vld [vmem:[%s3576_s10 + $0x20] sm:$0xff] }
0x1828   :  { %2337 = vmatpush.msra.mxu1 %v2289_v55 }
0x182a   :  { %2338 = vmatpush.msra.mxu1 %v2288_v49 }
0x182c   :  { %2339 = vmatpush.msra.mxu1 %v2287_v51 }
0x182e   :  { %2340 = vmatpush.msra.mxu1 %v2286_v18 }
0x182f   :  { %2165 = vrot.lane.b32.xlu2 %v3507_v7, %s2813_s5  ;;  %v2492_v7 = vld [vmem:[%s3578_s12] ss:$0 sm:$0xff] }
0x1830   :  { %2341 = vmatpush.msra.mxu1 %v2285_v1 }
0x1879   :  { %v2275_v17 = vpop.permute.xlu2 %2274 }
0x187a   :  { %v2277_v48 = vadd.f32 %v2275_v17, %v2271_v41 }
0x187c   :  { %2651 = vtanh.f32 %v2277_v48 }
0x1881   :  { %v1711_v50 = vpop.permute.xlu2 %1710 }
0x1882   :  { %v2652_v20 = vpop.eup %2651  ;;  %1713 = vst.msk [vmem:[#allocation3] sm:$0x30] %vm623_vm6, %v1711_v50 }
0x1883   :  { %v2279_v0 = vmul.f32 %v2652_v20, %v2267_v43 }
0x1885   :  { %v2321_v2 = vrot.slane %v2279_v0, 6 }
0x1887   :  { %2322 = vrot.lane.b32.xlu0 %v2321_v2, %s2813_s5 }
0x1889   :  { %v2166_v3 = vpop.permute.xlu2 %2165 }
0x188a   :  { %2168 = vst.msk [vmem:[#allocation3 + $0x8] sm:$0x30] %vm623_vm6, %v2166_v3 }
0x188f   :  { %1826 = vrot.lane.b32.xlu0 %v3449_v38, %s2813_s5 }
0x1897   :  { %2281 = vrot.lane.b32.xlu0 %v2279_v0, %s2813_s5  ;;  %s2360_s5 = sshll.u32 %s3579_s13, 4  ;;  %s2361_s5 = int_to_ptr.hbm [resolvable:$true] %s2360_s5 }
0x18f9   :  { %v2323_v4 = vpop.permute.xlu0 %2322 }
0x18fa   :  { %2481 = vmatmul.msk.f32.vlgmr.msra.gmra.mxu1 %vm289_vm11, %v2323_v4 }
0x1901   :  { %v1827_v5 = vpop.permute.xlu0 %1826 }
0x1902   :  { %1829 = vst.msk [vmem:[#allocation3] sm:$0xc0] %vm740_vm2, %v1827_v5 }
0x1909   :  { %v2282_v6 = vpop.permute.xlu0 %2281 }
0x190a   :  { %2284 = vst.msk [vmem:[#allocation3 + $0x8] sm:$0xc0] %vm740_vm2, %v2282_v6 }
0x1977   :  { %v2343_v9 = vpop.f32.mrf.mxu1 }
0x1978   :  { %v2344_v38 = vadd.f32 %v2343_v9, %v2318_v8 }
0x197a   :  { %v2350_v10 = vadd.f32 %v2492_v7, %v2344_v38 }
0x197c   :  { %2352 = vst.msk [vmem:[#allocation14] sm:$0x3] %vm2351_vm8, %v2350_v10 }
0x197d   :  { %2363 = dma.vmem_to_hbm [thread:$0]  %s2359_s15, 32, %s2361_s5, [#allocation7]  }
0x197e   :  { %2803 = dma.done.wait [#allocation7], 32  }
0x197f   :  { %2804 = vsyncadd [#allocation7], 4294967264 }
0x1980   :  { %2368 = vsyncpa [#allocation6], 1 }
0x1981   :  { %2369 = vsyncpa [#allocation9], 1 }
0x1982   :  { %2370 = vsyncpa [#allocation12], 1 }
0x1983   :  { %2371 = vsyncpa [#allocation7], 1 }

</bundles_post_ra>
